<compile_context>
chip_gen: v6e
topology: v6e:2x2x1
jax: 0.10.0
libtpu: 0.0.40
codegen_flags: <defaults>
</compile_context>

<pallas_src>
import functools

import jax
import jax.numpy as jnp
from jax.experimental import pallas as pl
from jax.experimental.pallas import tpu as pltpu


# ----------------------------- Pallas kernel --------------------------------

def _pipe_stage_kernel(
    x_ref,                                   # [TM, d_in_p]       bf16
    w_pre_ref,                               # [d_in_p, d_model_p] bf16
    w1_0_ref, w2_0_ref,                      # block 0 weights     bf16
    w1_1_ref, w2_1_ref,                      # block 1 weights     bf16
    bias_dm_ref,                             # [8, d_model_p] f32: rows 0..4 =
                                             #   b_pre, b2_0, b2_1, gamma, beta
    bias_ff_ref,                             # [8, d_ff_p]   f32: rows 0..1 =
                                             #   b1_0, b1_1
    out_ref,                                 # [TM, d_model_p]
    *, d_model: int,
):
    f32 = jnp.float32
    bf16 = jnp.bfloat16

    b_pre = bias_dm_ref[0:1, :]
    b2_0 = bias_dm_ref[1:2, :]
    b2_1 = bias_dm_ref[2:3, :]
    gamma = bias_dm_ref[3:4, :]
    beta = bias_dm_ref[4:5, :]
    b1_0 = bias_ff_ref[0:1, :]
    b1_1 = bias_ff_ref[1:2, :]

    # ---- pre_layer: Linear(d_in -> d_model) ----
    # x is already bf16; bf16 x bf16 MXU operands, f32 accumulation.
    h = jnp.dot(x_ref[...], w_pre_ref[...], preferred_element_type=f32) + b_pre

    # ---- blocks: 2 residual MLP blocks ----
    def mlp_block(h, w1_ref, b1, w2_ref, b2):
        z = jnp.dot(h.astype(bf16), w1_ref[...], preferred_element_type=f32) + b1
        z = jax.nn.gelu(z, approximate=True)            # tanh-approx GELU (EUP)
        z = jnp.dot(z.astype(bf16), w2_ref[...], preferred_element_type=f32) + b2
        return h + z                                    # residual (f32)

    h = mlp_block(h, w1_0_ref, b1_0, w2_0_ref, b2_0)
    h = mlp_block(h, w1_1_ref, b1_1, w2_1_ref, b2_1)

    # ---- post_layer: LayerNorm over the ORIGINAL d_model features ----
    # Single-pass: var = E[x^2] - mean^2, dividing by the true d_model.
    # CORRECTNESS NOTE: this relies on padded lanes of h being exactly zero.
    # That holds because all padded weights/biases are zero-padded, the bf16
    # cast preserves 0 and gelu(0) == 0 for the tanh approximation.  If any of
    # those change (nonzero bias padding, activation with f(0) != 0), the
    # padded lanes would corrupt mean/var.
    inv_d = f32(1.0 / d_model)
    mean = jnp.sum(h, axis=-1, keepdims=True) * inv_d
    meansq = jnp.sum(h * h, axis=-1, keepdims=True) * inv_d
    var = meansq - mean * mean
    inv = jax.lax.rsqrt(var + 1e-5)
    out = (h - mean) * inv * gamma + beta
    out_ref[...] = out.astype(out_ref.dtype)


# --------------------------- one-time param prep ------------------------------

def _round_up(x, m):
    return (x + m - 1) // m * m


def _lane_align(dim):
    # v6e/v7x MXUs are 2x256x256: when the real dim is >= 256, pad K/N up to a
    # multiple of 256 so contractions fill the array.  128 otherwise (and 128
    # is already native for v5e's 4x128x128 MXU).
    return _round_up(dim, 256 if dim >= 256 else 128)


def _pad2(a, rows, cols, dtype=None):
    a = jnp.pad(a, ((0, rows - a.shape[0]), (0, cols - a.shape[1])))
    return a if dtype is None else a.astype(dtype)


def prepare_pipe_params(params):
    """One-time (stage-init) padding + bf16 cast of all parameters.

    Keeping this out of pipe_module_forward removes all per-call weight
    re-pad/re-cast HBM traffic from the steady-state path.
    """
    bf16, f32 = jnp.bfloat16, jnp.float32
    d_in, d_model = params["w_pre"].shape
    d_ff = params["w1_0"].shape[1]
    d_in_p = _lane_align(d_in)
    d_model_p = _lane_align(d_model)
    d_ff_p = _lane_align(d_ff)

    # Pack the d_model-width f32 rows into one (8, d_model_p) tile and the
    # d_ff-width rows into one (8, d_ff_p) tile (fewer small DMAs / refs).
    bias_dm = jnp.zeros((8, d_model_p), f32)
    bias_dm = bias_dm.at[0, :d_model].set(params["b_pre"].reshape(-1))
    bias_dm = bias_dm.at[1, :d_model].set(params["b2_0"].reshape(-1))
    bias_dm = bias_dm.at[2, :d_model].set(params["b2_1"].reshape(-1))
    bias_dm = bias_dm.at[3, :d_model].set(params["gamma"].reshape(-1))
    bias_dm = bias_dm.at[4, :d_model].set(params["beta"].reshape(-1))

    bias_ff = jnp.zeros((8, d_ff_p), f32)
    bias_ff = bias_ff.at[0, :d_ff].set(params["b1_0"].reshape(-1))
    bias_ff = bias_ff.at[1, :d_ff].set(params["b1_1"].reshape(-1))

    weights = (
        _pad2(params["w_pre"], d_in_p, d_model_p, bf16),
        _pad2(params["w1_0"], d_model_p, d_ff_p, bf16),
        _pad2(params["w2_0"], d_ff_p, d_model_p, bf16),
        _pad2(params["w1_1"], d_model_p, d_ff_p, bf16),
        _pad2(params["w2_1"], d_ff_p, d_model_p, bf16),
        bias_dm,
        bias_ff,
    )
    weights = jax.tree_util.tree_map(jax.block_until_ready, weights)
    return {
        "weights": weights,
        "dims": (d_in, d_model, d_ff, d_in_p, d_model_p, d_ff_p),
    }


# ------------------------------ forward wrapper -------------------------------

def _choose_tile_m(tokens):
    # Single-TC chips (v5e/v6e): few large row tiles (per-step overhead ~0.35us
    # + output writeback).  v7x megacore: keep an even number (>=2) of
    # "parallel" steps so both TensorCores get work.
    if tokens <= 256:
        return _round_up(tokens, 8)          # one step
    for tm in (1024, 512, 256):
        if _round_up(tokens, tm) // tm >= 2:
            return tm
    return 256


def pipe_module_forward(x, prepared, *, tile_m=None, out_dtype=jnp.float32):
    """x: [tokens, d_in] float32/bfloat16.  Returns [tokens, d_model] out_dtype.

    `prepared` comes from prepare_pipe_params(params).  Pass out_dtype=bf16 if
    the downstream pipeline stage accepts bf16 (halves output HBM writes).
    """
    d_in, d_model, d_ff, d_in_p, d_model_p, d_ff_p = prepared["dims"]
    weights = prepared["weights"]
    tokens = x.shape[0]
    assert x.shape[1] == d_in

    if tile_m is None:
        tile_m = _choose_tile_m(tokens)
    tokens_p = _round_up(tokens, tile_m)
    grid = (tokens_p // tile_m,)

    bf16 = jnp.bfloat16
    # x is only an MXU operand: cast to bf16 here (numerically identical to an
    # in-kernel cast) so the per-step input DMA is half the bytes.
    x_p = _pad2(x, tokens_p, d_in_p, bf16)

    def row_spec(dim):
        return pl.BlockSpec((tile_m, dim), lambda i: (i, 0))

    # Grid-invariant, fully-resident weight blocks.  Single-buffer them: the
    # block index never changes, so a second buffer would be pure VMEM waste
    # (matters most on v7x's 64 MiB/TC VMEM).
    # TODO(synk): once total bf16 weight bytes exceed ~half the VMEM budget
    # (~24-32 MiB on v7x, ~48-64 MiB on v5e/v6e), add an "arbitrary" grid axis
    # over d_ff (or stream weight chunks with pltpu.emit_pipeline) with an f32
    # VMEM accumulator instead of whole-matrix weight blocks.
    weight_specs = [
        pl.BlockSpec(w.shape, lambda i: (0, 0), pipeline_mode=pl.Buffered(1))
        for w in weights
    ]

    out_itemsize = jnp.dtype(out_dtype).itemsize
    weight_bytes = sum(int(w.size) * jnp.dtype(w.dtype).itemsize for w in weights)

    # VMEM need: single-buffered weights + double-buffered x/out tiles + a few
    # live f32 activation intermediates; 2x headroom, capped below the v7x
    # per-TC ceiling.
    vmem_need = (
        weight_bytes
        + 2 * tile_m * d_in_p * 2
        + 2 * tile_m * d_model_p * out_itemsize
        + 4 * tile_m * max(d_model_p, d_ff_p) * 4
    )
    vmem_limit = int(min(48 * 1024 * 1024, max(2 * vmem_need, 16 * 1024 * 1024)))

    # Advisory cost estimate on the REAL (unpadded) dims so it does not skew
    # XLA scheduling around the call.
    flops = 2 * tokens * (d_in * d_model + 2 * (d_model * d_ff + d_ff * d_model))
    transcendentals = tokens * (2 * d_ff + 1)          # tanh in GELU + rsqrt
    bytes_accessed = int(
        int(x_p.size) * 2 + tokens_p * d_model_p * out_itemsize + weight_bytes
    )

    out_p = pl.pallas_call(
        functools.partial(_pipe_stage_kernel, d_model=d_model),
        out_shape=jax.ShapeDtypeStruct((tokens_p, d_model_p), out_dtype),
        grid_spec=pltpu.PrefetchScalarGridSpec(
            num_scalar_prefetch=0,
            grid=grid,
            in_specs=[row_spec(d_in_p)] + weight_specs,
            out_specs=row_spec(d_model_p),
        ),
        compiler_params=pltpu.CompilerParams(
            dimension_semantics=("parallel",),
            vmem_limit_bytes=vmem_limit,
        ),
        cost_estimate=pl.CostEstimate(
            flops=flops,
            transcendentals=transcendentals,
            bytes_accessed=bytes_accessed,
        ),
    )(x_p, *weights)

    return out_p[:tokens, :d_model]


# -------------------------- pure-JAX reference --------------------------------

def pipe_module_reference(x, params):
    """Same forward, same precision policy (bf16 matmul operands, f32 accum)."""
    f32, bf16 = jnp.float32, jnp.bfloat16

    def mm(a, w):
        return jnp.dot(a.astype(bf16), w.astype(bf16), preferred_element_type=f32)

    h = mm(x.astype(f32), params["w_pre"]) + params["b_pre"]

    def mlp(h, w1, b1, w2, b2):
        z = jax.nn.gelu(mm(h, w1) + b1, approximate=True)
        return h + mm(z, w2) + b2

    h = mlp(h, params["w1_0"], params["b1_0"], params["w2_0"], params["b2_0"])
    h = mlp(h, params["w1_1"], params["b1_1"], params["w2_1"], params["b2_1"])
    mean = jnp.mean(h, axis=-1, keepdims=True)
    var = jnp.mean(jnp.square(h - mean), axis=-1, keepdims=True)
    return (h - mean) * jax.lax.rsqrt(var + 1e-5) * params["gamma"] + params["beta"]


# ------------------------------- main -----------------------------------------

def make_params(key, d_in, d_model, d_ff):
    ks = jax.random.split(key, 6)
    s = lambda fan_in: 1.0 / jnp.sqrt(jnp.float32(fan_in))
    return {
        "w_pre": jax.random.normal(ks[0], (d_in, d_model), jnp.float32) * s(d_in),
        "b_pre": jnp.zeros((1, d_model), jnp.float32),
        "w1_0":  jax.random.normal(ks[1], (d_model, d_ff), jnp.float32) * s(d_model),
        "b1_0":  jnp.zeros((1, d_ff), jnp.float32),
        "w2_0":  jax.random.normal(ks[2], (d_ff, d_model), jnp.float32) * s(d_ff),
        "b2_0":  jnp.zeros((1, d_model), jnp.float32),
        "w1_1":  jax.random.normal(ks[3], (d_model, d_ff), jnp.float32) * s(d_model),
        "b1_1":  jnp.zeros((1, d_ff), jnp.float32),
        "w2_1":  jax.random.normal(ks[4], (d_ff, d_model), jnp.float32) * s(d_ff),
        "b2_1":  jnp.zeros((1, d_model), jnp.float32),
        "gamma": jnp.ones((1, d_model), jnp.float32),
        "beta":  jnp.zeros((1, d_model), jnp.float32),
    }


if __name__ == "__main__":
    # batch=2, seq=256 -> 512 tokens; d_in=32, d_model=32, d_ff=64 (the prep
    # step lane-pads features to 128).  tile_m=256 -> 2 "parallel" grid steps
    # (both v7x TensorCores get work; fine on single-TC v5e/v6e too).
    batch, seq, d_in, d_model, d_ff = 2, 256, 32, 32, 64

    key = jax.random.PRNGKey(0)
    kx, kp = jax.random.split(key)
    x = jax.random.normal(kx, (batch * seq, d_in), jnp.float32)
    params = make_params(kp, d_in, d_model, d_ff)

    # TODO(synk): PipeModule's make_viewless_tensor / autograd-graph bookkeeping
    # has no Pallas equivalent (it is a no-op on forward values).

    prepared = prepare_pipe_params(params)   # one-time, off the steady-state path
    out = pipe_module_forward(x, prepared, tile_m=256)
    out = jax.block_until_ready(out)

    ref = pipe_module_reference(x, params)
    assert out.shape == (batch * seq, d_model)
    assert jnp.allclose(out, ref, atol=1e-3, rtol=1e-3), "mismatch vs reference"

    print("KERNEL_OK")
</pallas_src>

<mosaic_0001>
module attributes {stable_mosaic.version = 11 : i64} {
  func.func @_pipe_stage_kernel(%arg0: i32, %arg1: memref<256x128xbf16, #tpu.memory_space<vmem>>, %arg2: memref<128x128xbf16, #tpu.memory_space<vmem>>, %arg3: memref<128x128xbf16, #tpu.memory_space<vmem>>, %arg4: memref<128x128xbf16, #tpu.memory_space<vmem>>, %arg5: memref<128x128xbf16, #tpu.memory_space<vmem>>, %arg6: memref<128x128xbf16, #tpu.memory_space<vmem>>, %arg7: memref<8x128xf32, #tpu.memory_space<vmem>>, %arg8: memref<8x128xf32, #tpu.memory_space<vmem>>, %arg9: memref<256x128xf32, #tpu.memory_space<vmem>>) attributes {dimension_semantics = [#tpu.dimension_semantics<parallel>], iteration_bounds = array<i64: 2>, scalar_prefetch = 0 : i64, scratch_operands = 0 : i64, tpu.core_type = #tpu.core_type<tc>, window_params = [{transform_indices = @transform_0, window_bounds = array<i64: 256, 128>}, {pipeline_mode = #tpu.pipeline_mode<synchronous>, transform_indices = @transform_1, window_bounds = array<i64: 128, 128>}, {pipeline_mode = #tpu.pipeline_mode<synchronous>, transform_indices = @transform_2, window_bounds = array<i64: 128, 128>}, {pipeline_mode = #tpu.pipeline_mode<synchronous>, transform_indices = @transform_3, window_bounds = array<i64: 128, 128>}, {pipeline_mode = #tpu.pipeline_mode<synchronous>, transform_indices = @transform_4, window_bounds = array<i64: 128, 128>}, {pipeline_mode = #tpu.pipeline_mode<synchronous>, transform_indices = @transform_5, window_bounds = array<i64: 128, 128>}, {pipeline_mode = #tpu.pipeline_mode<synchronous>, transform_indices = @transform_6, window_bounds = array<i64: 8, 128>}, {pipeline_mode = #tpu.pipeline_mode<synchronous>, transform_indices = @transform_7, window_bounds = array<i64: 8, 128>}, {transform_indices = @transform_8, window_bounds = array<i64: 256, 128>}]} {
    %c0 = arith.constant 0 : index
    %c0_0 = arith.constant 0 : index
    %0 = vector.load %arg7[%c0, %c0_0] : memref<8x128xf32, #tpu.memory_space<vmem>>, vector<1x128xf32>
    %c1 = arith.constant 1 : index
    %c0_1 = arith.constant 0 : index
    %1 = vector.load %arg7[%c1, %c0_1] : memref<8x128xf32, #tpu.memory_space<vmem>>, vector<1x128xf32>
    %c2 = arith.constant 2 : index
    %c0_2 = arith.constant 0 : index
    %2 = vector.load %arg7[%c2, %c0_2] : memref<8x128xf32, #tpu.memory_space<vmem>>, vector<1x128xf32>
    %c3 = arith.constant 3 : index
    %c0_3 = arith.constant 0 : index
    %3 = vector.load %arg7[%c3, %c0_3] : memref<8x128xf32, #tpu.memory_space<vmem>>, vector<1x128xf32>
    %c4 = arith.constant 4 : index
    %c0_4 = arith.constant 0 : index
    %4 = vector.load %arg7[%c4, %c0_4] : memref<8x128xf32, #tpu.memory_space<vmem>>, vector<1x128xf32>
    %c0_5 = arith.constant 0 : index
    %c0_6 = arith.constant 0 : index
    %5 = vector.load %arg8[%c0_5, %c0_6] : memref<8x128xf32, #tpu.memory_space<vmem>>, vector<1x128xf32>
    %c1_7 = arith.constant 1 : index
    %c0_8 = arith.constant 0 : index
    %6 = vector.load %arg8[%c1_7, %c0_8] : memref<8x128xf32, #tpu.memory_space<vmem>>, vector<1x128xf32>
    %c0_9 = arith.constant 0 : index
    %c0_10 = arith.constant 0 : index
    %7 = vector.load %arg1[%c0_9, %c0_10] : memref<256x128xbf16, #tpu.memory_space<vmem>>, vector<256x128xbf16>
    %c0_11 = arith.constant 0 : index
    %c0_12 = arith.constant 0 : index
    %8 = vector.load %arg2[%c0_11, %c0_12] : memref<128x128xbf16, #tpu.memory_space<vmem>>, vector<128x128xbf16>
    %cst = arith.constant dense<0.000000e+00> : vector<256x128xf32>
    %9 = tpu.matmul %7, %8, %cst {dimension_numbers = #tpu.dot_dimension_numbers<[1], [0], [0], [1], [0, 0, 1, 1], [], []>} : vector<256x128xbf16>, vector<128x128xbf16>, vector<256x128xf32> -> vector<256x128xf32>
    %10 = vector.broadcast %0 : vector<1x128xf32> to vector<256x128xf32>
    %11 = arith.addf %9, %10 : vector<256x128xf32>
    %12 = arith.truncf %11 : vector<256x128xf32> to vector<256x128xbf16>
    %c0_13 = arith.constant 0 : index
    %c0_14 = arith.constant 0 : index
    %13 = vector.load %arg3[%c0_13, %c0_14] : memref<128x128xbf16, #tpu.memory_space<vmem>>, vector<128x128xbf16>
    %cst_15 = arith.constant dense<0.000000e+00> : vector<256x128xf32>
    %14 = tpu.matmul %12, %13, %cst_15 {dimension_numbers = #tpu.dot_dimension_numbers<[1], [0], [0], [1], [0, 0, 1, 1], [], []>} : vector<256x128xbf16>, vector<128x128xbf16>, vector<256x128xf32> -> vector<256x128xf32>
    %15 = vector.broadcast %5 : vector<1x128xf32> to vector<256x128xf32>
    %16 = arith.addf %14, %15 : vector<256x128xf32>
    %17 = arith.mulf %16, %16 : vector<256x128xf32>
    %18 = arith.mulf %16, %17 : vector<256x128xf32>
    %cst_16 = arith.constant 4.471500e-02 : f32
    %19 = vector.broadcast %cst_16 : f32 to vector<256x128xf32>
    %20 = arith.mulf %19, %18 : vector<256x128xf32>
    %21 = arith.addf %16, %20 : vector<256x128xf32>
    %cst_17 = arith.constant 0.797884583 : f32
    %22 = vector.broadcast %cst_17 : f32 to vector<256x128xf32>
    %23 = arith.mulf %22, %21 : vector<256x128xf32>
    %24 = math.tanh %23 : vector<256x128xf32>
    %cst_18 = arith.constant 1.000000e+00 : f32
    %25 = vector.broadcast %cst_18 : f32 to vector<256x128xf32>
    %26 = arith.addf %25, %24 : vector<256x128xf32>
    %cst_19 = arith.constant 5.000000e-01 : f32
    %27 = vector.broadcast %cst_19 : f32 to vector<256x128xf32>
    %28 = arith.mulf %27, %26 : vector<256x128xf32>
    %29 = arith.mulf %16, %28 : vector<256x128xf32>
    %30 = arith.truncf %29 : vector<256x128xf32> to vector<256x128xbf16>
    %c0_20 = arith.constant 0 : index
    %c0_21 = arith.constant 0 : index
    %31 = vector.load %arg4[%c0_20, %c0_21] : memref<128x128xbf16, #tpu.memory_space<vmem>>, vector<128x128xbf16>
    %cst_22 = arith.constant dense<0.000000e+00> : vector<256x128xf32>
    %32 = tpu.matmul %30, %31, %cst_22 {dimension_numbers = #tpu.dot_dimension_numbers<[1], [0], [0], [1], [0, 0, 1, 1], [], []>} : vector<256x128xbf16>, vector<128x128xbf16>, vector<256x128xf32> -> vector<256x128xf32>
    %33 = vector.broadcast %1 : vector<1x128xf32> to vector<256x128xf32>
    %34 = arith.addf %32, %33 : vector<256x128xf32>
    %35 = arith.addf %11, %34 : vector<256x128xf32>
    %36 = arith.truncf %35 : vector<256x128xf32> to vector<256x128xbf16>
    %c0_23 = arith.constant 0 : index
    %c0_24 = arith.constant 0 : index
    %37 = vector.load %arg5[%c0_23, %c0_24] : memref<128x128xbf16, #tpu.memory_space<vmem>>, vector<128x128xbf16>
    %cst_25 = arith.constant dense<0.000000e+00> : vector<256x128xf32>
    %38 = tpu.matmul %36, %37, %cst_25 {dimension_numbers = #tpu.dot_dimension_numbers<[1], [0], [0], [1], [0, 0, 1, 1], [], []>} : vector<256x128xbf16>, vector<128x128xbf16>, vector<256x128xf32> -> vector<256x128xf32>
    %39 = vector.broadcast %6 : vector<1x128xf32> to vector<256x128xf32>
    %40 = arith.addf %38, %39 : vector<256x128xf32>
    %41 = arith.mulf %40, %40 : vector<256x128xf32>
    %42 = arith.mulf %40, %41 : vector<256x128xf32>
    %cst_26 = arith.constant 4.471500e-02 : f32
    %43 = vector.broadcast %cst_26 : f32 to vector<256x128xf32>
    %44 = arith.mulf %43, %42 : vector<256x128xf32>
    %45 = arith.addf %40, %44 : vector<256x128xf32>
    %cst_27 = arith.constant 0.797884583 : f32
    %46 = vector.broadcast %cst_27 : f32 to vector<256x128xf32>
    %47 = arith.mulf %46, %45 : vector<256x128xf32>
    %48 = math.tanh %47 : vector<256x128xf32>
    %cst_28 = arith.constant 1.000000e+00 : f32
    %49 = vector.broadcast %cst_28 : f32 to vector<256x128xf32>
    %50 = arith.addf %49, %48 : vector<256x128xf32>
    %cst_29 = arith.constant 5.000000e-01 : f32
    %51 = vector.broadcast %cst_29 : f32 to vector<256x128xf32>
    %52 = arith.mulf %51, %50 : vector<256x128xf32>
    %53 = arith.mulf %40, %52 : vector<256x128xf32>
    %54 = arith.truncf %53 : vector<256x128xf32> to vector<256x128xbf16>
    %c0_30 = arith.constant 0 : index
    %c0_31 = arith.constant 0 : index
    %55 = vector.load %arg6[%c0_30, %c0_31] : memref<128x128xbf16, #tpu.memory_space<vmem>>, vector<128x128xbf16>
    %cst_32 = arith.constant dense<0.000000e+00> : vector<256x128xf32>
    %56 = tpu.matmul %54, %55, %cst_32 {dimension_numbers = #tpu.dot_dimension_numbers<[1], [0], [0], [1], [0, 0, 1, 1], [], []>} : vector<256x128xbf16>, vector<128x128xbf16>, vector<256x128xf32> -> vector<256x128xf32>
    %57 = vector.broadcast %2 : vector<1x128xf32> to vector<256x128xf32>
    %58 = arith.addf %56, %57 : vector<256x128xf32>
    %59 = arith.addf %35, %58 : vector<256x128xf32>
    %cst_33 = arith.constant dense<0.000000e+00> : vector<256xf32>
    %60 = vector.multi_reduction <add>, %59, %cst_33 [1] : vector<256x128xf32> to vector<256xf32>
    %61 = vector.shape_cast %60 : vector<256xf32> to vector<256x1xf32>
    %cst_34 = arith.constant 3.125000e-02 : f32
    %62 = vector.broadcast %cst_34 : f32 to vector<256x1xf32>
    %63 = arith.mulf %61, %62 : vector<256x1xf32>
    %64 = arith.mulf %59, %59 : vector<256x128xf32>
    %cst_35 = arith.constant dense<0.000000e+00> : vector<256xf32>
    %65 = vector.multi_reduction <add>, %64, %cst_35 [1] : vector<256x128xf32> to vector<256xf32>
    %66 = vector.shape_cast %65 : vector<256xf32> to vector<256x1xf32>
    %cst_36 = arith.constant 3.125000e-02 : f32
    %67 = vector.broadcast %cst_36 : f32 to vector<256x1xf32>
    %68 = arith.mulf %66, %67 : vector<256x1xf32>
    %69 = arith.mulf %63, %63 : vector<256x1xf32>
    %70 = arith.subf %68, %69 : vector<256x1xf32>
    %cst_37 = arith.constant 9.99999974E-6 : f32
    %71 = vector.broadcast %cst_37 : f32 to vector<256x1xf32>
    %72 = arith.addf %70, %71 : vector<256x1xf32>
    %73 = math.rsqrt %72 : vector<256x1xf32>
    %74 = vector.broadcast %63 : vector<256x1xf32> to vector<256x128xf32>
    %75 = arith.subf %59, %74 : vector<256x128xf32>
    %76 = vector.broadcast %73 : vector<256x1xf32> to vector<256x128xf32>
    %77 = arith.mulf %75, %76 : vector<256x128xf32>
    %78 = vector.broadcast %3 : vector<1x128xf32> to vector<256x128xf32>
    %79 = arith.mulf %77, %78 : vector<256x128xf32>
    %80 = vector.broadcast %4 : vector<1x128xf32> to vector<256x128xf32>
    %81 = arith.addf %79, %80 : vector<256x128xf32>
    %c0_38 = arith.constant 0 : index
    %c0_39 = arith.constant 0 : index
    %82 = vector.load %arg9[%c0_38, %c0_39] : memref<256x128xf32, #tpu.memory_space<vmem>>, vector<256x128xf32>
    tpu.vector_store %arg9[%c0_38, %c0_39], %81 {strides = array<i32>} : memref<256x128xf32, #tpu.memory_space<vmem>>, vector<256x128xf32>,
    return
  }
  func.func @transform_0(%arg0: i32) -> (i32, i32) {
    %c0_i32 = arith.constant 0 : i32
    %c0_i32_0 = arith.constant 0 : i32
    return %arg0, %c0_i32 : i32, i32
  }
  func.func @transform_1(%arg0: i32) -> (i32, i32) {
    %c0_i32 = arith.constant 0 : i32
    %c0_i32_0 = arith.constant 0 : i32
    %c0_i32_1 = arith.constant 0 : i32
    return %c0_i32, %c0_i32_0 : i32, i32
  }
  func.func @transform_2(%arg0: i32) -> (i32, i32) {
    %c0_i32 = arith.constant 0 : i32
    %c0_i32_0 = arith.constant 0 : i32
    %c0_i32_1 = arith.constant 0 : i32
    return %c0_i32, %c0_i32_0 : i32, i32
  }
  func.func @transform_3(%arg0: i32) -> (i32, i32) {
    %c0_i32 = arith.constant 0 : i32
    %c0_i32_0 = arith.constant 0 : i32
    %c0_i32_1 = arith.constant 0 : i32
    return %c0_i32, %c0_i32_0 : i32, i32
  }
  func.func @transform_4(%arg0: i32) -> (i32, i32) {
    %c0_i32 = arith.constant 0 : i32
    %c0_i32_0 = arith.constant 0 : i32
    %c0_i32_1 = arith.constant 0 : i32
    return %c0_i32, %c0_i32_0 : i32, i32
  }
  func.func @transform_5(%arg0: i32) -> (i32, i32) {
    %c0_i32 = arith.constant 0 : i32
    %c0_i32_0 = arith.constant 0 : i32
    %c0_i32_1 = arith.constant 0 : i32
    return %c0_i32, %c0_i32_0 : i32, i32
  }
  func.func @transform_6(%arg0: i32) -> (i32, i32) {
    %c0_i32 = arith.constant 0 : i32
    %c0_i32_0 = arith.constant 0 : i32
    %c0_i32_1 = arith.constant 0 : i32
    return %c0_i32, %c0_i32_0 : i32, i32
  }
  func.func @transform_7(%arg0: i32) -> (i32, i32) {
    %c0_i32 = arith.constant 0 : i32
    %c0_i32_0 = arith.constant 0 : i32
    %c0_i32_1 = arith.constant 0 : i32
    return %c0_i32, %c0_i32_0 : i32, i32
  }
  func.func @transform_8(%arg0: i32) -> (i32, i32) {
    %c0_i32 = arith.constant 0 : i32
    %c0_i32_0 = arith.constant 0 : i32
    return %arg0, %c0_i32 : i32, i32
  }
}

</mosaic_0001>

<bundles_post_ra>
// kernel: tpu_custom_call.1
= control target key start
LH: loop header
LB: loop body
LE: loop exit
PB: predicated region body
PF: predicated region fallthrough
CT: control target
= control target key end

     0   :  { %s5882_s0 = inlined_call_operand.hbm [shape: bf16[512,128], index: 0, kind: input, shape index: {}]   ;;  %s5883_s1 = inlined_call_operand.hbm [shape: bf16[128,128], index: 1, kind: input, shape index: {}]   ;;  %s5884_s2 = inlined_call_operand.hbm [shape: bf16[128,128], index: 2, kind: input, shape index: {}]   ;;  %s5885_s3 = inlined_call_operand.hbm [shape: bf16[128,128], index: 3, kind: input, shape index: {}]   ;;  %s5886_s4 = inlined_call_operand.hbm [shape: bf16[128,128], index: 4, kind: input, shape index: {}]   ;;  %s5887_s5 = inlined_call_operand.hbm [shape: bf16[128,128], index: 5, kind: input, shape index: {}]   ;;  %s5888_s6 = inlined_call_operand.vmem [shape: f32[8,128], index: 6, kind: input, shape index: {}]   ;;  %s5889_s7 = inlined_call_operand.hbm [shape: f32[8,128], index: 7, kind: input, shape index: {}]   ;;  %s5890_s8 = inlined_call_operand.hbm [shape: f32[512,128], index: 8, kind: output, shape index: {}]  }
   0x1   :  { %5937 = sst [smem:[#allocation41_spill]] %s5883_s1 }
   0x2   :  { %5938 = sst [smem:[#allocation42_spill]] %s5884_s2 }
   0x3   :  { %13 = vsyncpa [#allocation3], 0 }
   0x4   :  { %15 = vsyncpa [#allocation3 + $0x1], 0 }
   0x5   :  { %16 = vsyncpa [#allocation6], 0 }
   0x6   :  { %17 = vsyncpa [#allocation9], 0 }
   0x7   :  { %18 = vsyncpa [#allocation12], 0 }
   0x8   :  { %19 = vsyncpa [#allocation4], 0 }
   0x9   :  { %21 = vsyncpa [#allocation4 + $0x1], 0  ;;  %s4205_s27 = smov 0   ;;  %s4207_s28 = smov 0  }
   0xa   :  { %s4209_s29 = smov 0   ;;  %s4211_s30 = smov 0  }
   0xb LB: > { %s4148_s9 = smov [#allocation5]   ;;  %s4226_s11 = sadd.s32 4294967295, %s4146_s30   ;;  %s4146_s30 = sphi %s4211_s30, %s6046_s30   ;;  %s4142_s29 = sphi %s4209_s29, %s6045_s29   ;;  %s4138_s28 = sphi %s4207_s28, %s6044_s28   ;;  %s4134_s27 = sphi %s4205_s27, %s6043_s27  }
   0xc   : > { %s243_s10 = sshll.u32 %s4148_s9, 4  ;;  %p3061_p0 = scmp.ge.s32.totalorder %s4146_s30, 1  ;;  %s244_s10 = int_to_ptr.vmem [resolvable:$true] %s243_s10 }
   0xd   : > { %p5893_p1 = scmp.eq.s32.totalorder %s4226_s11, 0  ;;  %p231_p2 = scmp.lt.s32.totalorder %s4146_s30, 3 }
   0xe   : > { %s4149_s13 = smov [#allocation8]   ;;  %s4150_s16 = smov [#allocation11]  }
   0xf   : > { %p4231_p3 = pnand %p3061_p0, %p231_p2  ;;  %s269_s14 = sshll.u32 %s4149_s13, 4  ;;  %s4244_s14 = int_to_ptr.vmem [resolvable:$true] %s269_s14 }
  0x10   : > { %s295_s17 = sshll.u32 %s4150_s16, 4  ;;  %s3897_s19 = scalar_lea.vmem %s244_s10, 1024  ;;  %s4246_s17 = int_to_ptr.vmem [resolvable:$true] %s295_s17 }
  0x11   : > { %s5939_s12 = scalar_select %p4231_p3, 1, 0 }
  0x12   : > { %p3555_p5 = pneg %p4231_p3  ;;  %p3898_p8 = scmp.ne.s32.totalorder %s244_s10, %s3897_s19 }
  0x13   : > { %p3905_p11 = scmp.lt.s32.totalorder %s244_s10, %s244_s10  ;;  %p3906_p12 = scmp.lt.s32.totalorder %s3897_s19, %s3897_s19 }
  0x14   : > { %p4240_p6 = pnand %p3555_p5, %p5893_p1 }
  0x15   : > { %p3907_p13 = por %p3906_p12, %p3905_p11 }
  0x16   : > { %p4250_p7 = pneg %p4240_p6 }
  0x18   : > { %p3900_p9 = pnand %p3898_p8, %p4250_p7 }
  0x1a   : > { %p3901_p10 = pneg %p3900_p9 }
  0x1c   : > { %p3908_p0 = pnand %p3907_p13, %p3901_p10 }
  0x1e   : > { %3911 = shalt.err (!%p3908_p0)
}
  0x1f   : > { %s5891_s20 = smov 64   ;;  %s5892_s21 = smov 4  }
  0x20   : > { %s5942_s1 = sld [smem:[#allocation41_spill]]  ;;  %s3923_s24 = scalar_lea.vmem %s4244_s14, 1024 }
  0x21   : > { %p3924_p2 = scmp.ne.s32.totalorder %s4244_s14, %s3923_s24  ;;  %p3931_p9 = scmp.lt.s32.totalorder %s4244_s14, %s4244_s14 }
  0x22   : > { %p3932_p10 = scmp.lt.s32.totalorder %s3923_s24, %s3923_s24 }
  0x23   : > { %p3926_p5 = pnand %p3924_p2, %p4250_p7 }
  0x24   : > { %p3933_p11 = por %p3932_p10, %p3931_p9 }
  0x25   : > { %p3927_p8 = pneg %p3926_p5 }
  0x26   : > { %3558 = dma.hbm_to_vmem [thread:$0]  (!%p4240_p6), %s5942_s1, 1024, %s244_s10, [#allocation6], %s5891_s20, %s5891_s20, %s5892_s21  }
  0x27   : > { %p3934_p12 = pnand %p3933_p11, %p3927_p8 }
  0x29   : > { %3937 = shalt.err (!%p3934_p12)
}
  0x2a   : > { %3564 = dma.hbm_to_vmem [thread:$0]  (!%p4240_p6), %s5885_s3, 1024, %s4244_s14, [#allocation9], %s5891_s20, %s5891_s20, %s5892_s21  }
  0x2b   : > { %s3949_s9 = scalar_lea.vmem %s4246_s17, 1024  ;;  %p3957_p5 = scmp.lt.s32.totalorder %s4246_s17, %s4246_s17 }
  0x2c   : > { %p3950_p13 = scmp.ne.s32.totalorder %s4246_s17, %s3949_s9  ;;  %p3958_p8 = scmp.lt.s32.totalorder %s3949_s9, %s3949_s9 }
  0x2e   : > { %p3952_p0 = pnand %p3950_p13, %p4250_p7  ;;  %p3959_p9 = por %p3958_p8, %p3957_p5 }
  0x30   : > { %p3953_p2 = pneg %p3952_p0 }
  0x32   : > { %p3960_p10 = pnand %p3959_p9, %p3953_p2 }
  0x34   : > { %3963 = shalt.err (!%p3960_p10)
}
  0x35   : > { %3570 = dma.hbm_to_vmem [thread:$0]  (!%p4240_p6), %s5887_s5, 1024, %s4246_s17, [#allocation12], %s5891_s20, %s5891_s20, %s5892_s21  }
  0x36   : > { %s4153_s14 = smov [#allocation7]   ;;  %s4154_s19 = smov [#allocation10]  }
  0x37   : > { %s256_s16 = sshll.u32 %s4153_s14, 4  ;;  %s282_s22 = sshll.u32 %s4154_s19, 4  ;;  %s257_s16 = int_to_ptr.vmem [resolvable:$true] %s256_s16  ;;  %s283_s22 = int_to_ptr.vmem [resolvable:$true] %s282_s22 }
  0x38   : > { %s3975_s23 = scalar_lea.vmem %s257_s16, 1024  ;;  %p3983_p0 = scmp.lt.s32.totalorder %s257_s16, %s257_s16 }
  0x39   : > { %p3976_p11 = scmp.ne.s32.totalorder %s257_s16, %s3975_s23  ;;  %p3984_p2 = scmp.lt.s32.totalorder %s3975_s23, %s3975_s23 }
  0x3b   : > { %p3978_p12 = pnand %p3976_p11, %p4250_p7  ;;  %p3985_p5 = por %p3984_p2, %p3983_p0 }
  0x3d   : > { %p3979_p13 = pneg %p3978_p12 }
  0x3f   : > { %p3986_p8 = pnand %p3985_p5, %p3979_p13 }
  0x41   : > { %3989 = shalt.err (!%p3986_p8)
}
  0x42   : > { %s5943_s2 = sld [smem:[#allocation42_spill]]  ;;  %s4001_s25 = scalar_lea.vmem %s283_s22, 1024 }
  0x43   : > { %p4002_p9 = scmp.ne.s32.totalorder %s283_s22, %s4001_s25  ;;  %p4009_p12 = scmp.lt.s32.totalorder %s283_s22, %s283_s22 }
  0x44   : > { %p4010_p0 = scmp.lt.s32.totalorder %s4001_s25, %s4001_s25 }
  0x45   : > { %p4004_p10 = pnand %p4002_p9, %p4250_p7 }
  0x46   : > { %p4011_p13 = por %p4010_p0, %p4009_p12 }
  0x47   : > { %p4005_p11 = pneg %p4004_p10 }
  0x48   : > { %3561 = dma.hbm_to_vmem [thread:$0]  (!%p4240_p6), %s5943_s2, 1024, %s257_s16, [#allocation6], %s5891_s20, %s5891_s20, %s5892_s21  }
  0x49   : > { %p4012_p2 = pnand %p4011_p13, %p4005_p11 }
  0x4b   : > { %4015 = shalt.err (!%p4012_p2)
}
  0x4c   : > { %3567 = dma.hbm_to_vmem [thread:$0]  (!%p4240_p6), %s5886_s4, 1024, %s283_s22, [#allocation9], %s5891_s20, %s5891_s20, %s5892_s21  }
  0x4d   : > { %s4155_s10 = smov [#allocation13]  }
  0x4e   : > { %s312_s13 = sshll.u32 %s4155_s10, 4  ;;  %s313_s13 = int_to_ptr.vmem [resolvable:$true] %s312_s13 }
  0x4f   : > { %s4027_s14 = scalar_lea.vmem %s313_s13, 128  ;;  %p4035_p10 = scmp.lt.s32.totalorder %s313_s13, %s313_s13 }
  0x50   : > { %p4028_p5 = scmp.ne.s32.totalorder %s313_s13, %s4027_s14  ;;  %p4036_p11 = scmp.lt.s32.totalorder %s4027_s14, %s4027_s14 }
  0x52   : > { %p4030_p8 = pnand %p4028_p5, %p4250_p7  ;;  %p4037_p12 = por %p4036_p11, %p4035_p10 }
  0x54   : > { %p4031_p9 = pneg %p4030_p8 }
  0x56   : > { %p4038_p0 = pnand %p4037_p12, %p4031_p9 }
  0x58   : > { %4041 = shalt.err (!%p4038_p0)
}
  0x59   : > { %3573 = dma.hbm_to_vmem [thread:$0]  (!%p4240_p6), %s5889_s7, 128, %s313_s13, [#allocation12]  }
  0x5a   : > { %s3060_s18 = sadd.s32 4294967294, %s4146_s30   ;;  %s4323_s15 = sadd.s32 1, %s4146_s30  }
  0x5b   : > { %s31_s22 = ssub.s32 %s4146_s30, %s4323_s15  ;;  %s34_s23 = sadd.s32 1, %s4142_s29 }
  0x5c   : > { %p32_p7 = scmp.eq.s32.totalorder %s31_s22, 0  ;;  %p41_p13 = scmp.ne.s32.totalorder %s4142_s29, %s4138_s28 }
  0x5d   : > { %p42_p2 = scmp.eq.s32.totalorder %s4146_s30, 0  ;;  %p47_p5 = scmp.ne.s32.totalorder %s4138_s28, %s4134_s27 }
  0x5e   : > { %s4334_s17 = scalar_select %p32_p7, %s4142_s29, %s34_s23  }
  0x5f   : > { %p4336_p8 = por %p42_p2, %p41_p13  ;;  %p4342_p6 = por %p5893_p1, %p47_p5 }
  0x60   : > { %p218_p9 = scmp.eq.s32.totalorder %s4226_s11, 1  ;;  %p224_p10 = scmp.eq.s32.totalorder %s3060_s18, 1 }
  0x61   : > { %s5945_s25 = scalar_select %p4342_p6, 1, 0 }
  0x62   : > { %p3588_p11 = scmp.lt.s32.totalorder %s4146_s30, 2  ;;  %s323_s26 = sand.u32 1, %s4142_s29  }
  0x63   : > { %p4349_p12 = por %p218_p9, %p41_p13  ;;  %p4353_p0 = por %p224_p10, %p47_p5 }
  0x64   : > { %s3069_s13 = sshll.u32 %s323_s26, 7  ;;  %s3149_s14 = sshll.u32 %s4146_s30, 11 }
  0x65   : > { %s5946_s9 = scalar_select %p4349_p12, 1, 0 }
  0x66   : > { %s5947_s10 = scalar_select %p4353_p0, 1, 0 }
  0x67   : > { %s4361_s22 = scalar_lea.hbm %s5882_s0, %s3149_s14  ;;  %s327_s18 = scalar_lea.vmem [#allocation2], %s3069_s13 }
  0x68   : > { %s334_s23 = sshll.u32 %s327_s18, 4  ;;  %p4367_p7 = pnand %p3588_p11, %p4336_p8  ;;  %s4363_s23 = int_to_ptr.vmem [resolvable:$true] %s334_s23 }
  0x69   : > { %s4371_s21 = scalar_lea.sflag [#allocation3], %s323_s26  ;;  %s4042_s1 = scalar_lea.hbm %s4361_s22, 2048 }
  0x6a   : > { %p4043_p13 = scmp.ne.s32.totalorder %s4361_s22, %s4042_s1  ;;  %p4044_p2 = pneg %p4367_p7 }
  0x6b   : > { %s4047_s13 = scalar_lea.hbm %s5882_s0, 4096  ;;  %p4048_p8 = scmp.lt.s32.totalorder %s4361_s22, %s5882_s0 }
  0x6c   : > { %p4045_p5 = pnand %p4044_p2, %p4043_p13  ;;  %p4049_p10 = scmp.lt.s32.totalorder %s4047_s13, %s4042_s1 }
  0x6e   : > { %p4046_p9 = pneg %p4045_p5  ;;  %p4050_p11 = por %p4049_p10, %p4048_p8 }
  0x70   : > { %p4051_p4 = pnand %p4050_p11, %p4046_p9 }
  0x72   : > { %4054 = shalt.err (!%p4051_p4)
}
  0x73   : > { %s4055_s24 = scalar_lea.vmem %s4363_s23, 2048  ;;  %s4156_s26 = smov [#allocation2]  }
  0x74   : > { %p4056_p1 = scmp.ne.s32.totalorder %s4363_s23, %s4055_s24  ;;  %s4060_s2 = sshll.u32 %s4156_s26, 4  ;;  %s4061_s2 = int_to_ptr.vmem [resolvable:$false] %s4060_s2 }
  0x75   : > { %s4062_s14 = scalar_lea.vmem %s4061_s2, 4096  ;;  %p4063_p5 = scmp.lt.s32.totalorder %s4363_s23, %s4061_s2 }
  0x76   : > { %p4058_p0 = pnand %p4056_p1, %p4044_p2  ;;  %p4064_p12 = scmp.lt.s32.totalorder %s4062_s14, %s4055_s24 }
  0x78   : > { %p4059_p13 = pneg %p4058_p0  ;;  %p4065_p6 = por %p4064_p12, %p4063_p5 }
  0x7a   : > { %p4066_p3 = pnand %p4065_p6, %p4059_p13 }
  0x7c   : > { %4069 = shalt.err (!%p4066_p3)
}
  0x7d   : > { %s5949_s1 = smov 4   ;;  %s5950_s16 = smov 64  }
  0x7e   : > { %3577 = dma.hbm_to_vmem [thread:$0]  (!%p4367_p7), %s4361_s22, 2048, %s4363_s23, %s4371_s21, %s5950_s16, %s5950_s16, %s5949_s1  }
  0x7f   : > { %p5951_p1 = scmp.ne.s32.totalorder %s5939_s12, 0 }
  0x81   : > { %346 = sbr.rel (%p5951_p1) target bundleno = 1583 (0x62f), region = 52 }
  0x86   : > { %s4398_s13 = sand.u32 1, %s4138_s28   ;;  %p5952_p3 = scmp.ne.s32.totalorder %s5945_s25, 0 }
  0x87   : > { %s3073_s2 = sshll.u32 %s4398_s13, 7  ;;  %s349_s19 = scalar_lea.sflag [#allocation3], %s4398_s13 }
  0x88   : > { %s4402_s18 = scalar_lea.vmem [#allocation2], %s3073_s2 }
  0x89   : > { %4113 = dma.done.wait (%p5952_p3), %s349_s19, 2048  }
  0x8a   : > { %4115 = vsyncadd (%p5952_p3), %s349_s19, 4294965248  ;;  %p5953_p4 = scmp.eq.s32.totalorder %s4226_s11, 0 }
  0x8c   : > { %4117 = dma.done.wait (%p5953_p4), [#allocation6], 2048   ;;  %p5954_p6 = pmov %p5953_p4 }
  0x8d   : > { %p5955_p12 = pmov %p5953_p4 }
  0x8e   : > { %4119 = vsyncadd (%p5954_p6), [#allocation6], 4294965248 }
  0x8f   : > { %4121 = dma.done.wait (%p5955_p12), [#allocation9], 2048   ;;  %p5956_p0 = pmov %p5953_p4 }
  0x91   : > { %4123 = vsyncadd (%p5956_p0), [#allocation9], 4294965248  ;;  %p5957_p7 = pmov %p5956_p0 }
  0x92   : > { %p5958_p2 = pmov %p5956_p0 }
  0x93   : > { %4125 = dma.done.wait (%p5957_p7), [#allocation12], 1152  }
  0x94   : > { %4127 = vsyncadd (%p5958_p2), [#allocation12], 4294966144  ;;  %v3638_v0 = vld [vmem:[#allocation5 + $0x38] sm:$0xff]   ;;  %v3639_v1 = vld [vmem:[#allocation5 + $0x30] sm:$0xff]   ;;  %s3080_s14 = sshll.u32 %s4398_s13, 8  ;;  %s3150_s19 = sshll.u32 %s4226_s11, 12 }
  0x95   : > { %3271 = vmatprep.subr.bf16.mxu0 %v3638_v0  ;;  %3511 = vmatprep.subr.bf16.mxu1 %v3638_v0  ;;  %v3640_v2 = vld [vmem:[#allocation5 + $0x28] sm:$0xff]   ;;  %v3641_v3 = vld [vmem:[#allocation5 + $0x20] sm:$0xff]   ;;  %v3642_v5 = vld [vmem:[#allocation5 + $0x18] sm:$0xff]   ;;  %s5591_s2 = scalar_lea.vmem [#allocation14], %s3080_s14  ;;  %s5835_s21 = scalar_lea.hbm %s5890_s8, %s3150_s19 }
  0x96   : > { %3272 = vmatpush3.bf16.msra.mxu0 %v3638_v0  ;;  %3519 = vmatpush3.bf16.msra.mxu1 %v3638_v0  ;;  %v3646_v4 = vld [vmem:[%s4402_s18] sm:$0xff]   ;;  %v3643_v6 = vld [vmem:[#allocation5 + $0x10] sm:$0xff]   ;;  %v3644_v8 = vld [vmem:[#allocation5 + $0x8] sm:$0xff]   ;;  %s2917_s11 = scalar_lea.sflag [#allocation4], %s4398_s13  ;;  %p6040_p8 = scmp.ne.s32.totalorder %s5946_s9, 0 }
  0x97   : > { %3273 = vmatprep.subr.bf16.mxu0 %v3639_v1  ;;  %3512 = vmatprep.subr.bf16.mxu1 %v3639_v1  ;;  %v3654_v7 = vld [vmem:[%s4402_s18 + $0x40] sm:$0xff]   ;;  %v3647_v10 = vld [vmem:[%s4402_s18 + $0x8] sm:$0xff]   ;;  %v3662_v12 = vld [vmem:[#allocation7 + $0x38] sm:$0xff]   ;;  %s4157_s22 = smov [#allocation14]  }
  0x98   : > { %3287 = vmatprep.mubr.bf16.mxu0 %v3646_v4  ;;  %3303 = vmatprep.mubr.bf16.mxu1 %v3654_v7  ;;  %v3645_v9 = vld [vmem:[#allocation5] sm:$0xff]   ;;  %v3655_v11 = vld [vmem:[%s4402_s18 + $0x48] sm:$0xff]   ;;  %v3648_v13 = vld [vmem:[%s4402_s18 + $0x10] sm:$0xff]   ;;  %s4074_s23 = sshll.u32 %s4157_s22, 4  ;;  %s4075_s23 = int_to_ptr.vmem [resolvable:$false] %s4074_s23 }
  0x99   : > { %v3656_v14 = vld [vmem:[%s4402_s18 + $0x50] sm:$0xff]   ;;  %v3664_v16 = vld [vmem:[#allocation7 + $0x28] sm:$0xff]   ;;  %v3649_v17 = vld [vmem:[%s4402_s18 + $0x18] sm:$0xff]   ;;  %s4076_s24 = scalar_lea.vmem %s4075_s23, 8192 }
  0x9a   : > { %3274 = vmatpush3.bf16.msra.mxu0 %v3639_v1  ;;  %3520 = vmatpush3.bf16.msra.mxu1 %v3639_v1  ;;  %v3663_v15 = vld [vmem:[#allocation7 + $0x30] sm:$0xff]   ;;  %v3657_v18 = vld [vmem:[%s4402_s18 + $0x58] sm:$0xff]   ;;  %v3650_v19 = vld [vmem:[%s4402_s18 + $0x20] sm:$0xff]  }
  0x9b   : > { %3275 = vmatprep.subr.bf16.mxu0 %v3640_v2  ;;  %3513 = vmatprep.subr.bf16.mxu1 %v3640_v2  ;;  %v3658_v20 = vld [vmem:[%s4402_s18 + $0x60] sm:$0xff]   ;;  %v3666_v22 = vld [vmem:[#allocation7 + $0x18] sm:$0xff]   ;;  %v3651_v23 = vld [vmem:[%s4402_s18 + $0x28] sm:$0xff]  }
  0x9c   : > { %v3665_v21 = vld [vmem:[#allocation7 + $0x20] sm:$0xff]   ;;  %v3659_v24 = vld [vmem:[%s4402_s18 + $0x68] sm:$0xff]   ;;  %v3652_v25 = vld [vmem:[%s4402_s18 + $0x30] sm:$0xff]  }
  0x9d   : > { %v3660_v26 = vld [vmem:[%s4402_s18 + $0x70] sm:$0xff]   ;;  %v3653_v28 = vld [vmem:[%s4402_s18 + $0x38] sm:$0xff]   ;;  %v3668_v30 = vld [vmem:[#allocation7 + $0x8] sm:$0xff]  }
  0x9e   : > { %3276 = vmatpush3.bf16.msra.mxu0 %v3640_v2  ;;  %3521 = vmatpush3.bf16.msra.mxu1 %v3640_v2  ;;  %v3667_v27 = vld [vmem:[#allocation7 + $0x10] sm:$0xff]   ;;  %v3661_v29 = vld [vmem:[%s4402_s18 + $0x78] sm:$0xff]   ;;  %v3669_v31 = vld [vmem:[#allocation7] sm:$0xff]   ;;  %s2930_s18 = sshll.u32 %s5591_s2, 4  ;;  %s5837_s18 = int_to_ptr.vmem [resolvable:$true] %s2930_s18 }
  0x9f   : > { %3277 = vmatprep.subr.bf16.mxu0 %v3641_v3  ;;  %3514 = vmatprep.subr.bf16.mxu1 %v3641_v3  ;;  %v4439_v38 = vld [vmem:[%s5888_s6] ss:$0 sm:$0xff]  ;;  %s4070_s25 = scalar_lea.vmem %s5837_s18, 4096  ;;  %p4077_p13 = scmp.lt.s32.totalorder %s5837_s18, %s4075_s23 }
  0xa0   : > { %p4071_p9 = scmp.ne.s32.totalorder %s5837_s18, %s4070_s25  ;;  %p4078_p5 = scmp.lt.s32.totalorder %s4076_s24, %s4070_s25 }
  0xa2   : > { %3278 = vmatpush3.bf16.msra.mxu0 %v3641_v3  ;;  %3522 = vmatpush3.bf16.msra.mxu1 %v3641_v3  ;;  %p4072_p10 = pnand %p4071_p9, %p6040_p8  ;;  %p4079_p1 = por %p4078_p5, %p4077_p13 }
  0xa3   : > { %3279 = vmatprep.subr.bf16.mxu0 %v3642_v5  ;;  %3515 = vmatprep.subr.bf16.mxu1 %v3642_v5 }
  0xa4   : > { %p4073_p11 = pneg %p4072_p10 }
  0xa6   : > { %3280 = vmatpush3.bf16.msra.mxu0 %v3642_v5  ;;  %3523 = vmatpush3.bf16.msra.mxu1 %v3642_v5  ;;  %p4080_p3 = pnand %p4079_p1, %p4073_p11 }
  0xa7   : > { %3281 = vmatprep.subr.bf16.mxu0 %v3643_v6  ;;  %3516 = vmatprep.subr.bf16.mxu1 %v3643_v6 }
  0xaa   : > { %3282 = vmatpush3.bf16.msra.mxu0 %v3643_v6  ;;  %3524 = vmatpush3.bf16.msra.mxu1 %v3643_v6 }
  0xab   : > { %3283 = vmatprep.subr.bf16.mxu0 %v3644_v8  ;;  %3517 = vmatprep.subr.bf16.mxu1 %v3644_v8 }
  0xae   : > { %3284 = vmatpush3.bf16.msra.mxu0 %v3644_v8  ;;  %3525 = vmatpush3.bf16.msra.mxu1 %v3644_v8 }
  0xaf   : > { %3285 = vmatprep.subr.bf16.mxu0 %v3645_v9  ;;  %3518 = vmatprep.subr.bf16.mxu1 %v3645_v9 }
  0xb2   : > { %3286 = vmatpush3.bf16.msra.mxu0 %v3645_v9  ;;  %3526 = vmatpush3.bf16.msra.mxu1 %v3645_v9 }
  0xb3   : > { %3319 = vmatprep.subr.bf16.mxu1 %v3662_v12 }
  0xb5   : > { %3288 = vmatmul.mubr.bf16.vlgmr.msra.gmra.mxu0 %v3647_v10  ;;  %3304 = vmatmul.mubr.bf16.vlgmr.msra.gmra.mxu1 %v3655_v11 }
  0xb6   : > { %3291 = vmatprep.mubr.bf16.mxu0 %v3648_v13  ;;  %3307 = vmatprep.mubr.bf16.mxu1 %v3656_v14 }
  0xb7   : > { %3320 = vmatpush3.bf16.msra.mxu1 %v3662_v12 }
  0xb8   : > { %3321 = vmatprep.subr.bf16.mxu1 %v3663_v15 }
  0xbb   : > { %3322 = vmatpush3.bf16.msra.mxu1 %v3663_v15 }
  0xbc   : > { %3323 = vmatprep.subr.bf16.mxu1 %v3664_v16 }
  0xbd   : > { %3292 = vmatmul.mubr.bf16.gmra.mxu0 %v3649_v17  ;;  %3308 = vmatmul.mubr.bf16.gmra.mxu1 %v3657_v18 }
  0xbe   : > { %3295 = vmatprep.mubr.bf16.mxu0 %v3650_v19  ;;  %3311 = vmatprep.mubr.bf16.mxu1 %v3658_v20 }
  0xbf   : > { %3324 = vmatpush3.bf16.msra.mxu1 %v3664_v16 }
  0xc0   : > { %3325 = vmatprep.subr.bf16.mxu1 %v3665_v21 }
  0xc3   : > { %3326 = vmatpush3.bf16.msra.mxu1 %v3665_v21 }
  0xc4   : > { %3327 = vmatprep.subr.bf16.mxu1 %v3666_v22 }
  0xc5   : > { %3296 = vmatmul.mubr.bf16.gmra.mxu0 %v3651_v23  ;;  %3312 = vmatmul.mubr.bf16.gmra.mxu1 %v3659_v24 }
  0xc6   : > { %3299 = vmatprep.mubr.bf16.mxu0 %v3652_v25  ;;  %3315 = vmatprep.mubr.bf16.mxu1 %v3660_v26 }
  0xc7   : > { %3328 = vmatpush3.bf16.msra.mxu1 %v3666_v22 }
  0xc8   : > { %3329 = vmatprep.subr.bf16.mxu1 %v3667_v27 }
  0xcb   : > { %3330 = vmatpush3.bf16.msra.mxu1 %v3667_v27 }
  0xcc   : > { %3331 = vmatprep.subr.bf16.mxu1 %v3668_v30 }
  0xcd   : > { %3300 = vmatmul.mubr.bf16.gmra.mxu0 %v3653_v28  ;;  %3316 = vmatmul.mubr.bf16.gmra.mxu1 %v3661_v29 }
  0xcf   : > { %3332 = vmatpush3.bf16.msra.mxu1 %v3668_v30 }
  0xd0   : > { %3333 = vmatprep.subr.bf16.mxu1 %v3669_v31 }
  0xd3   : > { %3334 = vmatpush3.bf16.msra.mxu1 %v3669_v31 }
 0x175   : > { %v3289_v32 = vpop.f32.mrf.mxu0  ;;  %v3305_v33 = vpop.f32.mrf.mxu1 }
 0x176   : > { %v4451_v44 = vadd.f32 %v3289_v32, %v4439_v38  ;;  %v4514_v24 = vadd.f32 %v3305_v33, %v4439_v38 }
 0x177   : > { %v649_v34 = vpop.f32.mrf.mxu0  ;;  %v713_v35 = vpop.f32.mrf.mxu1 }
 0x178   : > { %v4445_v42 = vadd.f32 %v4439_v38, %v649_v34  ;;  %v4499_v15 = vadd.f32 %v4439_v38, %v713_v35  ;;  %5966 = vst [vmem:[#allocation27_spill] sm:$0xff] %v4514_v24 }
 0x179   : > { %v3290_v36 = vpop.f32.mrf.mxu0  ;;  %v3306_v37 = vpop.f32.mrf.mxu1 }
 0x17a   : > { %v4442_v39 = vadd.f32 %v3290_v36, %v4439_v38  ;;  %5963 = vst [vmem:[#allocation24_spill] sm:$0xff] %v4499_v15  ;;  %v4517_v25 = vadd.f32 %v3306_v37, %v4439_v38 }
 0x17b   : > { %v652_v40 = vpop.f32.mrf.mxu0  ;;  %v716_v41 = vpop.f32.mrf.mxu1 }
 0x17c   : > { %v4448_v43 = vadd.f32 %v4439_v38, %v652_v40  ;;  %v777_v48 = vpack.c.bf16 %v4442_v39, %v4451_v44  ;;  %v4502_v16 = vadd.f32 %v4439_v38, %v716_v41  ;;  %5967 = vst [vmem:[#allocation28_spill] sm:$0xff] %v4517_v25  ;;  %v785_v29 = vpack.c.bf16 %v4517_v25, %v4514_v24 }
 0x17d   : > { %v3293_v45 = vpop.f32.mrf.mxu0  ;;  %v3309_v46 = vpop.f32.mrf.mxu1 }
 0x17e   : > { %v776_v47 = vpack.c.bf16 %v4448_v43, %v4445_v42  ;;  %v4458_v51 = vadd.f32 %v3293_v45, %v4439_v38  ;;  %5964 = vst [vmem:[#allocation25_spill] sm:$0xff] %v4502_v16  ;;  %v784_v22 = vpack.c.bf16 %v4502_v16, %v4499_v15  ;;  %v4530_v32 = vadd.f32 %v3309_v46, %v4439_v38 }
 0x17f   : > { %v665_v49 = vpop.f32.mrf.mxu0  ;;  %v729_v50 = vpop.f32.mrf.mxu1 }
 0x180   : > { %3335 = vmatprep.mubr.bf16.mxu1 %v776_v47  ;;  %v4461_v53 = vadd.f32 %v4439_v38, %v665_v49  ;;  %v4520_v26 = vadd.f32 %v4439_v38, %v729_v50  ;;  %5970 = vst [vmem:[#allocation31_spill] sm:$0xff] %v4530_v32 }
 0x181   : > { %v3294_v52 = vpop.f32.mrf.mxu0  ;;  %3336 = vmatmul.mubr.bf16.vlgmr.msra.gmra.mxu1 %v777_v48  ;;  %v3310_v56 = vpop.f32.mrf.mxu1 }
 0x182   : > { %v4464_v54 = vadd.f32 %v3294_v52, %v4439_v38  ;;  %5968 = vst [vmem:[#allocation29_spill] sm:$0xff] %v4520_v26  ;;  %v4533_v33 = vadd.f32 %v3310_v56, %v4439_v38 }
 0x183   : > { %v668_v55 = vpop.f32.mrf.mxu0  ;;  %v732_v62 = vpop.f32.mrf.mxu1 }
 0x184   : > { %v4467_v57 = vadd.f32 %v4439_v38, %v668_v55  ;;  %v779_v58 = vpack.c.bf16 %v4464_v54, %v4458_v51  ;;  %v4523_v27 = vadd.f32 %v4439_v38, %v732_v62  ;;  %5971 = vst [vmem:[#allocation32_spill] sm:$0xff] %v4533_v33  ;;  %v787_v37 = vpack.c.bf16 %v4533_v33, %v4530_v32  ;;  %v3675_v62 = vld [vmem:[#allocation8 + $0x10] sm:$0xff]  }
 0x185   : > { %v3297_v59 = vpop.f32.mrf.mxu0  ;;  %v3313_v4 = vpop.f32.mrf.mxu1 }
 0x186   : > { %v778_v60 = vpack.c.bf16 %v4467_v57, %v4461_v53  ;;  %v4474_v63 = vadd.f32 %v3297_v59, %v4439_v38  ;;  %5969 = vst [vmem:[#allocation30_spill] sm:$0xff] %v4523_v27  ;;  %v786_v30 = vpack.c.bf16 %v4523_v27, %v4520_v26  ;;  %v4546_v45 = vadd.f32 %v3313_v4, %v4439_v38  ;;  %v3671_v59 = vld [vmem:[#allocation8 + $0x30] sm:$0xff]   ;;  %v3678_v4 = vld [vmem:[#allocation10 + $0x38] sm:$0xff]  }
 0x187   : > { %v681_v61 = vpop.f32.mrf.mxu0  ;;  %v745_v10 = vpop.f32.mrf.mxu1  ;;  %3415 = vmatprep.subr.bf16.mxu1 %v3678_v4 }
 0x188   : > { %3339 = vmatprep.mubr.bf16.mxu1 %v778_v60  ;;  %5959 = vst [vmem:[#allocation20_spill] sm:$0xff] %v4474_v63  ;;  %v4477_v1 = vadd.f32 %v4439_v38, %v681_v61  ;;  %v4536_v34 = vadd.f32 %v4439_v38, %v745_v10  ;;  %5974 = vst [vmem:[#allocation35_spill] sm:$0xff] %v4546_v45  ;;  %v3672_v60 = vld [vmem:[#allocation8 + $0x28] sm:$0xff]   ;;  %v3673_v61 = vld [vmem:[#allocation8 + $0x20] sm:$0xff]   ;;  %3416 = vmatpush3.bf16.msra.mxu1 %v3678_v4 }
 0x189   : > { %v3298_v0 = vpop.f32.mrf.mxu0  ;;  %3340 = vmatmul.mubr.bf16.gmra.mxu1 %v779_v58  ;;  %v3314_v18 = vpop.f32.mrf.mxu1  ;;  %v3670_v58 = vld [vmem:[#allocation8 + $0x38] sm:$0xff]  }
 0x18a   : > { %v4480_v2 = vadd.f32 %v3298_v0, %v4439_v38  ;;  %5972 = vst [vmem:[#allocation33_spill] sm:$0xff] %v4536_v34  ;;  %v4549_v46 = vadd.f32 %v3314_v18, %v4439_v38  ;;  %3367 = vmatprep.subr.bf16.mxu0 %v3670_v58  ;;  %v3676_v0 = vld [vmem:[#allocation8 + $0x8] sm:$0xff]   ;;  %v3682_v10 = vld [vmem:[#allocation10 + $0x18] sm:$0xff]  }
 0x18b   : > { %v684_v3 = vpop.f32.mrf.mxu0  ;;  %v748_v23 = vpop.f32.mrf.mxu1  ;;  %3368 = vmatpush3.bf16.msra.mxu0 %v3670_v58 }
 0x18c   : > { %v4483_v5 = vadd.f32 %v4439_v38, %v684_v3  ;;  %v781_v6 = vpack.c.bf16 %v4480_v2, %v4474_v63  ;;  %v4539_v35 = vadd.f32 %v4439_v38, %v748_v23  ;;  %5975 = vst [vmem:[#allocation36_spill] sm:$0xff] %v4549_v46  ;;  %v789_v49 = vpack.c.bf16 %v4549_v46, %v4546_v45  ;;  %v3677_v3 = vld [vmem:[#allocation8] sm:$0xff]  }
 0x18d   : > { %v3301_v7 = vpop.f32.mrf.mxu0  ;;  %v3317_v28 = vpop.f32.mrf.mxu1  ;;  %3369 = vmatprep.subr.bf16.mxu0 %v3671_v59 }
 0x18e   : > { %v780_v8 = vpack.c.bf16 %v4483_v5, %v4477_v1  ;;  %v4490_v11 = vadd.f32 %v3301_v7, %v4439_v38  ;;  %5973 = vst [vmem:[#allocation34_spill] sm:$0xff] %v4539_v35  ;;  %v788_v40 = vpack.c.bf16 %v4539_v35, %v4536_v34  ;;  %v4562_v52 = vadd.f32 %v3317_v28, %v4439_v38  ;;  %v3680_v7 = vld [vmem:[#allocation10 + $0x28] sm:$0xff]  }
 0x18f   : > { %v697_v9 = vpop.f32.mrf.mxu0  ;;  %v761_v31 = vpop.f32.mrf.mxu1  ;;  %3370 = vmatpush3.bf16.msra.mxu0 %v3671_v59 }
 0x190   : > { %3343 = vmatprep.mubr.bf16.mxu1 %v780_v8  ;;  %5960 = vst [vmem:[#allocation21_spill] sm:$0xff] %v4490_v11  ;;  %v4493_v13 = vadd.f32 %v4439_v38, %v697_v9  ;;  %v4552_v47 = vadd.f32 %v4439_v38, %v761_v31  ;;  %5978 = vst [vmem:[#allocation39_spill] sm:$0xff] %v4562_v52  ;;  %3371 = vmatprep.subr.bf16.mxu0 %v3672_v60  ;;  %v3681_v8 = vld [vmem:[#allocation10 + $0x20] sm:$0xff]  }
 0x191   : > { %v3302_v12 = vpop.f32.mrf.mxu0  ;;  %3344 = vmatmul.mubr.bf16.gmra.mxu1 %v781_v6  ;;  %v3318_v36 = vpop.f32.mrf.mxu1  ;;  %v3679_v6 = vld [vmem:[#allocation10 + $0x30] sm:$0xff]   ;;  %v4569_v9 = vld [vmem:[#allocation13] ss:$0 sm:$0xff] }
 0x192   : > { %5961 = vst [vmem:[#allocation22_spill] sm:$0xff] %v4493_v13  ;;  %v4496_v14 = vadd.f32 %v3302_v12, %v4439_v38  ;;  %5976 = vst [vmem:[#allocation37_spill] sm:$0xff] %v4552_v47  ;;  %v4565_v55 = vadd.f32 %v3318_v36, %v4439_v38  ;;  %3417 = vmatprep.subr.bf16.mxu1 %v3679_v6 }
 0x193   : > { %v700_v17 = vpop.f32.mrf.mxu0  ;;  %v764_v41 = vpop.f32.mrf.mxu1  ;;  %3372 = vmatpush3.bf16.msra.mxu0 %v3672_v60  ;;  %3418 = vmatpush3.bf16.msra.mxu1 %v3679_v6 }
 0x194   : > { %5962 = vst [vmem:[#allocation23_spill] sm:$0xff] %v4496_v14  ;;  %v4505_v19 = vadd.f32 %v4439_v38, %v700_v17  ;;  %v783_v20 = vpack.c.bf16 %v4496_v14, %v4490_v11  ;;  %v4555_v48 = vadd.f32 %v4439_v38, %v764_v41  ;;  %5979 = vst [vmem:[#allocation40_spill] sm:$0xff] %v4565_v55  ;;  %3373 = vmatprep.subr.bf16.mxu0 %v3673_v61  ;;  %v3674_v38 = vld [vmem:[#allocation8 + $0x18] sm:$0xff]  }
 0x195   : > { %v791_v56 = vpack.c.bf16 %v4565_v55, %v4562_v52  ;;  %3419 = vmatprep.subr.bf16.mxu1 %v3680_v7 }
 0x196   : > { %5965 = vst [vmem:[#allocation26_spill] sm:$0xff] %v4505_v19  ;;  %v782_v21 = vpack.c.bf16 %v4505_v19, %v4493_v13  ;;  %5977 = vst [vmem:[#allocation38_spill] sm:$0xff] %v4555_v48  ;;  %v790_v50 = vpack.c.bf16 %v4555_v48, %v4552_v47 }
 0x197   : > { %3374 = vmatpush3.bf16.msra.mxu0 %v3673_v61  ;;  %3420 = vmatpush3.bf16.msra.mxu1 %v3680_v7 }
 0x198   : > { %3347 = vmatprep.mubr.bf16.mxu1 %v782_v21  ;;  %3375 = vmatprep.subr.bf16.mxu0 %v3674_v38 }
 0x199   : > { %3348 = vmatmul.mubr.bf16.gmra.mxu1 %v783_v20  ;;  %3421 = vmatprep.subr.bf16.mxu1 %v3681_v8 }
 0x19a   : > { %3351 = vmatprep.mubr.bf16.mxu1 %v784_v22  ;;  %v3683_v22 = vld [vmem:[#allocation10 + $0x10] sm:$0xff]  }
 0x19b   : > { %3376 = vmatpush3.bf16.msra.mxu0 %v3674_v38  ;;  %3422 = vmatpush3.bf16.msra.mxu1 %v3681_v8 }
 0x19c   : > { %3377 = vmatprep.subr.bf16.mxu0 %v3675_v62  ;;  %3423 = vmatprep.subr.bf16.mxu1 %v3682_v10 }
 0x19f   : > { %3378 = vmatpush3.bf16.msra.mxu0 %v3675_v62  ;;  %3424 = vmatpush3.bf16.msra.mxu1 %v3682_v10 }
 0x1a0   : > { %3379 = vmatprep.subr.bf16.mxu0 %v3676_v0  ;;  %3425 = vmatprep.subr.bf16.mxu1 %v3683_v22 }
 0x1a1   : > { %3352 = vmatmul.mubr.bf16.gmra.mxu1 %v785_v29 }
 0x1a2   : > { %3355 = vmatprep.mubr.bf16.mxu1 %v786_v30 }
 0x1a3   : > { %3380 = vmatpush3.bf16.msra.mxu0 %v3676_v0  ;;  %3426 = vmatpush3.bf16.msra.mxu1 %v3683_v22 }
 0x1a4   : > { %3381 = vmatprep.subr.bf16.mxu0 %v3677_v3 }
 0x1a7   : > { %3382 = vmatpush3.bf16.msra.mxu0 %v3677_v3 }
 0x1a9   : > { %3356 = vmatmul.mubr.bf16.gmra.mxu1 %v787_v37 }
 0x1aa   : > { %3359 = vmatprep.mubr.bf16.mxu1 %v788_v40 }
 0x1b1   : > { %3360 = vmatmul.mubr.bf16.gmra.mxu1 %v789_v49  ;;  %v3684_v49 = vld [vmem:[#allocation10 + $0x8] sm:$0xff]  }
 0x1b2   : > { %3363 = vmatprep.mubr.bf16.mxu1 %v790_v50  ;;  %3427 = vmatprep.subr.bf16.mxu1 %v3684_v49 }
 0x1b3   : > { %3428 = vmatpush3.bf16.msra.mxu1 %v3684_v49 }
 0x1b9   : > { %3364 = vmatmul.mubr.bf16.gmra.mxu1 %v791_v56 }
 0x241   : > { %v3337_v12 = vpop.f32.mrf.mxu1 }
 0x242   : > { %v4572_v17 = vadd.f32 %v3337_v12, %v4569_v9 }
 0x243   : > { %v894_v18 = vpop.f32.mrf.mxu1 }
 0x244   : > { %v1023_v20 = vmul.f32 %v4572_v17, %v4572_v17  ;;  %v4577_v21 = vadd.f32 %v4569_v9, %v894_v18 }
 0x245   : > { %v3338_v23 = vpop.f32.mrf.mxu1 }
 0x246   : > { %v1055_v28 = vmul.f32 %v1023_v20, %v4572_v17  ;;  %v1021_v29 = vmul.f32 %v4577_v21, %v4577_v21  ;;  %v4583_v30 = vadd.f32 %v3338_v23, %v4569_v9 }
 0x247   : > { %v897_v31 = vpop.f32.mrf.mxu1 }
 0x248   : > { %v1087_v36 = vmul.f32 0.044715, %v1055_v28  ;;  %v1053_v37 = vmul.f32 %v1021_v29, %v4577_v21  ;;  %v1024_v40 = vmul.f32 %v4583_v30, %v4583_v30  ;;  %v4589_v41 = vadd.f32 %v4569_v9, %v897_v31 }
 0x249   : > { %v3341_v50 = vpop.f32.mrf.mxu1 }
 0x24a   : > { %v1119_v56 = vadd.f32 %v1087_v36, %v4572_v17  ;;  %v1085_v58 = vmul.f32 0.044715, %v1053_v37  ;;  %v1056_v59 = vmul.f32 %v1024_v40, %v4583_v30  ;;  %v1022_v60 = vmul.f32 %v4589_v41, %v4589_v41 }
 0x24b   : > { %v4596_v61 = vadd.f32 %v3341_v50, %v4569_v9  ;;  %v910_v38 = vpop.f32.mrf.mxu1 }
 0x24c   : > { %v1151_v62 = vmul.f32 0.7978846, %v1119_v56  ;;  %v1117_v0 = vadd.f32 %v1085_v58, %v4577_v21  ;;  %v1088_v3 = vmul.f32 0.044715, %v1056_v59  ;;  %v1054_v4 = vmul.f32 %v1022_v60, %v4589_v41 }
 0x24d   : > { %v1027_v6 = vmul.f32 %v4596_v61, %v4596_v61  ;;  %v4603_v7 = vadd.f32 %v4569_v9, %v910_v38  ;;  %v3342_v8 = vpop.f32.mrf.mxu1 }
 0x24e   : > { %3694 = vtanh.f32 %v1151_v62  ;;  %v1120_v10 = vadd.f32 %v1088_v3, %v4583_v30  ;;  %v1086_v12 = vmul.f32 0.044715, %v1054_v4  ;;  %v4610_v22 = vadd.f32 %v3342_v8, %v4569_v9 }
 0x24f   : > { %v1059_v18 = vmul.f32 %v1027_v6, %v4596_v61  ;;  %v1025_v20 = vmul.f32 %v4603_v7, %v4603_v7  ;;  %v913_v23 = vpop.f32.mrf.mxu1  ;;  %v1149_v28 = vmul.f32 0.7978846, %v1117_v0 }
 0x250   : > { %v1152_v29 = vmul.f32 0.7978846, %v1120_v10  ;;  %v1118_v31 = vadd.f32 %v1086_v12, %v4589_v41  ;;  %v4614_v36 = vadd.f32 %v4569_v9, %v913_v23  ;;  %v1028_v50 = vmul.f32 %v4610_v22, %v4610_v22 }
 0x251   : > { %v1091_v37 = vmul.f32 0.044715, %v1059_v18  ;;  %v1057_v40 = vmul.f32 %v1025_v20, %v4603_v7  ;;  %v3345_v56 = vpop.f32.mrf.mxu1 }
 0x252   : > { %3696 = vtanh.f32 %v1152_v29  ;;  %v1150_v58 = vmul.f32 0.7978846, %v1118_v31  ;;  %v1026_v59 = vmul.f32 %v4614_v36, %v4614_v36  ;;  %v4622_v49 = vadd.f32 %v3345_v56, %v4569_v9 }
 0x253   : > { %v1123_v60 = vadd.f32 %v1091_v37, %v4596_v61  ;;  %v1089_v38 = vmul.f32 0.044715, %v1057_v40  ;;  %v1060_v62 = vmul.f32 %v1028_v50, %v4610_v22  ;;  %v926_v0 = vpop.f32.mrf.mxu1  ;;  %3698 = vtanh.f32 %v1149_v28 }
 0x254   : > { %v1058_v3 = vmul.f32 %v1026_v59, %v4614_v36  ;;  %v1031_v4 = vmul.f32 %v4622_v49, %v4622_v49  ;;  %v4630_v6 = vadd.f32 %v4569_v9, %v926_v0  ;;  %3700 = vtanh.f32 %v1150_v58 }
 0x255   : > { %v1155_v8 = vmul.f32 0.7978846, %v1123_v60  ;;  %v1121_v10 = vadd.f32 %v1089_v38, %v4603_v7  ;;  %v1092_v12 = vmul.f32 0.044715, %v1060_v62  ;;  %v3346_v18 = vpop.f32.mrf.mxu1 }
 0x256   : > { %v1090_v20 = vmul.f32 0.044715, %v1058_v3  ;;  %v1063_v23 = vmul.f32 %v1031_v4, %v4622_v49  ;;  %v1029_v28 = vmul.f32 %v4630_v6, %v4630_v6  ;;  %v4637_v29 = vadd.f32 %v3346_v18, %v4569_v9 }
 0x257   : > { %3702 = vtanh.f32 %v1155_v8  ;;  %v1153_v31 = vmul.f32 0.7978846, %v1121_v10  ;;  %v1124_v37 = vadd.f32 %v1092_v12, %v4610_v22  ;;  %v929_v40 = vpop.f32.mrf.mxu1 }
 0x258   : > { %v1122_v50 = vadd.f32 %v1090_v20, %v4614_v36  ;;  %v1095_v56 = vmul.f32 0.044715, %v1063_v23  ;;  %v1061_v58 = vmul.f32 %v1029_v28, %v4630_v6  ;;  %v1032_v59 = vmul.f32 %v4637_v29, %v4637_v29 }
 0x259   : > { %3704 = vtanh.f32 %v1153_v31  ;;  %v1156_v60 = vmul.f32 0.7978846, %v1124_v37  ;;  %v4645_v38 = vadd.f32 %v4569_v9, %v929_v40  ;;  %v3349_v62 = vpop.f32.mrf.mxu1 }
 0x25a   : > { %v1154_v0 = vmul.f32 0.7978846, %v1122_v50  ;;  %v1127_v3 = vadd.f32 %v1095_v56, %v4622_v49  ;;  %v1093_v4 = vmul.f32 0.044715, %v1061_v58  ;;  %v1064_v8 = vmul.f32 %v1032_v59, %v4637_v29 }
 0x25b   : > { %v3695_v10 = vpop.eup %3694  ;;  %3706 = vtanh.f32 %v1156_v60  ;;  %v1030_v12 = vmul.f32 %v4645_v38, %v4645_v38  ;;  %v4652_v18 = vadd.f32 %v3349_v62, %v4569_v9  ;;  %v942_v20 = vpop.f32.mrf.mxu1 }
 0x25c   : > { %v1215_v23 = vadd.f32 1.0, %v3695_v10  ;;  %3708 = vtanh.f32 %v1154_v0  ;;  %v1159_v28 = vmul.f32 0.7978846, %v1127_v3  ;;  %v1125_v31 = vadd.f32 %v1093_v4, %v4630_v6 }
 0x25d   : > { %v1096_v37 = vmul.f32 0.044715, %v1064_v8  ;;  %v1062_v40 = vmul.f32 %v1030_v12, %v4645_v38  ;;  %v1035_v50 = vmul.f32 %v4652_v18, %v4652_v18  ;;  %v4659_v56 = vadd.f32 %v4569_v9, %v942_v20  ;;  %v3350_v58 = vpop.f32.mrf.mxu1 }
 0x25e   : > { %v1247_v59 = vmul.f32 0.5, %v1215_v23  ;;  %3710 = vtanh.f32 %v1159_v28  ;;  %v1157_v60 = vmul.f32 0.7978846, %v1125_v31  ;;  %v4662_v62 = vadd.f32 %v3350_v58, %v4569_v9 }
 0x25f   : > { %v3697_v0 = vpop.eup %3696  ;;  %v1128_v3 = vadd.f32 %v1096_v37, %v4637_v29  ;;  %v1094_v4 = vmul.f32 0.044715, %v1062_v40  ;;  %v1067_v8 = vmul.f32 %v1035_v50, %v4652_v18  ;;  %v1033_v10 = vmul.f32 %v4659_v56, %v4659_v56  ;;  %v945_v12 = vpop.f32.mrf.mxu1 }
 0x260   : > { %v4669_v20 = vmul.f32 %v1247_v59, %v4572_v17  ;;  %v1216_v52 = vadd.f32 1.0, %v3697_v0  ;;  %3712 = vtanh.f32 %v1157_v60  ;;  %v1036_v23 = vmul.f32 %v4662_v62, %v4662_v62  ;;  %v3699_v28 = vpop.eup %3698 }
 0x261   : > { %v1160_v31 = vmul.f32 0.7978846, %v1128_v3  ;;  %v1126_v58 = vadd.f32 %v1094_v4, %v4645_v38  ;;  %v1099_v37 = vmul.f32 0.044715, %v1067_v8  ;;  %v1065_v40 = vmul.f32 %v1033_v10, %v4659_v56  ;;  %v3353_v50 = vpop.f32.mrf.mxu1  ;;  %v3701_v48 = vpop.eup %3700 }
 0x262   : > { %v1248_v47 = vmul.f32 0.5, %v1216_v52  ;;  %v1068_v55 = vmul.f32 %v1036_v23, %v4662_v62  ;;  %v4677_v17 = vadd.f32 %v4569_v9, %v945_v12  ;;  %v4680_v59 = vadd.f32 %v3353_v50, %v4569_v9 }
 0x263   : > { %3714 = vtanh.f32 %v1160_v31  ;;  %v1158_v60 = vmul.f32 0.7978846, %v1126_v58  ;;  %v1131_v0 = vadd.f32 %v1099_v37, %v4652_v18  ;;  %v1097_v3 = vmul.f32 0.044715, %v1065_v40  ;;  %v958_v4 = vpop.f32.mrf.mxu1 }
 0x264   : > { %v4683_v8 = vpop.eup %3702  ;;  %v4686_v10 = vmul.f32 %v1248_v47, %v4583_v30  ;;  %v1100_v52 = vmul.f32 0.044715, %v1068_v55  ;;  %v1034_v23 = vmul.f32 %v4677_v17, %v4677_v17  ;;  %v1039_v12 = vmul.f32 %v4680_v59, %v4680_v59 }
 0x265   : > { %3716 = vtanh.f32 %v1158_v60  ;;  %v1163_v50 = vmul.f32 0.7978846, %v1131_v0  ;;  %v1129_v31 = vadd.f32 %v1097_v3, %v4659_v56  ;;  %v4694_v58 = vadd.f32 %v4569_v9, %v958_v4  ;;  %v3354_v37 = vpop.f32.mrf.mxu1 }
 0x266   : > { %v4696_v40 = vpop.eup %3704  ;;  %v1132_v55 = vadd.f32 %v1100_v52, %v4662_v62  ;;  %v1066_v30 = vmul.f32 %v1034_v23, %v4677_v17  ;;  %v1071_v45 = vmul.f32 %v1039_v12, %v4680_v59  ;;  %v4706_v3 = vadd.f32 %v3354_v37, %v4569_v9 }
 0x267   : > { %3718 = vtanh.f32 %v1163_v50  ;;  %v1161_v60 = vmul.f32 0.7978846, %v1129_v31  ;;  %v1037_v0 = vmul.f32 %v4694_v58, %v4694_v58  ;;  %v961_v4 = vpop.f32.mrf.mxu1  ;;  %v1213_v37 = vadd.f32 1.0, %v3699_v28 }
 0x268   : > { %v4708_v35 = vpop.eup %3706  ;;  %v1164_v34 = vmul.f32 0.7978846, %v1132_v55  ;;  %v1098_v46 = vmul.f32 0.044715, %v1066_v30  ;;  %v1103_v47 = vmul.f32 0.044715, %v1071_v45  ;;  %v4711_v52 = vadd.f32 %v4569_v9, %v961_v4 }
 0x269   : > { %v4713_v23 = vpop.eup %3708  ;;  %3720 = vtanh.f32 %v1161_v60  ;;  %v1069_v12 = vmul.f32 %v1037_v0, %v4694_v58  ;;  %v1040_v50 = vmul.f32 %v4706_v3, %v4706_v3  ;;  %v3357_v31 = vpop.f32.mrf.mxu1  ;;  %v1214_v27 = vadd.f32 1.0, %v3701_v48 }
 0x26a   : > { %3722 = vtanh.f32 %v1164_v34  ;;  %v1130_v32 = vadd.f32 %v1098_v46, %v4677_v17  ;;  %v1135_v55 = vadd.f32 %v1103_v47, %v4680_v59  ;;  %v1038_v45 = vmul.f32 %v4711_v52, %v4711_v52 }
 0x26b   : > { %v4722_v30 = vpop.eup %3710  ;;  %v1101_v4 = vmul.f32 0.044715, %v1069_v12  ;;  %v1072_v60 = vmul.f32 %v1040_v50, %v4706_v3  ;;  %v4726_v0 = vadd.f32 %v3357_v31, %v4569_v9  ;;  %v974_v26 = vpop.f32.mrf.mxu1  ;;  %v1245_v46 = vmul.f32 0.5, %v1213_v37 }
 0x26c   : > { %v1162_v33 = vmul.f32 0.7978846, %v1130_v32  ;;  %v1167_v28 = vmul.f32 0.7978846, %v1135_v55  ;;  %v1070_v34 = vmul.f32 %v1038_v45, %v4711_v52  ;;  %v1246_v15 = vmul.f32 0.5, %v1214_v27 }
 0x26d   : > { %v4729_v24 = vpop.eup %3712  ;;  %v1133_v47 = vadd.f32 %v1101_v4, %v4694_v58  ;;  %v1104_v16 = vmul.f32 0.044715, %v1072_v60  ;;  %v1043_v12 = vmul.f32 %v4726_v0, %v4726_v0  ;;  %v3358_v50 = vpop.f32.mrf.mxu1  ;;  %v1277_v48 = vmul.f32 %v1245_v46, %v4577_v21 }
 0x26e   : > { %3724 = vtanh.f32 %v1162_v33  ;;  %v1102_v31 = vmul.f32 0.044715, %v1070_v34  ;;  %v4736_v32 = vadd.f32 %v4569_v9, %v974_v26  ;;  %v1278_v27 = vmul.f32 %v1246_v15, %v4589_v41 }
 0x26f   : > { %3726 = vtanh.f32 %v1167_v28  ;;  %v1165_v55 = vmul.f32 0.7978846, %v1133_v47  ;;  %v1136_v37 = vadd.f32 %v1104_v16, %v4706_v3  ;;  %v1075_v45 = vmul.f32 %v1043_v12, %v4726_v0  ;;  %v977_v4 = vpop.f32.mrf.mxu1 }
 0x270   : > { %v4740_v60 = vpop.eup %3714  ;;  %v1134_v25 = vadd.f32 %v1102_v31, %v4711_v52  ;;  %v1041_v33 = vmul.f32 %v4736_v32, %v4736_v32  ;;  %v4747_v21 = vadd.f32 %v3358_v50, %v4569_v9  ;;  %v4750_v16 = vadd.f32 %v4569_v9, %v977_v4 }
 0x271   : > { %3728 = vtanh.f32 %v1165_v55  ;;  %v1168_v26 = vmul.f32 0.7978846, %v1136_v37  ;;  %v1107_v28 = vmul.f32 0.044715, %v1075_v45  ;;  %v3361_v34 = vpop.f32.mrf.mxu1  ;;  %v1309_v12 = vpack.c.bf16 %v1278_v27, %v1277_v48 }
 0x272   : > { %v4752_v46 = vpop.eup %3716  ;;  %v1166_v47 = vmul.f32 0.7978846, %v1134_v25  ;;  %v1073_v31 = vmul.f32 %v1041_v33, %v4736_v32  ;;  %v1044_v15 = vmul.f32 %v4747_v21, %v4747_v21  ;;  %v1042_v50 = vmul.f32 %v4750_v16, %v4750_v16 }
 0x273   : > { %3730 = vtanh.f32 %v1168_v26  ;;  %v1139_v41 = vadd.f32 %v1107_v28, %v4726_v0  ;;  %v4761_v55 = vadd.f32 %v3361_v34, %v4569_v9  ;;  %v990_v37 = vpop.f32.mrf.mxu1  ;;  %3383 = vmatprep.mubr.bf16.mxu0 %v1309_v12  ;;  %v1217_v4 = vadd.f32 1.0, %v4696_v40 }
 0x274   : > { %v4763_v45 = vpop.eup %3718  ;;  %3732 = vtanh.f32 %v1166_v47  ;;  %v1105_v25 = vmul.f32 0.044715, %v1073_v31  ;;  %v1076_v48 = vmul.f32 %v1044_v15, %v4747_v21  ;;  %v5980_v33 = vpack.c.bf16 %v4686_v10, %v4669_v20 }
 0x275   : > { %v1171_v27 = vmul.f32 0.7978846, %v1139_v41  ;;  %v1074_v26 = vmul.f32 %v1042_v50, %v4750_v16  ;;  %v1047_v28 = vmul.f32 %v4761_v55, %v4761_v55  ;;  %v1218_v34 = vadd.f32 1.0, %v4713_v23  ;;  %v3362_v11 = vpop.f32.mrf.mxu1 }
 0x276   : > { %3384 = vmatmul.mubr.bf16.vlgmr.msra.gmra.mxu0 %v5980_v33  ;;  %v4774_v47 = vpop.eup %3720  ;;  %v1137_v12 = vadd.f32 %v1105_v25, %v4736_v32  ;;  %v1108_v31 = vmul.f32 0.044715, %v1076_v48  ;;  %v1249_v15 = vmul.f32 0.5, %v1217_v4  ;;  %v4778_v40 = vadd.f32 %v4569_v9, %v990_v37 }
 0x277   : > { %v4780_v41 = vpop.eup %3722  ;;  %3734 = vtanh.f32 %v1171_v27  ;;  %v1106_v20 = vmul.f32 0.044715, %v1074_v26  ;;  %v1079_v10 = vmul.f32 %v1047_v28, %v4761_v55  ;;  %v1250_v50 = vmul.f32 0.5, %v1218_v34  ;;  %v993_v33 = vpop.f32.mrf.mxu1 }
 0x278   : > { %v1169_v19 = vmul.f32 0.7978846, %v1137_v12  ;;  %v1140_v23 = vadd.f32 %v1108_v31, %v4747_v21  ;;  %v1281_v13 = vmul.f32 %v1249_v15, %v4603_v7  ;;  %v1045_v25 = vmul.f32 %v4778_v40, %v4778_v40 }
 0x279   : > { %v1138_v48 = vadd.f32 %v1106_v20, %v4750_v16  ;;  %v1111_v37 = vmul.f32 0.044715, %v1079_v10  ;;  %v1282_v4 = vmul.f32 %v1250_v50, %v4614_v36  ;;  %v1219_v27 = vadd.f32 1.0, %v4683_v8  ;;  %v3365_v26 = vpop.f32.mrf.mxu1 }
 0x27a   : > { %3736 = vtanh.f32 %v1169_v19  ;;  %v1172_v28 = vmul.f32 0.7978846, %v1140_v23  ;;  %v1077_v34 = vmul.f32 %v1045_v25, %v4778_v40  ;;  %v1220_v12 = vadd.f32 1.0, %v4708_v35 }
 0x27b   : > { %v4792_v31 = vpop.eup %3724  ;;  %v1170_v7 = vmul.f32 0.7978846, %v1138_v48  ;;  %v1143_v15 = vadd.f32 %v1111_v37, %v4761_v55  ;;  %v1311_v14 = vpack.c.bf16 %v1282_v4, %v1281_v13  ;;  %v1251_v63 = vmul.f32 0.5, %v1219_v27  ;;  %v1006_v19 = vpop.f32.mrf.mxu1 }
 0x27c   : > { %v4795_v20 = vpop.eup %3726  ;;  %3738 = vtanh.f32 %v1172_v28  ;;  %v1109_v36 = vmul.f32 0.044715, %v1077_v34  ;;  %v1252_v10 = vmul.f32 0.5, %v1220_v12  ;;  %v4798_v8 = vadd.f32 %v3362_v11, %v4569_v9 }
 0x27d   : > { %3740 = vtanh.f32 %v1170_v7  ;;  %3387 = vmatprep.mubr.bf16.mxu0 %v1311_v14  ;;  %v1283_v35 = vmul.f32 %v1251_v63, %v4596_v61  ;;  %v4802_v50 = vadd.f32 %v4569_v9, %v993_v33  ;;  %v4811_v11 = vadd.f32 %v3365_v26, %v4569_v9  ;;  %v3366_v34 = vpop.f32.mrf.mxu1 }
 0x27e   : > { %v4804_v23 = vpop.eup %3728  ;;  %v1141_v13 = vadd.f32 %v1109_v36, %v4778_v40  ;;  %v1284_v25 = vmul.f32 %v1252_v10, %v4610_v22  ;;  %v1048_v48 = vmul.f32 %v4798_v8, %v4798_v8  ;;  %v1175_v37 = vmul.f32 0.7978846, %v1143_v15 }
 0x27f   : > { %v1046_v14 = vmul.f32 %v4802_v50, %v4802_v50  ;;  %v1221_v63 = vadd.f32 1.0, %v4729_v24  ;;  %v1222_v61 = vadd.f32 1.0, %v4752_v46  ;;  %v1051_v28 = vmul.f32 %v4811_v11, %v4811_v11 }
 0x280   : > { %v4817_v33 = vpop.eup %3730  ;;  %v1173_v4 = vmul.f32 0.7978846, %v1141_v13  ;;  %v1312_v27 = vpack.c.bf16 %v1284_v25, %v1283_v35  ;;  %v1080_v22 = vmul.f32 %v1048_v48, %v4798_v8  ;;  %v4824_v36 = vadd.f32 %v4569_v9, %v1006_v19 }
 0x281   : > { %v3733_v26 = vpop.eup %3732  ;;  %v1078_v12 = vmul.f32 %v1046_v14, %v4802_v50  ;;  %v1253_v7 = vmul.f32 0.5, %v1221_v63  ;;  %v1254_v15 = vmul.f32 0.5, %v1222_v61  ;;  %v1083_v46 = vmul.f32 %v1051_v28, %v4811_v11 }
 0x282   : > { %3742 = vtanh.f32 %v1173_v4  ;;  %3388 = vmatmul.mubr.bf16.gmra.mxu0 %v1312_v27  ;;  %v1112_v24 = vmul.f32 0.044715, %v1080_v22  ;;  %v1223_v10 = vadd.f32 1.0, %v4722_v30  ;;  %v1049_v48 = vmul.f32 %v4824_v36, %v4824_v36  ;;  %v1009_v27 = vpop.f32.mrf.mxu1 }
 0x283   : > { %v1110_v35 = vmul.f32 0.044715, %v1078_v12  ;;  %v1285_v13 = vmul.f32 %v1253_v7, %v4630_v6  ;;  %v1286_v25 = vmul.f32 %v1254_v15, %v4645_v38  ;;  %v1115_v63 = vmul.f32 0.044715, %v1083_v46 }
 0x284   : > { %v4832_v14 = vpop.eup %3734  ;;  %v1144_v19 = vadd.f32 %v1112_v24, %v4798_v8  ;;  %v1224_v61 = vadd.f32 1.0, %v4740_v60  ;;  %v1255_v4 = vmul.f32 0.5, %v1223_v10  ;;  %v1081_v28 = vmul.f32 %v1049_v48, %v4824_v36 }
 0x285   : > { %v1142_v22 = vadd.f32 %v1110_v35, %v4802_v50  ;;  %v1313_v30 = vpack.c.bf16 %v1286_v25, %v1285_v13  ;;  %v4839_v6 = vadd.f32 %v3366_v34, %v4569_v9  ;;  %3744 = vtanh.f32 %v1175_v37 }
 0x286   : > { %v1176_v38 = vmul.f32 0.7978846, %v1144_v19  ;;  %v1147_v12 = vadd.f32 %v1115_v63, %v4811_v11  ;;  %v1256_v7 = vmul.f32 0.5, %v1224_v61  ;;  %v1113_v46 = vmul.f32 0.044715, %v1081_v28 }
 0x287   : > { %v3737_v15 = vpop.eup %3736  ;;  %v1174_v24 = vmul.f32 0.7978846, %v1142_v22  ;;  %3391 = vmatprep.mubr.bf16.mxu0 %v1313_v30  ;;  %v1052_v60 = vmul.f32 %v4839_v6, %v4839_v6  ;;  %v4845_v10 = vadd.f32 %v4569_v9, %v1009_v27  ;;  %v1287_v35 = vmul.f32 %v1255_v4, %v4622_v49 }
 0x288   : > { %3746 = vtanh.f32 %v1176_v38  ;;  %v1288_v34 = vmul.f32 %v1256_v7, %v4637_v29  ;;  %v1225_v37 = vadd.f32 1.0, %v4774_v47  ;;  %v1145_v25 = vadd.f32 %v1113_v46, %v4824_v36 }
 0x289   : > { %v3739_v13 = vpop.eup %3738  ;;  %3748 = vtanh.f32 %v1174_v24  ;;  %v1084_v48 = vmul.f32 %v1052_v60, %v4839_v6  ;;  %v1050_v19 = vmul.f32 %v4845_v10, %v4845_v10  ;;  %v1179_v61 = vmul.f32 0.7978846, %v1147_v12 }
 0x28a   : > { %v3741_v63 = vpop.eup %3740  ;;  %v1314_v9 = vpack.c.bf16 %v1288_v34, %v1287_v35  ;;  %v1226_v27 = vadd.f32 1.0, %v4792_v31  ;;  %v1257_v22 = vmul.f32 0.5, %v1225_v37  ;;  %v1177_v49 = vmul.f32 0.7978846, %v1145_v25 }
 0x28b   : > { %v1116_v4 = vmul.f32 0.044715, %v1084_v48  ;;  %v1082_v29 = vmul.f32 %v1050_v19, %v4845_v10  ;;  %v1227_v47 = vadd.f32 1.0, %v4763_v45  ;;  %v1228_v38 = vadd.f32 1.0, %v4780_v41 }
 0x28c   : > { %3392 = vmatmul.mubr.bf16.gmra.mxu0 %v1314_v9  ;;  %v1258_v30 = vmul.f32 0.5, %v1226_v27  ;;  %v1289_v28 = vmul.f32 %v1257_v22, %v4659_v56  ;;  %v1229_v7 = vadd.f32 1.0, %v4804_v23  ;;  %3750 = vtanh.f32 %v1177_v49 }
 0x28d   : > { %v1148_v12 = vadd.f32 %v1116_v4, %v4839_v6  ;;  %v1114_v24 = vmul.f32 0.044715, %v1082_v29  ;;  %v1259_v31 = vmul.f32 0.5, %v1227_v47  ;;  %v1260_v60 = vmul.f32 0.5, %v1228_v38 }
 0x28e   : > { %v1290_v46 = vmul.f32 %v1258_v30, %v4677_v17  ;;  %v1230_v35 = vadd.f32 1.0, %v3733_v26  ;;  %v1261_v34 = vmul.f32 0.5, %v1229_v7  ;;  %3752 = vtanh.f32 %v1179_v61 }
 0x28f   : > { %v3743_v37 = vpop.eup %3742  ;;  %v1180_v45 = vmul.f32 0.7978846, %v1148_v12  ;;  %v1146_v25 = vadd.f32 %v1114_v24, %v4845_v10  ;;  %v1291_v56 = vmul.f32 %v1259_v31, %v4652_v18  ;;  %v1292_v23 = vmul.f32 %v1260_v60, %v4662_v62 }
 0x290   : > { %v1315_v41 = vpack.c.bf16 %v1290_v46, %v1289_v28  ;;  %v1262_v48 = vmul.f32 0.5, %v1230_v35  ;;  %v1231_v19 = vadd.f32 1.0, %v4795_v20  ;;  %v1293_v17 = vmul.f32 %v1261_v34, %v4694_v58 }
 0x291   : > { %3754 = vtanh.f32 %v1180_v45  ;;  %v1178_v9 = vmul.f32 0.7978846, %v1146_v25  ;;  %v1232_v26 = vadd.f32 1.0, %v4817_v33  ;;  %v1316_v27 = vpack.c.bf16 %v1292_v23, %v1291_v56 }
 0x292   : > { %3395 = vmatprep.mubr.bf16.mxu0 %v1315_v41  ;;  %v1294_v61 = vmul.f32 %v1262_v48, %v4711_v52  ;;  %v1233_v22 = vadd.f32 1.0, %v3737_v15  ;;  %v1234_v49 = vadd.f32 1.0, %v3741_v63  ;;  %v3745_v4 = vpop.eup %3744  ;;  %v1263_v29 = vmul.f32 0.5, %v1231_v19 }
 0x293   : > { %3756 = vtanh.f32 %v1178_v9  ;;  %v1264_v18 = vmul.f32 0.5, %v1232_v26  ;;  %v1237_v28 = vadd.f32 1.0, %v3743_v37  ;;  %v1235_v52 = vadd.f32 1.0, %v4832_v14 }
 0x294   : > { %3396 = vmatmul.mubr.bf16.gmra.mxu0 %v1316_v27  ;;  %v1317_v62 = vpack.c.bf16 %v1294_v61, %v1293_v17  ;;  %v1265_v47 = vmul.f32 0.5, %v1233_v22  ;;  %v1266_v20 = vmul.f32 0.5, %v1234_v49  ;;  %v1236_v15 = vadd.f32 1.0, %v3739_v13 }
 0x295   : > { %v3747_v30 = vpop.eup %3746  ;;  %v1296_v58 = vmul.f32 %v1264_v18, %v4706_v3  ;;  %v1295_v12 = vmul.f32 %v1263_v29, %v4680_v59  ;;  %v1269_v31 = vmul.f32 0.5, %v1237_v28  ;;  %v1267_v34 = vmul.f32 0.5, %v1235_v52 }
 0x296   : > { %v3749_v38 = vpop.eup %3748  ;;  %3399 = vmatprep.mubr.bf16.mxu0 %v1317_v62  ;;  %v1298_v33 = vmul.f32 %v1266_v20, %v4750_v16  ;;  %v1297_v63 = vmul.f32 %v1265_v47, %v4736_v32  ;;  %v1268_v37 = vmul.f32 0.5, %v1236_v15  ;;  %v1239_v3 = vadd.f32 1.0, %v3745_v4  ;;  %v3686_v20 = vld [vmem:[#allocation11 + $0x38] sm:$0xff]  }
 0x297   : > { %v1238_v7 = vadd.f32 1.0, %v3749_v38  ;;  %v1318_v35 = vpack.c.bf16 %v1296_v58, %v1295_v12  ;;  %v1240_v25 = vadd.f32 1.0, %v3747_v30  ;;  %v1301_v16 = vmul.f32 %v1269_v31, %v4778_v40  ;;  %v3687_v30 = vld [vmem:[#allocation11 + $0x30] sm:$0xff]   ;;  %3463 = vmatprep.subr.bf16.mxu0 %v3686_v20 }
 0x298   : > { %v1319_v24 = vpack.c.bf16 %v1298_v33, %v1297_v63  ;;  %v1299_v59 = vmul.f32 %v1267_v34, %v4726_v0  ;;  %v1300_v56 = vmul.f32 %v1268_v37, %v4747_v21  ;;  %v1271_v23 = vmul.f32 0.5, %v1239_v3  ;;  %3464 = vmatpush3.bf16.msra.mxu0 %v3686_v20 }
 0x299   : > { %v1270_v46 = vmul.f32 0.5, %v1238_v7  ;;  %v3751_v60 = vpop.eup %3750  ;;  %v1272_v48 = vmul.f32 0.5, %v1240_v25  ;;  %3465 = vmatprep.subr.bf16.mxu0 %v3687_v30 }
 0x29a   : > { %v1241_v32 = vadd.f32 1.0, %v3751_v60  ;;  %v1320_v26 = vpack.c.bf16 %v1300_v56, %v1299_v59  ;;  %v1303_v61 = vmul.f32 %v1271_v23, %v4761_v55 }
 0x29b   : > { %v3753_v45 = vpop.eup %3752  ;;  %v1302_v14 = vmul.f32 %v1270_v46, %v4802_v50  ;;  %v1304_v40 = vmul.f32 %v1272_v48, %v4798_v8  ;;  %v3685_v8 = vld [vmem:[#allocation10] sm:$0xff]  }
 0x29c   : > { %3400 = vmatmul.mubr.bf16.gmra.mxu0 %v1318_v35  ;;  %v1273_v17 = vmul.f32 0.5, %v1241_v32  ;;  %v1243_v50 = vadd.f32 1.0, %v3753_v45  ;;  %3429 = vmatprep.subr.bf16.mxu1 %v3685_v8 }
 0x29d   : > { %3403 = vmatprep.mubr.bf16.mxu0 %v1319_v24  ;;  %v1321_v19 = vpack.c.bf16 %v1302_v14, %v1301_v16  ;;  %v1322_v49 = vpack.c.bf16 %v1304_v40, %v1303_v61  ;;  %3430 = vmatpush3.bf16.msra.mxu1 %v3685_v8 }
 0x29e   : > { %v3755_v13 = vpop.eup %3754  ;;  %v1305_v0 = vmul.f32 %v1273_v17, %v4824_v36  ;;  %v1275_v4 = vmul.f32 0.5, %v1243_v50  ;;  %v3688_v36 = vld [vmem:[#allocation11 + $0x28] sm:$0xff]   ;;  %3466 = vmatpush3.bf16.msra.mxu0 %v3687_v30 }
 0x29f   : > { %v1244_v22 = vadd.f32 1.0, %v3755_v13  ;;  %3467 = vmatprep.subr.bf16.mxu0 %v3688_v36  ;;  %v5981_v17 = vld [vmem:[#allocation20_spill] sm:$0xff] }
 0x2a0   : > { %v3757_v41 = vpop.eup %3756  ;;  %v1307_v29 = vmul.f32 %v1275_v4, %v4811_v11  ;;  %v4887_v11 = vld [vmem:[%s5888_s6 + $0x1] ss:$0 sm:$0xff] }
 0x2a1   : > { %v1242_v9 = vadd.f32 1.0, %v3757_v41  ;;  %v1276_v18 = vmul.f32 0.5, %v1244_v22 }
 0x2a2   : > { %3468 = vmatpush3.bf16.msra.mxu0 %v3688_v36 }
 0x2a3   : > { %v1274_v27 = vmul.f32 0.5, %v1242_v9  ;;  %v1308_v47 = vmul.f32 %v1276_v18, %v4839_v6  ;;  %v5984_v18 = vld [vmem:[#allocation22_spill] sm:$0xff] }
 0x2a4   : > { %3404 = vmatmul.mubr.bf16.gmra.mxu0 %v1320_v26 }
 0x2a5   : > { %3407 = vmatprep.mubr.bf16.mxu0 %v1321_v19  ;;  %v1306_v21 = vmul.f32 %v1274_v27, %v4845_v10  ;;  %v1324_v55 = vpack.c.bf16 %v1308_v47, %v1307_v29  ;;  %v5986_v29 = vld [vmem:[#allocation26_spill] sm:$0xff] }
 0x2a7   : > { %v1323_v62 = vpack.c.bf16 %v1306_v21, %v1305_v0  ;;  %v5982_v21 = vld [vmem:[#allocation23_spill] sm:$0xff] }
 0x2ac   : > { %3408 = vmatmul.mubr.bf16.gmra.mxu0 %v1322_v49 }
 0x2ad   : > { %3411 = vmatprep.mubr.bf16.mxu0 %v1323_v62 }
 0x2b4   : > { %3412 = vmatmul.mubr.bf16.gmra.mxu0 %v1324_v55  ;;  %v5988_v55 = vld [vmem:[#allocation21_spill] sm:$0xff] }
 0x336   : > { %v3385_v10 = vpop.f32.mrf.mxu0 }
 0x337   : > { %v1436_v33 = vadd.f32 %v3385_v10, %v4887_v11 }
 0x338   : > { %v1427_v28 = vpop.f32.mrf.mxu0 }
 0x339   : > { %v1428_v38 = vadd.f32 %v4887_v11, %v1427_v28  ;;  %v4903_v24 = vadd.f32 %v1436_v33, %v4451_v44 }
 0x33a   : > { %v3386_v6 = vpop.f32.mrf.mxu0 }
 0x33b   : > { %v1439_v58 = vadd.f32 %v3386_v6, %v4887_v11  ;;  %v4897_v7 = vadd.f32 %v1428_v38, %v4445_v42 }
 0x33c   : > { %v1430_v52 = vpop.f32.mrf.mxu0 }
 0x33d   : > { %v1431_v15 = vadd.f32 %v4887_v11, %v1430_v52  ;;  %v4894_v63 = vadd.f32 %v1439_v58, %v4442_v39  ;;  %v5989_v52 = vld [vmem:[#allocation28_spill] sm:$0xff] }
 0x33f   : > { %v4900_v12 = vadd.f32 %v1431_v15, %v4448_v43  ;;  %v1587_v46 = vpack.c.bf16 %v4894_v63, %v4903_v24 }
 0x341   : > { %v1586_v31 = vpack.c.bf16 %v4900_v12, %v4897_v7 }
 0x342   : > { %v3389_v60 = vpop.f32.mrf.mxu0 }
 0x343   : > { %3431 = vmatprep.mubr.bf16.mxu1 %v1586_v31  ;;  %v1452_v43 = vadd.f32 %v3389_v60, %v4887_v11 }
 0x344   : > { %3432 = vmatmul.mubr.bf16.vlgmr.msra.gmra.mxu1 %v1587_v46  ;;  %v1443_v39 = vpop.f32.mrf.mxu0  ;;  %v5991_v46 = vld [vmem:[#allocation24_spill] sm:$0xff] }
 0x345   : > { %v1444_v42 = vadd.f32 %v4887_v11, %v1443_v39  ;;  %v4923_v16 = vadd.f32 %v1452_v43, %v4458_v51  ;;  %v5993_v39 = vld [vmem:[#allocation25_spill] sm:$0xff] }
 0x346   : > { %v3390_v35 = vpop.f32.mrf.mxu0 }
 0x347   : > { %v1455_v34 = vadd.f32 %v3390_v35, %v4887_v11  ;;  %v4917_v3 = vadd.f32 %v1444_v42, %v4461_v53  ;;  %v5995_v42 = vld [vmem:[#allocation27_spill] sm:$0xff] }
 0x348   : > { %v1446_v37 = vpop.f32.mrf.mxu0 }
 0x349   : > { %v1447_v44 = vadd.f32 %v4887_v11, %v1446_v37  ;;  %v4914_v45 = vadd.f32 %v1455_v34, %v4464_v54 }
 0x34b   : > { %v4920_v25 = vadd.f32 %v1447_v44, %v4467_v57  ;;  %v1589_v59 = vpack.c.bf16 %v4914_v45, %v4923_v16 }
 0x34c   : > { %v3393_v14 = vpop.f32.mrf.mxu0 }
 0x34d   : > { %v1588_v32 = vpack.c.bf16 %v4920_v25, %v4917_v3  ;;  %v1468_v57 = vadd.f32 %v3393_v14, %v4887_v11 }
 0x34e   : > { %v1459_v13 = vpop.f32.mrf.mxu0 }
 0x34f   : > { %3435 = vmatprep.mubr.bf16.mxu1 %v1588_v32  ;;  %v1460_v53 = vadd.f32 %v4887_v11, %v1459_v13  ;;  %v4943_v26 = vadd.f32 %v1468_v57, %v5981_v17  ;;  %v6001_v17 = vld [vmem:[#allocation30_spill] sm:$0xff] }
 0x350   : > { %v3394_v54 = vpop.f32.mrf.mxu0  ;;  %3436 = vmatmul.mubr.bf16.gmra.mxu1 %v1589_v59 }
 0x351   : > { %v1471_v56 = vadd.f32 %v3394_v54, %v4887_v11  ;;  %v4937_v19 = vadd.f32 %v1460_v53, %v4477_v1 }
 0x352   : > { %v1462_v41 = vpop.f32.mrf.mxu0 }
 0x353   : > { %v1463_v51 = vadd.f32 %v4887_v11, %v1462_v41  ;;  %v4934_v23 = vadd.f32 %v1471_v56, %v4480_v2  ;;  %v5997_v56 = vld [vmem:[#allocation32_spill] sm:$0xff] }
 0x354   : > { %v3397_v48 = vpop.f32.mrf.mxu0 }
 0x355   : > { %v4940_v9 = vadd.f32 %v1463_v51, %v4483_v5  ;;  %v1591_v50 = vpack.c.bf16 %v4934_v23, %v4943_v26  ;;  %v1484_v1 = vadd.f32 %v3397_v48, %v4887_v11  ;;  %v5999_v51 = vld [vmem:[#allocation29_spill] sm:$0xff] }
 0x356   : > { %v1475_v27 = vpop.f32.mrf.mxu0 }
 0x357   : > { %v1590_v61 = vpack.c.bf16 %v4940_v9, %v4937_v19  ;;  %v1476_v2 = vadd.f32 %v4887_v11, %v1475_v27  ;;  %v4963_v8 = vadd.f32 %v1484_v1, %v5988_v55 }
 0x358   : > { %v3398_v40 = vpop.f32.mrf.mxu0 }
 0x359   : > { %v1487_v22 = vadd.f32 %v3398_v40, %v4887_v11  ;;  %3439 = vmatprep.mubr.bf16.mxu1 %v1590_v61  ;;  %v4957_v62 = vadd.f32 %v1476_v2, %v5984_v18  ;;  %v6003_v61 = vld [vmem:[#allocation31_spill] sm:$0xff] }
 0x35a   : > { %v1478_v5 = vpop.f32.mrf.mxu0  ;;  %3440 = vmatmul.mubr.bf16.gmra.mxu1 %v1591_v50 }
 0x35b   : > { %v1479_v0 = vadd.f32 %v4887_v11, %v1478_v5  ;;  %v4954_v49 = vadd.f32 %v1487_v22, %v5982_v21  ;;  %5985 = vst [vmem:[#allocation23_spill] sm:$0xff] %v4957_v62 }
 0x35c   : > { %v3401_v4 = vpop.f32.mrf.mxu0 }
 0x35d   : > { %5983 = vst [vmem:[#allocation20_spill] sm:$0xff] %v4954_v49  ;;  %v4960_v47 = vadd.f32 %v1479_v0, %v5986_v29  ;;  %v1593_v10 = vpack.c.bf16 %v4954_v49, %v4963_v8  ;;  %v1500_v38 = vadd.f32 %v3401_v4, %v4887_v11  ;;  %v6005_v29 = vld [vmem:[#allocation36_spill] sm:$0xff] }
 0x35e   : > { %v1491_v20 = vpop.f32.mrf.mxu0 }
 0x35f   : > { %5987 = vst [vmem:[#allocation22_spill] sm:$0xff] %v4960_v47  ;;  %v1592_v30 = vpack.c.bf16 %v4960_v47, %v4957_v62  ;;  %v1492_v28 = vadd.f32 %v4887_v11, %v1491_v20  ;;  %v4983_v34 = vadd.f32 %v1500_v38, %v5995_v42 }
 0x360   : > { %v3402_v36 = vpop.f32.mrf.mxu0 }
 0x361   : > { %v1503_v6 = vadd.f32 %v3402_v36, %v4887_v11  ;;  %3443 = vmatprep.mubr.bf16.mxu1 %v1592_v30  ;;  %v4977_v60 = vadd.f32 %v1492_v28, %v5991_v46  ;;  %5996 = vst [vmem:[#allocation24_spill] sm:$0xff] %v4983_v34  ;;  %v6007_v30 = vld [vmem:[#allocation33_spill] sm:$0xff] }
 0x362   : > { %v1494_v58 = vpop.f32.mrf.mxu0  ;;  %3444 = vmatmul.mubr.bf16.gmra.mxu1 %v1593_v10  ;;  %v6009_v10 = vld [vmem:[#allocation34_spill] sm:$0xff] }
 0x363   : > { %v1495_v33 = vadd.f32 %v4887_v11, %v1494_v58  ;;  %v4974_v15 = vadd.f32 %v1503_v6, %v5989_v52  ;;  %5992 = vst [vmem:[#allocation21_spill] sm:$0xff] %v4977_v60  ;;  %v6011_v6 = vld [vmem:[#allocation35_spill] sm:$0xff] }
 0x364   : > { %v3405_v31 = vpop.f32.mrf.mxu0 }
 0x365   : > { %5990 = vst [vmem:[#allocation26_spill] sm:$0xff] %v4974_v15  ;;  %v4980_v35 = vadd.f32 %v1495_v33, %v5993_v39  ;;  %v1595_v14 = vpack.c.bf16 %v4974_v15, %v4983_v34  ;;  %v1516_v59 = vadd.f32 %v3405_v31, %v4887_v11 }
 0x366   : > { %v1507_v43 = vpop.f32.mrf.mxu0 }
 0x367   : > { %5994 = vst [vmem:[#allocation28_spill] sm:$0xff] %v4980_v35  ;;  %v1594_v37 = vpack.c.bf16 %v4980_v35, %v4977_v60  ;;  %v1508_v32 = vadd.f32 %v4887_v11, %v1507_v43  ;;  %v5003_v40 = vadd.f32 %v1516_v59, %v6003_v61  ;;  %v6017_v59 = vld [vmem:[#allocation38_spill] sm:$0xff]  ;;  %v3691_v61 = vld [vmem:[#allocation11 + $0x10] sm:$0xff]  }
 0x368   : > { %v3406_v44 = vpop.f32.mrf.mxu0 }
 0x369   : > { %v1519_v13 = vadd.f32 %v3406_v44, %v4887_v11  ;;  %3447 = vmatprep.mubr.bf16.mxu1 %v1594_v37  ;;  %v4997_v48 = vadd.f32 %v1508_v32, %v5999_v51  ;;  %6004 = vst [vmem:[#allocation29_spill] sm:$0xff] %v5003_v40  ;;  %v6013_v44 = vld [vmem:[#allocation40_spill] sm:$0xff]  ;;  %v6015_v32 = vld [vmem:[#allocation37_spill] sm:$0xff] }
 0x36a   : > { %v1510_v54 = vpop.f32.mrf.mxu0  ;;  %3448 = vmatmul.mubr.bf16.gmra.mxu1 %v1595_v14 }
 0x36b   : > { %v1511_v53 = vadd.f32 %v4887_v11, %v1510_v54  ;;  %v4994_v57 = vadd.f32 %v1519_v13, %v5997_v56  ;;  %6000 = vst [vmem:[#allocation27_spill] sm:$0xff] %v4997_v48 }
 0x36c   : > { %v3409_v41 = vpop.f32.mrf.mxu0 }
 0x36d   : > { %5998 = vst [vmem:[#allocation25_spill] sm:$0xff] %v4994_v57  ;;  %v5000_v27 = vadd.f32 %v1511_v53, %v6001_v17  ;;  %v1597_v1 = vpack.c.bf16 %v4994_v57, %v5003_v40  ;;  %v1532_v21 = vadd.f32 %v3409_v41, %v4887_v11  ;;  %v6019_v53 = vld [vmem:[#allocation39_spill] sm:$0xff]  ;;  %v3690_v17 = vld [vmem:[#allocation11 + $0x18] sm:$0xff]  }
 0x36e   : > { %v1523_v50 = vpop.f32.mrf.mxu0 }
 0x36f   : > { %6002 = vst [vmem:[#allocation32_spill] sm:$0xff] %v5000_v27  ;;  %v1596_v2 = vpack.c.bf16 %v5000_v27, %v4997_v48  ;;  %v1524_v5 = vadd.f32 %v4887_v11, %v1523_v50  ;;  %v5023_v38 = vadd.f32 %v1532_v21, %v6011_v6  ;;  %v3692_v50 = vld [vmem:[#allocation11 + $0x8] sm:$0xff]  }
 0x370   : > { %v3410_v22 = vpop.f32.mrf.mxu0 }
 0x371   : > { %v1535_v0 = vadd.f32 %v3410_v22, %v4887_v11  ;;  %3451 = vmatprep.mubr.bf16.mxu1 %v1596_v2  ;;  %v5017_v36 = vadd.f32 %v1524_v5, %v6007_v30  ;;  %6012 = vst [vmem:[#allocation33_spill] sm:$0xff] %v5023_v38  ;;  %v3693_v2 = vld [vmem:[#allocation11] sm:$0xff]  }
 0x372   : > { %v1526_v4 = vpop.f32.mrf.mxu0  ;;  %3452 = vmatmul.mubr.bf16.gmra.mxu1 %v1597_v1  ;;  %v5049_v22 = vld [vmem:[#allocation13 + $0x1] ss:$0 sm:$0xff] }
 0x373   : > { %v1527_v18 = vadd.f32 %v4887_v11, %v1526_v4  ;;  %v5014_v55 = vadd.f32 %v1535_v0, %v6005_v29  ;;  %6008 = vst [vmem:[#allocation31_spill] sm:$0xff] %v5017_v36 }
 0x374   : > { %v3413_v20 = vpop.f32.mrf.mxu0 }
 0x375   : > { %6006 = vst [vmem:[#allocation30_spill] sm:$0xff] %v5014_v55  ;;  %v5020_v28 = vadd.f32 %v1527_v18, %v6009_v10  ;;  %v1599_v31 = vpack.c.bf16 %v5014_v55, %v5023_v38  ;;  %v1548_v42 = vadd.f32 %v3413_v20, %v4887_v11 }
 0x376   : > { %v1539_v58 = vpop.f32.mrf.mxu0 }
 0x377   : > { %6010 = vst [vmem:[#allocation36_spill] sm:$0xff] %v5020_v28  ;;  %v1598_v33 = vpack.c.bf16 %v5020_v28, %v5017_v36  ;;  %v1540_v46 = vadd.f32 %v4887_v11, %v1539_v58  ;;  %v5043_v56 = vadd.f32 %v1548_v42, %v6019_v53 }
 0x378   : > { %v3414_v52 = vpop.f32.mrf.mxu0 }
 0x379   : > { %v1551_v39 = vadd.f32 %v3414_v52, %v4887_v11  ;;  %3455 = vmatprep.mubr.bf16.mxu1 %v1598_v33  ;;  %v5037_v13 = vadd.f32 %v1540_v46, %v6015_v32  ;;  %6020 = vst [vmem:[#allocation37_spill] sm:$0xff] %v5043_v56 }
 0x37a   : > { %v1542_v43 = vpop.f32.mrf.mxu0  ;;  %3456 = vmatmul.mubr.bf16.gmra.mxu1 %v1599_v31 }
 0x37b   : > { %v1543_v37 = vadd.f32 %v4887_v11, %v1542_v43  ;;  %v5034_v14 = vadd.f32 %v1551_v39, %v6013_v44  ;;  %6016 = vst [vmem:[#allocation35_spill] sm:$0xff] %v5037_v13  ;;  %v3689_v11 = vld [vmem:[#allocation11 + $0x20] sm:$0xff]  }
 0x37c   : > { %3469 = vmatprep.subr.bf16.mxu0 %v3689_v11 }
 0x37d   : > { %6014 = vst [vmem:[#allocation34_spill] sm:$0xff] %v5034_v14  ;;  %v5040_v54 = vadd.f32 %v1543_v37, %v6017_v59  ;;  %v1601_v51 = vpack.c.bf16 %v5034_v14, %v5043_v56  ;;  %3470 = vmatpush3.bf16.msra.mxu0 %v3689_v11 }
 0x37e   : > { %3471 = vmatprep.subr.bf16.mxu0 %v3690_v17 }
 0x37f   : > { %6018 = vst [vmem:[#allocation40_spill] sm:$0xff] %v5040_v54  ;;  %v1600_v41 = vpack.c.bf16 %v5040_v54, %v5037_v13 }
 0x381   : > { %3459 = vmatprep.mubr.bf16.mxu1 %v1600_v41  ;;  %3472 = vmatpush3.bf16.msra.mxu0 %v3690_v17 }
 0x382   : > { %3460 = vmatmul.mubr.bf16.gmra.mxu1 %v1601_v51  ;;  %3473 = vmatprep.subr.bf16.mxu0 %v3691_v61 }
 0x385   : > { %3474 = vmatpush3.bf16.msra.mxu0 %v3691_v61 }
 0x386   : > { %3475 = vmatprep.subr.bf16.mxu0 %v3692_v50 }
 0x389   : > { %3476 = vmatpush3.bf16.msra.mxu0 %v3692_v50 }
 0x38a   : > { %3477 = vmatprep.subr.bf16.mxu0 %v3693_v2 }
 0x38d   : > { %3478 = vmatpush3.bf16.msra.mxu0 %v3693_v2 }
 0x404   : > { %v3433_v1 = vpop.f32.mrf.mxu1 }
 0x405   : > { %v5052_v5 = vadd.f32 %v3433_v1, %v5049_v22 }
 0x406   : > { %v1704_v0 = vpop.f32.mrf.mxu1 }
 0x407   : > { %v1833_v21 = vmul.f32 %v5052_v5, %v5052_v5  ;;  %v5057_v4 = vadd.f32 %v5049_v22, %v1704_v0 }
 0x408   : > { %v3434_v18 = vpop.f32.mrf.mxu1 }
 0x409   : > { %v1865_v29 = vmul.f32 %v1833_v21, %v5052_v5  ;;  %v1831_v20 = vmul.f32 %v5057_v4, %v5057_v4  ;;  %v5063_v30 = vadd.f32 %v3434_v18, %v5049_v22 }
 0x40a   : > { %v1707_v10 = vpop.f32.mrf.mxu1 }
 0x40b   : > { %v1897_v6 = vmul.f32 0.044715, %v1865_v29  ;;  %v1863_v58 = vmul.f32 %v1831_v20, %v5057_v4  ;;  %v1834_v33 = vmul.f32 %v5063_v30, %v5063_v30  ;;  %v5069_v52 = vadd.f32 %v5049_v22, %v1707_v10 }
 0x40d   : > { %v1929_v31 = vadd.f32 %v1897_v6, %v5052_v5  ;;  %v1895_v46 = vmul.f32 0.044715, %v1863_v58  ;;  %v1866_v39 = vmul.f32 %v1834_v33, %v5063_v30  ;;  %v1832_v42 = vmul.f32 %v5069_v52, %v5069_v52 }
 0x40f   : > { %v1961_v43 = vmul.f32 0.7978846, %v1929_v31  ;;  %v1927_v37 = vadd.f32 %v1895_v46, %v5057_v4  ;;  %v1898_v44 = vmul.f32 0.044715, %v1866_v39  ;;  %v1864_v32 = vmul.f32 %v1832_v42, %v5069_v52 }
 0x410   : > { %v3437_v51 = vpop.f32.mrf.mxu1 }
 0x411   : > { %3758 = vtanh.f32 %v1961_v43  ;;  %v1959_v59 = vmul.f32 0.7978846, %v1927_v37  ;;  %v1930_v53 = vadd.f32 %v1898_v44, %v5063_v30  ;;  %v1896_v41 = vmul.f32 0.044715, %v1864_v32 }
 0x412   : > { %v5079_v11 = vadd.f32 %v3437_v51, %v5049_v22  ;;  %v1720_v50 = vpop.f32.mrf.mxu1 }
 0x413   : > { %3760 = vtanh.f32 %v1959_v59  ;;  %v1962_v17 = vmul.f32 0.7978846, %v1930_v53  ;;  %v1928_v61 = vadd.f32 %v1896_v41, %v5069_v52  ;;  %v5085_v1 = vadd.f32 %v5049_v22, %v1720_v50 }
 0x414   : > { %v1837_v2 = vmul.f32 %v5079_v11, %v5079_v11  ;;  %v3438_v21 = vpop.f32.mrf.mxu1 }
 0x415   : > { %3762 = vtanh.f32 %v1962_v17  ;;  %v1960_v0 = vmul.f32 0.7978846, %v1928_v61  ;;  %v1835_v29 = vmul.f32 %v5085_v1, %v5085_v1  ;;  %v5091_v20 = vadd.f32 %v3438_v21, %v5049_v22 }
 0x416   : > { %v1869_v18 = vmul.f32 %v1837_v2, %v5079_v11  ;;  %v1723_v10 = vpop.f32.mrf.mxu1 }
 0x417   : > { %3764 = vtanh.f32 %v1960_v0  ;;  %v1867_v58 = vmul.f32 %v1835_v29, %v5085_v1  ;;  %v1838_v33 = vmul.f32 %v5091_v20, %v5091_v20  ;;  %v5097_v31 = vadd.f32 %v5049_v22, %v1723_v10 }
 0x418   : > { %v1901_v6 = vmul.f32 0.044715, %v1869_v18 }
 0x419   : > { %v1899_v39 = vmul.f32 0.044715, %v1867_v58  ;;  %v1870_v42 = vmul.f32 %v1838_v33, %v5091_v20  ;;  %v1836_v43 = vmul.f32 %v5097_v31, %v5097_v31 }
 0x41a   : > { %v1933_v46 = vadd.f32 %v1901_v6, %v5079_v11  ;;  %v3441_v37 = vpop.f32.mrf.mxu1 }
 0x41b   : > { %v1931_v32 = vadd.f32 %v1899_v39, %v5085_v1  ;;  %v1902_v59 = vmul.f32 0.044715, %v1870_v42  ;;  %v1868_v53 = vmul.f32 %v1836_v43, %v5097_v31  ;;  %v5106_v41 = vadd.f32 %v3441_v37, %v5049_v22 }
 0x41c   : > { %v1965_v44 = vmul.f32 0.7978846, %v1933_v46  ;;  %v1736_v51 = vpop.f32.mrf.mxu1 }
 0x41d   : > { %v1963_v61 = vmul.f32 0.7978846, %v1931_v32  ;;  %v1934_v50 = vadd.f32 %v1902_v59, %v5091_v20  ;;  %v1900_v2 = vmul.f32 0.044715, %v1868_v53  ;;  %v1841_v21 = vmul.f32 %v5106_v41, %v5106_v41 }
 0x41e   : > { %v3759_v17 = vpop.eup %3758  ;;  %v5112_v18 = vadd.f32 %v5049_v22, %v1736_v51  ;;  %v3442_v29 = vpop.f32.mrf.mxu1  ;;  %3766 = vtanh.f32 %v1965_v44 }
 0x41f   : > { %v2025_v0 = vadd.f32 1.0, %v3759_v17  ;;  %v1966_v6 = vmul.f32 0.7978846, %v1934_v50  ;;  %v1932_v58 = vadd.f32 %v1900_v2, %v5097_v31  ;;  %v5116_v33 = vadd.f32 %v3442_v29, %v5049_v22 }
 0x420   : > { %v3761_v10 = vpop.eup %3760  ;;  %3768 = vtanh.f32 %v1963_v61  ;;  %v1873_v46 = vmul.f32 %v1841_v21, %v5106_v41  ;;  %v1839_v39 = vmul.f32 %v5112_v18, %v5112_v18  ;;  %v1739_v42 = vpop.f32.mrf.mxu1 }
 0x421   : > { %v2057_v37 = vmul.f32 0.5, %v2025_v0  ;;  %v1964_v32 = vmul.f32 0.7978846, %v1932_v58  ;;  %v1842_v59 = vmul.f32 %v5116_v33, %v5116_v33  ;;  %v5124_v44 = vadd.f32 %v5049_v22, %v1739_v42 }
 0x422   : > { %v3763_v43 = vpop.eup %3762  ;;  %v1905_v51 = vmul.f32 0.044715, %v1873_v46  ;;  %v1871_v17 = vmul.f32 %v1839_v39, %v5112_v18  ;;  %v3445_v61 = vpop.f32.mrf.mxu1  ;;  %v2023_v50 = vadd.f32 1.0, %v3761_v10  ;;  %3770 = vtanh.f32 %v1966_v6 }
 0x423   : > { %v2026_v53 = vadd.f32 1.0, %v3763_v43  ;;  %v1874_v21 = vmul.f32 %v1842_v59, %v5116_v33  ;;  %v1840_v0 = vmul.f32 %v5124_v44, %v5124_v44  ;;  %v5131_v29 = vadd.f32 %v3445_v61, %v5049_v22 }
 0x424   : > { %v3765_v2 = vpop.eup %3764  ;;  %3772 = vtanh.f32 %v1964_v32  ;;  %v1937_v42 = vadd.f32 %v1905_v51, %v5106_v41  ;;  %v1903_v43 = vmul.f32 0.044715, %v1871_v17  ;;  %v1752_v46 = vpop.f32.mrf.mxu1  ;;  %v5141_v59 = vmul.f32 %v2057_v37, %v5052_v5 }
 0x425   : > { %v2058_v58 = vmul.f32 0.5, %v2026_v53  ;;  %v1906_v54 = vmul.f32 0.044715, %v1874_v21  ;;  %v1872_v39 = vmul.f32 %v1840_v0, %v5124_v44  ;;  %v1845_v10 = vmul.f32 %v5131_v29, %v5131_v29 }
 0x426   : > { %v5138_v6 = vadd.f32 %v5049_v22, %v1752_v46  ;;  %v1969_v61 = vmul.f32 0.7978846, %v1937_v42  ;;  %v1935_v53 = vadd.f32 %v1903_v43, %v5112_v18  ;;  %v3446_v32 = vpop.f32.mrf.mxu1  ;;  %v2024_v14 = vadd.f32 1.0, %v3765_v2 }
 0x427   : > { %v1938_v51 = vadd.f32 %v1906_v54, %v5116_v33  ;;  %v1904_v17 = vmul.f32 0.044715, %v1872_v39  ;;  %v1877_v21 = vmul.f32 %v1845_v10, %v5131_v29  ;;  %v2090_v13 = vmul.f32 %v2058_v58, %v5063_v30 }
 0x428   : > { %v1843_v0 = vmul.f32 %v5138_v6, %v5138_v6  ;;  %v1967_v46 = vmul.f32 0.7978846, %v1935_v53  ;;  %v5150_v56 = vadd.f32 %v3446_v32, %v5049_v22  ;;  %v1755_v5 = vpop.f32.mrf.mxu1  ;;  %v2055_v37 = vmul.f32 0.5, %v2023_v50 }
 0x429   : > { %v1970_v42 = vmul.f32 0.7978846, %v1938_v51  ;;  %v1936_v43 = vadd.f32 %v1904_v17, %v5124_v44  ;;  %v1909_v2 = vmul.f32 0.044715, %v1877_v21  ;;  %3774 = vtanh.f32 %v1969_v61 }
 0x42a   : > { %v1875_v54 = vmul.f32 %v1843_v0, %v5138_v6  ;;  %v1846_v39 = vmul.f32 %v5150_v56, %v5150_v56  ;;  %v5157_v10 = vadd.f32 %v5049_v22, %v1755_v5  ;;  %v3449_v30 = vpop.f32.mrf.mxu1  ;;  %v2056_v58 = vmul.f32 0.5, %v2024_v14 }
 0x42b   : > { %3776 = vtanh.f32 %v1967_v46  ;;  %v1968_v53 = vmul.f32 0.7978846, %v1936_v43  ;;  %v1941_v32 = vadd.f32 %v1909_v2, %v5131_v29  ;;  %v5160_v51 = vpop.eup %3766  ;;  %v5166_v21 = vadd.f32 %v3449_v30, %v5049_v22 }
 0x42c   : > { %v1907_v50 = vmul.f32 0.044715, %v1875_v54  ;;  %3778 = vtanh.f32 %v1970_v42  ;;  %v1878_v17 = vmul.f32 %v1846_v39, %v5150_v56  ;;  %v1844_v61 = vmul.f32 %v5157_v10, %v5157_v10  ;;  %v1768_v0 = vpop.f32.mrf.mxu1 }
 0x42d   : > { %v3769_v5 = vpop.eup %3768  ;;  %v1973_v28 = vmul.f32 0.7978846, %v1941_v32  ;;  %v5170_v46 = vadd.f32 %v5049_v22, %v1768_v0  ;;  %v2087_v43 = vmul.f32 %v2055_v37, %v5057_v4  ;;  %v1849_v54 = vmul.f32 %v5166_v21, %v5166_v21 }
 0x42e   : > { %v1939_v14 = vadd.f32 %v1907_v50, %v5138_v6  ;;  %v1910_v2 = vmul.f32 0.044715, %v1878_v17  ;;  %v1876_v42 = vmul.f32 %v1844_v61, %v5157_v10  ;;  %v3450_v39 = vpop.f32.mrf.mxu1  ;;  %v2088_v30 = vmul.f32 %v2056_v58, %v5069_v52 }
 0x42f   : > { %v2120_v55 = vpack.c.bf16 %v2090_v13, %v5141_v59  ;;  %3780 = vtanh.f32 %v1968_v53  ;;  %v1847_v32 = vmul.f32 %v5170_v46, %v5170_v46  ;;  %v5181_v50 = vadd.f32 %v3450_v39, %v5049_v22  ;;  %v5183_v0 = vpop.eup %3770 }
 0x430   : > { %v1942_v4 = vadd.f32 %v1910_v2, %v5150_v56  ;;  %v1908_v37 = vmul.f32 0.044715, %v1876_v42  ;;  %v1881_v17 = vmul.f32 %v1849_v54, %v5166_v21  ;;  %v1771_v61 = vpop.f32.mrf.mxu1  ;;  %v2119_v36 = vpack.c.bf16 %v2088_v30, %v2087_v43 }
 0x431   : > { %v3773_v38 = vpop.eup %3772  ;;  %3782 = vtanh.f32 %v1973_v28  ;;  %v1879_v13 = vmul.f32 %v1847_v32, %v5170_v46  ;;  %v1850_v52 = vmul.f32 %v5181_v50, %v5181_v50  ;;  %v5191_v59 = vadd.f32 %v5049_v22, %v1771_v61 }
 0x432   : > { %v1971_v58 = vmul.f32 0.7978846, %v1939_v14  ;;  %v1940_v53 = vadd.f32 %v1908_v37, %v5157_v10  ;;  %v1913_v39 = vmul.f32 0.044715, %v1881_v17  ;;  %v3453_v2 = vpop.f32.mrf.mxu1  ;;  %3479 = vmatprep.mubr.bf16.mxu0 %v2119_v36  ;;  %v2027_v42 = vadd.f32 1.0, %v3769_v5 }
 0x433   : > { %v1911_v54 = vmul.f32 0.044715, %v1879_v13  ;;  %v1882_v43 = vmul.f32 %v1850_v52, %v5181_v50  ;;  %v1848_v28 = vmul.f32 %v5191_v59, %v5191_v59  ;;  %v5198_v30 = vadd.f32 %v3453_v2, %v5049_v22  ;;  %3480 = vmatmul.mubr.bf16.vlgmr.msra.gmra.mxu0 %v2120_v55 }
 0x434   : > { %v1974_v32 = vmul.f32 0.7978846, %v1942_v4  ;;  %v1972_v61 = vmul.f32 0.7978846, %v1940_v53  ;;  %v1945_v14 = vadd.f32 %v1913_v39, %v5166_v21  ;;  %v1784_v27 = vpop.f32.mrf.mxu1  ;;  %v2028_v37 = vadd.f32 1.0, %v3773_v38 }
 0x435   : > { %v1943_v17 = vadd.f32 %v1911_v54, %v5170_v46  ;;  %v1914_v36 = vmul.f32 0.044715, %v1882_v43  ;;  %v1880_v5 = vmul.f32 %v1848_v28, %v5191_v59  ;;  %v1853_v13 = vmul.f32 %v5198_v30, %v5198_v30 }
 0x436   : > { %3784 = vtanh.f32 %v1971_v58  ;;  %v1977_v52 = vmul.f32 0.7978846, %v1945_v14  ;;  %v5206_v2 = vadd.f32 %v5049_v22, %v1784_v27  ;;  %v3454_v55 = vpop.f32.mrf.mxu1  ;;  %v5208_v4 = vpop.eup %3774  ;;  %v2059_v54 = vmul.f32 0.5, %v2027_v42 }
 0x437   : > { %v1946_v53 = vadd.f32 %v1914_v36, %v5181_v50  ;;  %v1912_v39 = vmul.f32 0.044715, %v1880_v5  ;;  %v1885_v38 = vmul.f32 %v1853_v13, %v5198_v30  ;;  %3786 = vtanh.f32 %v1974_v32 }
 0x438   : > { %v5212_v43 = vpop.eup %3776  ;;  %v1851_v28 = vmul.f32 %v5206_v2, %v5206_v2  ;;  %v5217_v58 = vadd.f32 %v3454_v55, %v5049_v22  ;;  %v1787_v27 = vpop.f32.mrf.mxu1  ;;  %v2060_v14 = vmul.f32 0.5, %v2028_v37  ;;  %3788 = vtanh.f32 %v1972_v61 }
 0x439   : > { %v5219_v57 = vpop.eup %3778  ;;  %v1975_v48 = vmul.f32 0.7978846, %v1943_v17  ;;  %v1944_v36 = vadd.f32 %v1912_v39, %v5191_v59  ;;  %v1917_v5 = vmul.f32 0.044715, %v1885_v38  ;;  %3790 = vtanh.f32 %v1977_v52 }
 0x43a   : > { %v1883_v42 = vmul.f32 %v1851_v28, %v5206_v2  ;;  %v1854_v32 = vmul.f32 %v5217_v58, %v5217_v58  ;;  %v5226_v13 = vadd.f32 %v5049_v22, %v1787_v27  ;;  %v3457_v55 = vpop.f32.mrf.mxu1  ;;  %v1978_v40 = vmul.f32 0.7978846, %v1946_v53 }
 0x43b   : > { %v1949_v37 = vadd.f32 %v1917_v5, %v5198_v30  ;;  %v5230_v35 = vadd.f32 %v3457_v55, %v5049_v22  ;;  %v2091_v61 = vmul.f32 %v2059_v54, %v5085_v1  ;;  %v2092_v28 = vmul.f32 %v2060_v14, %v5097_v31 }
 0x43c   : > { %v3781_v17 = vpop.eup %3780  ;;  %v1915_v39 = vmul.f32 0.044715, %v1883_v42  ;;  %v1886_v52 = vmul.f32 %v1854_v32, %v5217_v58  ;;  %v1852_v38 = vmul.f32 %v5226_v13, %v5226_v13  ;;  %v1800_v27 = vpop.f32.mrf.mxu1  ;;  %3792 = vtanh.f32 %v1975_v48 }
 0x43d   : > { %v1976_v15 = vmul.f32 0.7978846, %v1944_v36  ;;  %v1857_v53 = vmul.f32 %v5230_v35, %v5230_v35  ;;  %v5240_v5 = vadd.f32 %v5049_v22, %v1800_v27  ;;  %v2121_v32 = vpack.c.bf16 %v2092_v28, %v2091_v61 }
 0x43e   : > { %v5242_v55 = vpop.eup %3782  ;;  %v1947_v1 = vadd.f32 %v1915_v39, %v5206_v2  ;;  %v1918_v54 = vmul.f32 0.044715, %v1886_v52  ;;  %v1884_v42 = vmul.f32 %v1852_v38, %v5226_v13  ;;  %v3458_v60 = vpop.f32.mrf.mxu1  ;;  %v1981_v34 = vmul.f32 0.7978846, %v1949_v37 }
 0x43f   : > { %v1889_v31 = vmul.f32 %v1857_v53, %v5230_v35  ;;  %v1855_v48 = vmul.f32 %v5240_v5, %v5240_v5  ;;  %v2029_v14 = vadd.f32 1.0, %v5160_v51  ;;  %3794 = vtanh.f32 %v1978_v40  ;;  %3483 = vmatprep.mubr.bf16.mxu0 %v2121_v32 }
 0x440   : > { %v1979_v36 = vmul.f32 0.7978846, %v1947_v1  ;;  %v1916_v27 = vmul.f32 0.044715, %v1884_v42  ;;  %v2030_v47 = vadd.f32 1.0, %v5183_v0  ;;  %v1803_v39 = vpop.f32.mrf.mxu1  ;;  %v5253_v37 = vadd.f32 %v3458_v60, %v5049_v22 }
 0x441   : > { %v1921_v52 = vmul.f32 0.044715, %v1889_v31  ;;  %v1887_v38 = vmul.f32 %v1855_v48, %v5240_v5  ;;  %v2061_v61 = vmul.f32 0.5, %v2029_v14  ;;  %3796 = vtanh.f32 %v1976_v15 }
 0x442   : > { %v1950_v28 = vadd.f32 %v1918_v54, %v5217_v58  ;;  %v1948_v53 = vadd.f32 %v1916_v27, %v5226_v13  ;;  %v2062_v51 = vmul.f32 0.5, %v2030_v47  ;;  %v3461_v40 = vpop.f32.mrf.mxu1  ;;  %3798 = vtanh.f32 %v1981_v34 }
 0x443   : > { %v3785_v1 = vpop.eup %3784  ;;  %v1953_v42 = vadd.f32 %v1921_v52, %v5230_v35  ;;  %v1919_v0 = vmul.f32 0.044715, %v1887_v38  ;;  %v1858_v32 = vmul.f32 %v5253_v37, %v5253_v37  ;;  %v2093_v48 = vmul.f32 %v2061_v61, %v5079_v11 }
 0x444   : > { %v1980_v31 = vmul.f32 0.7978846, %v1948_v53  ;;  %v2094_v60 = vmul.f32 %v2062_v51, %v5091_v20  ;;  %v5263_v15 = vadd.f32 %v5049_v22, %v1803_v39  ;;  %v1816_v54 = vpop.f32.mrf.mxu1  ;;  %v5265_v14 = vpop.eup %3786  ;;  %3800 = vtanh.f32 %v1979_v36 }
 0x445   : > { %v1951_v47 = vadd.f32 %v1919_v0, %v5240_v5  ;;  %v1890_v34 = vmul.f32 %v1858_v32, %v5253_v37  ;;  %v5270_v27 = vadd.f32 %v3461_v40, %v5049_v22  ;;  %v3789_v52 = vpop.eup %3788  ;;  %v1982_v38 = vmul.f32 0.7978846, %v1950_v28 }
 0x446   : > { %v2122_v53 = vpack.c.bf16 %v2094_v60, %v2093_v48  ;;  %v1856_v11 = vmul.f32 %v5263_v15, %v5263_v15  ;;  %v2031_v20 = vadd.f32 1.0, %v5212_v43  ;;  %v5275_v39 = vpop.eup %3790  ;;  %3802 = vtanh.f32 %v1980_v31  ;;  %v3462_v28 = vpop.f32.mrf.mxu1 }
 0x447   : > { %v1985_v61 = vmul.f32 0.7978846, %v1953_v42  ;;  %v1922_v36 = vmul.f32 0.044715, %v1890_v34  ;;  %v2032_v0 = vadd.f32 1.0, %v3781_v17  ;;  %v5279_v40 = vadd.f32 %v5049_v22, %v1816_v54 }
 0x448   : > { %3484 = vmatmul.mubr.bf16.gmra.mxu0 %v2122_v53  ;;  %v1888_v51 = vmul.f32 %v1856_v11, %v5263_v15  ;;  %v2063_v32 = vmul.f32 0.5, %v2031_v20  ;;  %v1983_v48 = vmul.f32 0.7978846, %v1951_v47  ;;  %v1861_v43 = vmul.f32 %v5270_v27, %v5270_v27 }
 0x449   : > { %v1954_v60 = vadd.f32 %v1922_v36, %v5253_v37  ;;  %v2033_v49 = vadd.f32 1.0, %v5208_v4  ;;  %v3793_v31 = vpop.eup %3792  ;;  %3804 = vtanh.f32 %v1982_v38  ;;  %v2064_v34 = vmul.f32 0.5, %v2032_v0  ;;  %v1819_v38 = vpop.f32.mrf.mxu1 }
 0x44a   : > { %v1920_v42 = vmul.f32 0.044715, %v1888_v51  ;;  %v1859_v17 = vmul.f32 %v5279_v40, %v5279_v40  ;;  %3806 = vtanh.f32 %v1985_v61  ;;  %v2095_v54 = vmul.f32 %v2063_v32, %v5112_v18 }
 0x44b   : > { %v2034_v53 = vadd.f32 1.0, %v5219_v57  ;;  %v2065_v47 = vmul.f32 0.5, %v2033_v49  ;;  %v2096_v20 = vmul.f32 %v2064_v34, %v5124_v44  ;;  %v5293_v4 = vadd.f32 %v3462_v28, %v5049_v22 }
 0x44c   : > { %v1952_v11 = vadd.f32 %v1920_v42, %v5263_v15  ;;  %v1891_v36 = vmul.f32 %v1859_v17, %v5279_v40  ;;  %v3795_v51 = vpop.eup %3794  ;;  %3808 = vtanh.f32 %v1983_v48  ;;  %v1986_v0 = vmul.f32 0.7978846, %v1954_v60 }
 0x44d   : > { %v1893_v61 = vmul.f32 %v1861_v43, %v5270_v27  ;;  %v2066_v62 = vmul.f32 0.5, %v2034_v53  ;;  %v2123_v32 = vpack.c.bf16 %v2096_v20, %v2095_v54  ;;  %v1862_v49 = vmul.f32 %v5293_v4, %v5293_v4 }
 0x44e   : > { %v1984_v18 = vmul.f32 0.7978846, %v1952_v11  ;;  %v1923_v57 = vmul.f32 0.044715, %v1891_v36  ;;  %v3797_v42 = vpop.eup %3796  ;;  %v2097_v44 = vmul.f32 %v2065_v47, %v5106_v41  ;;  %v5301_v28 = vadd.f32 %v5049_v22, %v1819_v38 }
 0x44f   : > { %v2098_v34 = vmul.f32 %v2066_v62, %v5116_v33  ;;  %v2035_v17 = vadd.f32 1.0, %v3785_v1  ;;  %v5303_v48 = vpop.eup %3798  ;;  %3487 = vmatprep.mubr.bf16.mxu0 %v2123_v32  ;;  %v1894_v43 = vmul.f32 %v1862_v49, %v5293_v4  ;;  %v2036_v54 = vadd.f32 1.0, %v3789_v52 }
 0x450   : > { %3810 = vtanh.f32 %v1984_v18  ;;  %v1955_v60 = vadd.f32 %v1923_v57, %v5279_v40  ;;  %v1925_v53 = vmul.f32 0.044715, %v1893_v61  ;;  %v1860_v41 = vmul.f32 %v5301_v28, %v5301_v28 }
 0x451   : > { %v2124_v11 = vpack.c.bf16 %v2098_v34, %v2097_v44  ;;  %v2067_v47 = vmul.f32 0.5, %v2035_v17  ;;  %v3801_v62 = vpop.eup %3800  ;;  %v1926_v22 = vmul.f32 0.044715, %v1894_v43  ;;  %v2068_v20 = vmul.f32 0.5, %v2036_v54 }
 0x452   : > { %v1987_v33 = vmul.f32 0.7978846, %v1955_v60  ;;  %v2037_v1 = vadd.f32 1.0, %v5242_v55  ;;  %3812 = vtanh.f32 %v1986_v0  ;;  %v1892_v36 = vmul.f32 %v1860_v41, %v5301_v28 }
 0x453   : > { %3488 = vmatmul.mubr.bf16.gmra.mxu0 %v2124_v11  ;;  %v2038_v38 = vadd.f32 1.0, %v5265_v14  ;;  %v2039_v18 = vadd.f32 1.0, %v3793_v31  ;;  %v3803_v52 = vpop.eup %3802  ;;  %v1958_v61 = vadd.f32 %v1926_v22, %v5293_v4  ;;  %v2099_v32 = vmul.f32 %v2067_v47, %v5138_v6 }
 0x454   : > { %v2100_v57 = vmul.f32 %v2068_v20, %v5157_v10  ;;  %v2069_v49 = vmul.f32 0.5, %v2037_v1  ;;  %v1924_v44 = vmul.f32 0.044715, %v1892_v36  ;;  %v2040_v17 = vadd.f32 1.0, %v3797_v42 }
 0x455   : > { %v2070_v34 = vmul.f32 0.5, %v2038_v38  ;;  %v2071_v60 = vmul.f32 0.5, %v2039_v18  ;;  %v1957_v55 = vadd.f32 %v1925_v53, %v5270_v27  ;;  %3814 = vtanh.f32 %v1987_v33 }
 0x456   : > { %v2125_v0 = vpack.c.bf16 %v2100_v57, %v2099_v32  ;;  %v2101_v43 = vmul.f32 %v2069_v49, %v5131_v29  ;;  %v3805_v14 = vpop.eup %3804  ;;  %v1956_v31 = vadd.f32 %v1924_v44, %v5301_v28  ;;  %v2072_v11 = vmul.f32 0.5, %v2040_v17 }
 0x457   : > { %v2102_v54 = vmul.f32 %v2070_v34, %v5150_v56  ;;  %v2041_v6 = vadd.f32 1.0, %v5275_v39  ;;  %v3807_v10 = vpop.eup %3806  ;;  %v1990_v41 = vmul.f32 0.7978846, %v1958_v61  ;;  %v2103_v42 = vmul.f32 %v2071_v60, %v5170_v46 }
 0x458   : > { %3491 = vmatprep.mubr.bf16.mxu0 %v2125_v0  ;;  %v2042_v47 = vadd.f32 1.0, %v3795_v51  ;;  %v2043_v22 = vadd.f32 1.0, %v3801_v62  ;;  %v1988_v53 = vmul.f32 0.7978846, %v1956_v31  ;;  %v2104_v20 = vmul.f32 %v2072_v11, %v5191_v59 }
 0x459   : > { %v2126_v33 = vpack.c.bf16 %v2102_v54, %v2101_v43  ;;  %v2044_v29 = vadd.f32 1.0, %v3803_v52  ;;  %v3809_v1 = vpop.eup %3808  ;;  %v1989_v36 = vmul.f32 0.7978846, %v1957_v55  ;;  %v2073_v39 = vmul.f32 0.5, %v2041_v6 }
 0x45a   : > { %v2074_v38 = vmul.f32 0.5, %v2042_v47  ;;  %v2075_v18 = vmul.f32 0.5, %v2043_v22  ;;  %3816 = vtanh.f32 %v1988_v53  ;;  %v2127_v56 = vpack.c.bf16 %v2104_v20, %v2103_v42 }
 0x45b   : > { %3492 = vmatmul.mubr.bf16.gmra.mxu0 %v2126_v33  ;;  %v2076_v32 = vmul.f32 0.5, %v2044_v29  ;;  %3818 = vtanh.f32 %v1990_v41  ;;  %v2046_v62 = vadd.f32 1.0, %v3805_v14  ;;  %v2047_v52 = vadd.f32 1.0, %v3809_v1 }
 0x45c   : > { %3495 = vmatprep.mubr.bf16.mxu0 %v2127_v56  ;;  %v2106_v46 = vmul.f32 %v2074_v38, %v5181_v50  ;;  %v2107_v59 = vmul.f32 %v2075_v18, %v5206_v2  ;;  %3820 = vtanh.f32 %v1989_v36  ;;  %v2105_v49 = vmul.f32 %v2073_v39, %v5166_v21 }
 0x45d   : > { %v3811_v61 = vpop.eup %3810  ;;  %v2108_v51 = vmul.f32 %v2076_v32, %v5226_v13  ;;  %v2045_v44 = vadd.f32 1.0, %v5303_v48  ;;  %v2078_v0 = vmul.f32 0.5, %v2046_v62  ;;  %v2079_v43 = vmul.f32 0.5, %v2047_v52 }
 0x45e   : > { %v2048_v57 = vadd.f32 1.0, %v3811_v61  ;;  %v2128_v55 = vpack.c.bf16 %v2106_v46, %v2105_v49  ;;  %v2049_v11 = vadd.f32 1.0, %v3807_v10 }
 0x45f   : > { %v3813_v34 = vpop.eup %3812  ;;  %v2129_v17 = vpack.c.bf16 %v2108_v51, %v2107_v59  ;;  %v2077_v50 = vmul.f32 0.5, %v2045_v44  ;;  %v2110_v2 = vmul.f32 %v2078_v0, %v5217_v58  ;;  %v2111_v54 = vmul.f32 %v2079_v43, %v5240_v5 }
 0x460   : > { %v2080_v60 = vmul.f32 0.5, %v2048_v57  ;;  %v2050_v14 = vadd.f32 1.0, %v3813_v34  ;;  %v2081_v20 = vmul.f32 0.5, %v2049_v11 }
 0x461   : > { %v2109_v48 = vmul.f32 %v2077_v50, %v5198_v30 }
 0x462   : > { %v3815_v31 = vpop.eup %3814  ;;  %v2112_v13 = vmul.f32 %v2080_v60, %v5263_v15  ;;  %v2082_v47 = vmul.f32 0.5, %v2050_v14  ;;  %v2113_v10 = vmul.f32 %v2081_v20, %v5230_v35 }
 0x463   : > { %3496 = vmatmul.mubr.bf16.gmra.mxu0 %v2128_v55  ;;  %v2051_v21 = vadd.f32 1.0, %v3815_v31  ;;  %v2130_v42 = vpack.c.bf16 %v2110_v2, %v2109_v48 }
 0x464   : > { %3499 = vmatprep.mubr.bf16.mxu0 %v2129_v17  ;;  %v2131_v41 = vpack.c.bf16 %v2112_v13, %v2111_v54  ;;  %v2114_v58 = vmul.f32 %v2082_v47, %v5253_v37  ;;  %v5340_v37 = vld [vmem:[%s5888_s6 + $0x2] ss:$0 sm:$0xff] }
 0x465   : > { %v2083_v33 = vmul.f32 0.5, %v2051_v21 }
 0x466   : > { %v2132_v18 = vpack.c.bf16 %v2114_v58, %v2113_v10 }
 0x467   : > { %v3817_v6 = vpop.eup %3816  ;;  %v2115_v30 = vmul.f32 %v2083_v33, %v5279_v40 }
 0x468   : > { %v2052_v22 = vadd.f32 1.0, %v3817_v6  ;;  %v3819_v53 = vpop.eup %3818 }
 0x469   : > { %v3821_v15 = vpop.eup %3820  ;;  %v2054_v1 = vadd.f32 1.0, %v3819_v53 }
 0x46a   : > { %v2084_v29 = vmul.f32 0.5, %v2052_v22  ;;  %v2053_v36 = vadd.f32 1.0, %v3821_v15 }
 0x46b   : > { %3500 = vmatmul.mubr.bf16.gmra.mxu0 %v2130_v42  ;;  %v2086_v56 = vmul.f32 0.5, %v2054_v1 }
 0x46c   : > { %3503 = vmatprep.mubr.bf16.mxu0 %v2131_v41  ;;  %v2116_v5 = vmul.f32 %v2084_v29, %v5301_v28  ;;  %v2085_v39 = vmul.f32 0.5, %v2053_v36 }
 0x46d   : > { %v2118_v32 = vmul.f32 %v2086_v56, %v5293_v4 }
 0x46e   : > { %v2133_v38 = vpack.c.bf16 %v2116_v5, %v2115_v30  ;;  %v2117_v61 = vmul.f32 %v2085_v39, %v5270_v27  ;;  %v6022_v39 = vld [vmem:[#allocation20_spill] sm:$0xff] }
 0x470   : > { %v2134_v46 = vpack.c.bf16 %v2118_v32, %v2117_v61 }
 0x473   : > { %3504 = vmatmul.mubr.bf16.gmra.mxu0 %v2132_v18  ;;  %v6021_v18 = vld [vmem:[#allocation23_spill] sm:$0xff] }
 0x474   : > { %3507 = vmatprep.mubr.bf16.mxu0 %v2133_v38 }
 0x47b   : > { %3508 = vmatmul.mubr.bf16.gmra.mxu0 %v2134_v46  ;;  %v6023_v46 = vld [vmem:[#allocation22_spill] sm:$0xff] }
 0x4f3   : > { %v3481_v40 = vpop.f32.mrf.mxu0 }
 0x4f4   : > { %v2246_v35 = vadd.f32 %v3481_v40, %v5340_v37 }
 0x4f5   : > { %v2237_v28 = vpop.f32.mrf.mxu0 }
 0x4f6   : > { %v5344_v51 = vadd.f32 %v2246_v35, %v4903_v24  ;;  %v2238_v62 = vadd.f32 %v5340_v37, %v2237_v28 }
 0x4f7   : > { %v3482_v59 = vpop.f32.mrf.mxu0 }
 0x4f8   : > { %v5348_v4 = vadd.f32 %v2238_v62, %v4897_v7  ;;  %v2249_v27 = vadd.f32 %v3482_v59, %v5340_v37  ;;  %2400 = vadd.xlane.f32.xlu1 %v5344_v51  ;;  %v2494_v24 = vmul.f32 %v5344_v51, %v5344_v51 }
 0x4f9   : > { %v2240_v52 = vpop.f32.mrf.mxu0 }
 0x4fa   : > { %v5353_v57 = vadd.f32 %v2249_v27, %v4894_v63  ;;  %v2241_v49 = vadd.f32 %v5340_v37, %v2240_v52  ;;  %2396 = vadd.xlane.f32.xlu0 %v5348_v4  ;;  %v2492_v63 = vmul.f32 %v5348_v4, %v5348_v4 }
 0x4fc   : > { %2402 = vadd.xlane.f32.xlu1 %v5353_v57  ;;  %v5361_v7 = vadd.f32 %v2241_v49, %v4900_v12  ;;  %v2495_v44 = vmul.f32 %v5353_v57, %v5353_v57  ;;  %v6024_v49 = vld [vmem:[#allocation24_spill] sm:$0xff] }
 0x4fe   : > { %2528 = vadd.xlane.f32.xlu0 %v2494_v24  ;;  %v2493_v34 = vmul.f32 %v5361_v7, %v5361_v7 }
 0x500   : > { %2530 = vadd.xlane.f32.xlu1 %v2495_v44 }
 0x502   : > { %2524 = vadd.xlane.f32.xlu0 %v2492_v63 }
 0x504   : > { %2526 = vadd.xlane.f32.xlu1 %v2493_v34 }
 0x506   : > { %2398 = vadd.xlane.f32.xlu0 %v5361_v7 }
 0x508   : > { %v3485_v17 = vpop.f32.mrf.mxu0 }
 0x509   : > { %v2262_v60 = vadd.f32 %v3485_v17, %v5340_v37 }
 0x50a   : > { %v2253_v12 = vpop.f32.mrf.mxu0 }
 0x50b   : > { %v5372_v55 = vadd.f32 %v2262_v60, %v4923_v16  ;;  %v2254_v0 = vadd.f32 %v5340_v37, %v2253_v12  ;;  %v6025_v60 = vld [vmem:[#allocation21_spill] sm:$0xff] }
 0x50c   : > { %v3486_v43 = vpop.f32.mrf.mxu0 }
 0x50d   : > { %v2265_v31 = vadd.f32 %v3486_v43, %v5340_v37  ;;  %2408 = vadd.xlane.f32.xlu0 %v5372_v55  ;;  %v5378_v13 = vadd.f32 %v2254_v0, %v4917_v3  ;;  %v2498_v21 = vmul.f32 %v5372_v55, %v5372_v55  ;;  %v6026_v0 = vld [vmem:[#allocation26_spill] sm:$0xff] }
 0x50e   : > { %v2256_v50 = vpop.f32.mrf.mxu0 }
 0x50f   : > { %v5381_v2 = vadd.f32 %v2265_v31, %v4914_v45  ;;  %v2257_v14 = vadd.f32 %v5340_v37, %v2256_v50  ;;  %v2496_v11 = vmul.f32 %v5378_v13, %v5378_v13 }
 0x511   : > { %2410 = vadd.xlane.f32.xlu1 %v5381_v2  ;;  %2404 = vadd.xlane.f32.xlu0 %v5378_v13  ;;  %v5387_v16 = vadd.f32 %v2257_v14, %v4920_v25  ;;  %v2499_v3 = vmul.f32 %v5381_v2, %v5381_v2  ;;  %v6027_v14 = vld [vmem:[#allocation28_spill] sm:$0xff] }
 0x513   : > { %v3489_v54 = vpop.f32.mrf.mxu0  ;;  %v2497_v47 = vmul.f32 %v5387_v16, %v5387_v16 }
 0x514   : > { %v2278_v45 = vadd.f32 %v3489_v54, %v5340_v37 }
 0x515   : > { %v2269_v48 = vpop.f32.mrf.mxu0  ;;  %2406 = vadd.xlane.f32.xlu1 %v5387_v16  ;;  %2536 = vadd.xlane.f32.xlu0 %v2498_v21 }
 0x516   : > { %v5398_v25 = vadd.f32 %v2278_v45, %v4943_v26  ;;  %v2270_v41 = vadd.f32 %v5340_v37, %v2269_v48 }
 0x517   : > { %v3490_v6 = vpop.f32.mrf.mxu0 }
 0x518   : > { %v2281_v42 = vadd.f32 %v3490_v6, %v5340_v37  ;;  %v5406_v53 = vadd.f32 %v2270_v41, %v4937_v19  ;;  %v2502_v15 = vmul.f32 %v5398_v25, %v5398_v25  ;;  %v6028_v41 = vld [vmem:[#allocation29_spill] sm:$0xff] }
 0x519   : > { %2538 = vadd.xlane.f32.xlu1 %v2499_v3  ;;  %2532 = vadd.xlane.f32.xlu0 %v2496_v11  ;;  %v2272_v22 = vpop.f32.mrf.mxu0 }
 0x51a   : > { %v5409_v33 = vadd.f32 %v2281_v42, %v4934_v23  ;;  %v2273_v26 = vadd.f32 %v5340_v37, %v2272_v22  ;;  %v2500_v5 = vmul.f32 %v5406_v53, %v5406_v53 }
 0x51b   : > { %v3493_v20 = vpop.f32.mrf.mxu0 }
 0x51c   : > { %v5415_v29 = vadd.f32 %v2273_v26, %v4940_v9  ;;  %v2294_v23 = vadd.f32 %v3493_v20, %v5340_v37  ;;  %v2503_v19 = vmul.f32 %v5409_v33, %v5409_v33 }
 0x51d   : > { %2534 = vadd.xlane.f32.xlu1 %v2497_v47  ;;  %2416 = vadd.xlane.f32.xlu0 %v5398_v25  ;;  %v2285_v58 = vpop.f32.mrf.mxu0 }
 0x51e   : > { %v5426_v9 = vadd.f32 %v2294_v23, %v4963_v8  ;;  %v2286_v30 = vadd.f32 %v5340_v37, %v2285_v58  ;;  %v2501_v36 = vmul.f32 %v5415_v29, %v5415_v29  ;;  %v6030_v23 = vld [vmem:[#allocation25_spill] sm:$0xff] }
 0x51f   : > { %v3494_v1 = vpop.f32.mrf.mxu0 }
 0x520   : > { %v2297_v10 = vadd.f32 %v3494_v1, %v5340_v37  ;;  %v5434_v56 = vadd.f32 %v2286_v30, %v6021_v18  ;;  %v2506_v35 = vmul.f32 %v5426_v9, %v5426_v9  ;;  %v6031_v30 = vld [vmem:[#allocation32_spill] sm:$0xff] }
 0x521   : > { %2418 = vadd.xlane.f32.xlu1 %v5409_v33  ;;  %2412 = vadd.xlane.f32.xlu0 %v5406_v53  ;;  %v2288_v38 = vpop.f32.mrf.mxu0 }
 0x522   : > { %v5437_v32 = vadd.f32 %v2297_v10, %v6022_v39  ;;  %v2289_v8 = vadd.f32 %v5340_v37, %v2288_v38  ;;  %v2504_v27 = vmul.f32 %v5434_v56, %v5434_v56 }
 0x523   : > { %v3497_v61 = vpop.f32.mrf.mxu0 }
 0x524   : > { %v5443_v40 = vadd.f32 %v2289_v8, %v6023_v46  ;;  %v2310_v62 = vadd.f32 %v3497_v61, %v5340_v37  ;;  %v2507_v59 = vmul.f32 %v5437_v32, %v5437_v32  ;;  %v6032_v46 = vld [vmem:[#allocation33_spill] sm:$0xff] }
 0x525   : > { %2414 = vadd.xlane.f32.xlu1 %v5415_v29  ;;  %2544 = vadd.xlane.f32.xlu0 %v2502_v15  ;;  %v2301_v28 = vpop.f32.mrf.mxu0  ;;  %v6029_v15 = vld [vmem:[#allocation27_spill] sm:$0xff] }
 0x526   : > { %v5454_v24 = vadd.f32 %v2310_v62, %v6024_v49  ;;  %v2302_v44 = vadd.f32 %v5340_v37, %v2301_v28  ;;  %v2505_v34 = vmul.f32 %v5443_v40, %v5443_v40 }
 0x527   : > { %v3498_v52 = vpop.f32.mrf.mxu0 }
 0x528   : > { %v2313_v63 = vadd.f32 %v3498_v52, %v5340_v37  ;;  %v5462_v12 = vadd.f32 %v2302_v44, %v6025_v60  ;;  %v2510_v21 = vmul.f32 %v5454_v24, %v5454_v24  ;;  %v6033_v52 = vld [vmem:[#allocation31_spill] sm:$0xff]  ;;  %v6034_v44 = vld [vmem:[#allocation30_spill] sm:$0xff]  ;;  %v6035_v60 = vld [vmem:[#allocation36_spill] sm:$0xff] }
 0x529   : > { %2546 = vadd.xlane.f32.xlu1 %v2503_v19  ;;  %2540 = vadd.xlane.f32.xlu0 %v2500_v5  ;;  %v2304_v17 = vpop.f32.mrf.mxu0 }
 0x52a   : > { %v5465_v43 = vadd.f32 %v2313_v63, %v6026_v0  ;;  %v2305_v31 = vadd.f32 %v5340_v37, %v2304_v17  ;;  %v2508_v11 = vmul.f32 %v5462_v12, %v5462_v12 }
 0x52b   : > { %v3501_v50 = vpop.f32.mrf.mxu0 }
 0x52c   : > { %v5471_v54 = vadd.f32 %v2305_v31, %v6027_v14  ;;  %v2326_v45 = vadd.f32 %v3501_v50, %v5340_v37  ;;  %v2511_v3 = vmul.f32 %v5465_v43, %v5465_v43 }
 0x52d   : > { %2542 = vadd.xlane.f32.xlu1 %v2501_v36  ;;  %2424 = vadd.xlane.f32.xlu0 %v5426_v9  ;;  %v2317_v48 = vpop.f32.mrf.mxu0 }
 0x52e   : > { %v5482_v42 = vadd.f32 %v2326_v45, %v6028_v41  ;;  %v2318_v47 = vadd.f32 %v5340_v37, %v2317_v48  ;;  %v2509_v26 = vmul.f32 %v5471_v54, %v5471_v54 }
 0x52f   : > { %v3502_v6 = vpop.f32.mrf.mxu0 }
 0x530   : > { %v2329_v22 = vadd.f32 %v3502_v6, %v5340_v37  ;;  %v5490_v58 = vadd.f32 %v2318_v47, %v6029_v15  ;;  %v2514_v36 = vmul.f32 %v5482_v42, %v5482_v42  ;;  %v6038_v15 = vld [vmem:[#allocation34_spill] sm:$0xff] }
 0x531   : > { %2426 = vadd.xlane.f32.xlu1 %v5437_v32  ;;  %2420 = vadd.xlane.f32.xlu0 %v5434_v56  ;;  %v2320_v20 = vpop.f32.mrf.mxu0 }
 0x532   : > { %v5493_v19 = vadd.f32 %v2329_v22, %v6030_v23  ;;  %v2321_v5 = vadd.f32 %v5340_v37, %v2320_v20  ;;  %v2512_v8 = vmul.f32 %v5490_v58, %v5490_v58 }
 0x533   : > { %v3505_v1 = vpop.f32.mrf.mxu0 }
 0x534   : > { %v5499_v10 = vadd.f32 %v2321_v5, %v6031_v30  ;;  %v2342_v18 = vadd.f32 %v3505_v1, %v5340_v37  ;;  %v2515_v39 = vmul.f32 %v5493_v19, %v5493_v19  ;;  %v6039_v1 = vld [vmem:[#allocation40_spill] sm:$0xff] }
 0x535   : > { %2422 = vadd.xlane.f32.xlu1 %v5443_v40  ;;  %2552 = vadd.xlane.f32.xlu0 %v2506_v35  ;;  %v2333_v38 = vpop.f32.mrf.mxu0 }
 0x536   : > { %v5510_v35 = vadd.f32 %v2342_v18, %v6032_v46  ;;  %v2334_v28 = vadd.f32 %v5340_v37, %v2333_v38 }
 0x537   : > { %v3506_v61 = vpop.f32.mrf.mxu0 }
 0x538   : > { %v2345_v62 = vadd.f32 %v3506_v61, %v5340_v37  ;;  %v5518_v49 = vadd.f32 %v2334_v28, %v6033_v52  ;;  %v2518_v31 = vmul.f32 %v5510_v35, %v5510_v35 }
 0x539   : > { %2554 = vadd.xlane.f32.xlu1 %v2507_v59  ;;  %2548 = vadd.xlane.f32.xlu0 %v2504_v27  ;;  %v2513_v59 = vmul.f32 %v5499_v10, %v5499_v10  ;;  %v2336_v27 = vpop.f32.mrf.mxu0 }
 0x53a   : > { %v5521_v63 = vadd.f32 %v2345_v62, %v6034_v44  ;;  %v2516_v48 = vmul.f32 %v5518_v49, %v5518_v49 }
 0x53b   : > { %v3509_v17 = vpop.f32.mrf.mxu0 }
 0x53c   : > { %v2358_v14 = vadd.f32 %v3509_v17, %v5340_v37 }
 0x53d   : > { %2550 = vadd.xlane.f32.xlu1 %v2505_v34  ;;  %2432 = vadd.xlane.f32.xlu0 %v5454_v24  ;;  %v2337_v34 = vadd.f32 %v5340_v37, %v2336_v27  ;;  %v2349_v50 = vpop.f32.mrf.mxu0 }
 0x53e   : > { %v2350_v6 = vadd.f32 %v5340_v37, %v2349_v50 }
 0x53f   : > { %v5527_v0 = vadd.f32 %v2337_v34, %v6035_v60  ;;  %v3510_v45 = vpop.f32.mrf.mxu0 }
 0x540   : > { %v2361_v41 = vadd.f32 %v3510_v45, %v5340_v37 }
 0x541   : > { %2434 = vadd.xlane.f32.xlu1 %v5465_v43  ;;  %2428 = vadd.xlane.f32.xlu0 %v5462_v12  ;;  %v2517_v47 = vmul.f32 %v5527_v0, %v5527_v0  ;;  %v2352_v22 = vpop.f32.mrf.mxu0 }
 0x542   : > { %v5549_v23 = vadd.f32 %v2361_v41, %v6038_v15  ;;  %v2353_v5 = vadd.f32 %v5340_v37, %v2352_v22 }
 0x544   : > { %v5555_v30 = vadd.f32 %v2353_v5, %v6039_v1  ;;  %v2523_v37 = vmul.f32 %v5549_v23, %v5549_v23 }
 0x545   : > { %2430 = vadd.xlane.f32.xlu1 %v5471_v54  ;;  %2560 = vadd.xlane.f32.xlu0 %v2510_v21  ;;  %v2519_v21 = vmul.f32 %v5521_v63, %v5521_v63 }
 0x546   : > { %v2521_v38 = vmul.f32 %v5555_v30, %v5555_v30 }
 0x549   : > { %2562 = vadd.xlane.f32.xlu1 %v2511_v3  ;;  %2556 = vadd.xlane.f32.xlu0 %v2508_v11  ;;  %v6036_v3 = vld [vmem:[#allocation37_spill] sm:$0xff] }
 0x54a   : > { %v5538_v11 = vadd.f32 %v2358_v14, %v6036_v3 }
 0x54c   : > { %v2522_v18 = vmul.f32 %v5538_v11, %v5538_v11 }
 0x54d   : > { %2558 = vadd.xlane.f32.xlu1 %v2509_v26  ;;  %2440 = vadd.xlane.f32.xlu0 %v5482_v42  ;;  %v6037_v26 = vld [vmem:[#allocation35_spill] sm:$0xff] }
 0x54e   : > { %v5546_v20 = vadd.f32 %v2350_v6, %v6037_v26 }
 0x551   : > { %2442 = vadd.xlane.f32.xlu1 %v5493_v19  ;;  %2436 = vadd.xlane.f32.xlu0 %v5490_v58 }
 0x555   : > { %2438 = vadd.xlane.f32.xlu1 %v5499_v10  ;;  %2568 = vadd.xlane.f32.xlu0 %v2514_v36  ;;  %v2520_v36 = vmul.f32 %v5546_v20, %v5546_v20 }
 0x559   : > { %2570 = vadd.xlane.f32.xlu1 %v2515_v39  ;;  %2564 = vadd.xlane.f32.xlu0 %v2512_v8 }
 0x55d   : > { %2566 = vadd.xlane.f32.xlu1 %v2513_v59  ;;  %2448 = vadd.xlane.f32.xlu0 %v5510_v35 }
 0x561   : > { %2450 = vadd.xlane.f32.xlu1 %v5521_v63  ;;  %2444 = vadd.xlane.f32.xlu0 %v5518_v49 }
 0x565   : > { %2446 = vadd.xlane.f32.xlu1 %v5527_v0  ;;  %2576 = vadd.xlane.f32.xlu0 %v2518_v31 }
 0x569   : > { %2578 = vadd.xlane.f32.xlu1 %v2519_v21  ;;  %2572 = vadd.xlane.f32.xlu0 %v2516_v48 }
 0x56d   : > { %2574 = vadd.xlane.f32.xlu1 %v2517_v47  ;;  %2456 = vadd.xlane.f32.xlu0 %v5538_v11 }
 0x571   : > { %2458 = vadd.xlane.f32.xlu1 %v5549_v23  ;;  %2452 = vadd.xlane.f32.xlu0 %v5546_v20 }
 0x575   : > { %2454 = vadd.xlane.f32.xlu1 %v5555_v30  ;;  %2580 = vadd.xlane.f32.xlu0 %v2520_v36 }
 0x579   : > { %2582 = vadd.xlane.f32.xlu1 %v2521_v38  ;;  %2584 = vadd.xlane.f32.xlu0 %v2522_v18 }
 0x57d   : > { %2586 = vadd.xlane.f32.xlu1 %v2523_v37 }
 0x581   : > { %v2401_v39 = vpop.xlane.xlu1 %2400 }
 0x582   : > { %v2462_v61 = vmul.f32 0.03125, %v2401_v39 }
 0x583   : > { %v2397_v8 = vpop.xlane.xlu0 %2396 }
 0x584   : > { %v2622_v59 = vmul.f32 %v2462_v61, %v2462_v61  ;;  %v2460_v27 = vmul.f32 0.03125, %v2397_v8  ;;  %v2750_v38 = vsub.f32 %v5344_v51, %v2462_v61  ;;  %v5570_v8 = vld [vmem:[%s5888_s6 + $0x3] ss:$0 sm:$0xff]  ;;  %v5580_v51 = vld [vmem:[%s5888_s6 + $0x4] ss:$0 sm:$0xff] }
 0x585   : > { %v2403_v46 = vpop.xlane.xlu1 %2402 }
 0x586   : > { %v2463_v28 = vmul.f32 0.03125, %v2403_v46  ;;  %v2620_v50 = vmul.f32 %v2460_v27, %v2460_v27 }
 0x587   : > { %v2529_v62 = vpop.xlane.xlu0 %2528 }
 0x588   : > { %v2590_v52 = vmul.f32 0.03125, %v2529_v62  ;;  %v2623_v34 = vmul.f32 %v2463_v28, %v2463_v28  ;;  %v2751_v62 = vsub.f32 %v5353_v57, %v2463_v28 }
 0x589   : > { %v2531_v44 = vpop.xlane.xlu1 %2530 }
 0x58a   : > { %v2654_v17 = vsub.f32 %v2590_v52, %v2622_v59  ;;  %v2591_v60 = vmul.f32 0.03125, %v2531_v44  ;;  %v2748_v44 = vsub.f32 %v5348_v4, %v2460_v27 }
 0x58b   : > { %v2525_v31 = vpop.xlane.xlu0 %2524 }
 0x58c   : > { %v2686_v14 = vadd.f32 1e-05, %v2654_v17  ;;  %v2655_v21 = vsub.f32 %v2591_v60, %v2623_v34  ;;  %v2588_v48 = vmul.f32 0.03125, %v2525_v31 }
 0x58d   : > { %v2527_v6 = vpop.xlane.xlu1 %2526 }
 0x58e   : > { %3822 = vrsqrt.f32 %v2686_v14  ;;  %v2687_v45 = vadd.f32 1e-05, %v2655_v21  ;;  %v2652_v3 = vsub.f32 %v2588_v48, %v2620_v50  ;;  %v2589_v26 = vmul.f32 0.03125, %v2527_v6 }
 0x58f   : > { %v2399_v41 = vpop.xlane.xlu0 %2398 }
 0x590   : > { %3824 = vrsqrt.f32 %v2687_v45  ;;  %v2684_v47 = vadd.f32 1e-05, %v2652_v3  ;;  %v2461_v22 = vmul.f32 0.03125, %v2399_v41 }
 0x592   : > { %3826 = vrsqrt.f32 %v2684_v47  ;;  %v2621_v15 = vmul.f32 %v2461_v22, %v2461_v22 }
 0x594   : > { %v2653_v5 = vsub.f32 %v2589_v26, %v2621_v15 }
 0x596   : > { %v2685_v1 = vadd.f32 1e-05, %v2653_v5  ;;  %v2409_v36 = vpop.xlane.xlu0 %2408 }
 0x597   : > { %v5572_v46 = vmul.f32 0.03125, %v2409_v36 }
 0x598   : > { %3828 = vrsqrt.f32 %v2685_v1 }
 0x599   : > { %v2626_v28 = vmul.f32 %v5572_v46, %v5572_v46 }
 0x59a   : > { %v2411_v18 = vpop.xlane.xlu1 %2410  ;;  %v2405_v37 = vpop.xlane.xlu0 %2404 }
 0x59b   : > { %v3823_v39 = vpop.eup %3822  ;;  %v5583_v17 = vmul.f32 0.03125, %v2411_v18  ;;  %v5585_v31 = vmul.f32 0.03125, %v2405_v37  ;;  %v2749_v18 = vsub.f32 %v5361_v7, %v2461_v22 }
 0x59c   : > { %v2782_v59 = vmul.f32 %v3823_v39, %v2750_v38 }
 0x59d   : > { %v3825_v52 = vpop.eup %3824  ;;  %v2627_v6 = vmul.f32 %v5583_v17, %v5583_v17  ;;  %v2624_v41 = vmul.f32 %v5585_v31, %v5585_v31 }
 0x59e   : > { %v2818_v61 = vmul.f32 %v5570_v8, %v2782_v59  ;;  %v2783_v34 = vmul.f32 %v3825_v52, %v2751_v62  ;;  %v2407_v60 = vpop.xlane.xlu1 %2406  ;;  %v2537_v50 = vpop.xlane.xlu0 %2536 }
 0x59f   : > { %v3827_v57 = vpop.eup %3826  ;;  %v2594_v14 = vmul.f32 0.03125, %v2537_v50  ;;  %v5600_v15 = vmul.f32 0.03125, %v2407_v60 }
 0x5a0   : > { %v2854_v4 = vadd.f32 %v5580_v51, %v2818_v61  ;;  %v2819_v27 = vmul.f32 %v5570_v8, %v2783_v34  ;;  %v2780_v21 = vmul.f32 %v3827_v57, %v2748_v44 }
 0x5a1   : > { %v2658_v48 = vsub.f32 %v2594_v14, %v2626_v28  ;;  %v2625_v61 = vmul.f32 %v5600_v15, %v5600_v15 }
 0x5a2   : > { %2886 = vst [vmem:[%s5591_s2 + $0x10] sm:$0xff] %v2854_v4  ;;  %v2855_v45 = vadd.f32 %v5580_v51, %v2819_v27  ;;  %v2816_v3 = vmul.f32 %v5570_v8, %v2780_v21  ;;  %v2539_v47 = vpop.xlane.xlu1 %2538  ;;  %v2533_v26 = vpop.xlane.xlu0 %2532 }
 0x5a3   : > { %v2595_v5 = vmul.f32 0.03125, %v2539_v47  ;;  %v2690_v1 = vadd.f32 1e-05, %v2658_v48  ;;  %v2592_v36 = vmul.f32 0.03125, %v2533_v26  ;;  %v2754_v47 = vsub.f32 %v5372_v55, %v5572_v46 }
 0x5a4   : > { %2887 = vst [vmem:[%s5591_s2 + $0x18] sm:$0xff] %v2855_v45  ;;  %v2852_v38 = vadd.f32 %v5580_v51, %v2816_v3 }
 0x5a5   : > { %v3829_v37 = vpop.eup %3828  ;;  %v2659_v39 = vsub.f32 %v2595_v5, %v2627_v6  ;;  %3830 = vrsqrt.f32 %v2690_v1  ;;  %v2656_v62 = vsub.f32 %v2592_v36, %v2624_v41 }
 0x5a6   : > { %2884 = vst [vmem:[%s5591_s2] sm:$0xff] %v2852_v38  ;;  %v2781_v59 = vmul.f32 %v3829_v37, %v2749_v18  ;;  %v2535_v52 = vpop.xlane.xlu1 %2534  ;;  %v2417_v44 = vpop.xlane.xlu0 %2416 }
 0x5a7   : > { %v2691_v34 = vadd.f32 1e-05, %v2659_v39  ;;  %v2593_v60 = vmul.f32 0.03125, %v2535_v52  ;;  %v2688_v50 = vadd.f32 1e-05, %v2656_v62  ;;  %v5610_v27 = vmul.f32 0.03125, %v2417_v44 }
 0x5a8   : > { %v2817_v57 = vmul.f32 %v5570_v8, %v2781_v59  ;;  %v2755_v44 = vsub.f32 %v5381_v2, %v5583_v17 }
 0x5a9   : > { %3832 = vrsqrt.f32 %v2691_v34  ;;  %v2657_v28 = vsub.f32 %v2593_v60, %v2625_v61  ;;  %v2630_v6 = vmul.f32 %v5610_v27, %v5610_v27  ;;  %v2752_v60 = vsub.f32 %v5378_v13, %v5585_v31 }
 0x5aa   : > { %v2853_v7 = vadd.f32 %v5580_v51, %v2817_v57  ;;  %3834 = vrsqrt.f32 %v2688_v50  ;;  %v2419_v22 = vpop.xlane.xlu1 %2418  ;;  %v2413_v14 = vpop.xlane.xlu0 %2412 }
 0x5ab   : > { %v2689_v4 = vadd.f32 1e-05, %v2657_v28  ;;  %v5613_v21 = vmul.f32 0.03125, %v2419_v22  ;;  %v5615_v45 = vmul.f32 0.03125, %v2413_v14 }
 0x5ac   : > { %2885 = vst [vmem:[%s5591_s2 + $0x8] sm:$0xff] %v2853_v7 }
 0x5ad   : > { %3836 = vrsqrt.f32 %v2689_v4  ;;  %v2631_v1 = vmul.f32 %v5613_v21, %v5613_v21  ;;  %v2628_v38 = vmul.f32 %v5615_v45, %v5615_v45 }
 0x5ae   : > { %v2415_v48 = vpop.xlane.xlu1 %2414  ;;  %v2545_v3 = vpop.xlane.xlu0 %2544 }
 0x5af   : > { %v2598_v41 = vmul.f32 0.03125, %v2545_v3  ;;  %v5623_v36 = vmul.f32 0.03125, %v2415_v48  ;;  %v2753_v3 = vsub.f32 %v5387_v16, %v5600_v15 }
 0x5b1   : > { %v2662_v26 = vsub.f32 %v2598_v41, %v2630_v6  ;;  %v2629_v50 = vmul.f32 %v5623_v36, %v5623_v36 }
 0x5b2   : > { %v3831_v5 = vpop.eup %3830  ;;  %v2547_v18 = vpop.xlane.xlu1 %2546 }
 0x5b3   : > { %v2541_v37 = vpop.xlane.xlu0 %2540  ;;  %v2786_v39 = vmul.f32 %v3831_v5, %v2754_v47  ;;  %v2599_v62 = vmul.f32 0.03125, %v2547_v18  ;;  %v2694_v59 = vadd.f32 1e-05, %v2662_v26 }
 0x5b4   : > { %v2596_v52 = vmul.f32 0.03125, %v2541_v37 }
 0x5b5   : > { %v2822_v55 = vmul.f32 %v5570_v8, %v2786_v39  ;;  %v2663_v46 = vsub.f32 %v2599_v62, %v2631_v1  ;;  %3838 = vrsqrt.f32 %v2694_v59 }
 0x5b6   : > { %v2660_v61 = vsub.f32 %v2596_v52, %v2628_v38  ;;  %v3833_v34 = vpop.eup %3832  ;;  %v2543_v57 = vpop.xlane.xlu1 %2542 }
 0x5b7   : > { %v2425_v28 = vpop.xlane.xlu0 %2424  ;;  %v3835_v7 = vpop.eup %3834  ;;  %v2787_v22 = vmul.f32 %v3833_v34, %v2755_v44  ;;  %v2858_v14 = vadd.f32 %v5580_v51, %v2822_v55  ;;  %v2695_v2 = vadd.f32 1e-05, %v2663_v46  ;;  %v2597_v17 = vmul.f32 0.03125, %v2543_v57 }
 0x5b8   : > { %v2784_v4 = vmul.f32 %v3835_v7, %v2752_v60  ;;  %v2692_v48 = vadd.f32 1e-05, %v2660_v61  ;;  %v5641_v18 = vmul.f32 0.03125, %v2425_v28  ;;  %v2758_v46 = vsub.f32 %v5398_v25, %v5610_v27 }
 0x5b9   : > { %v2823_v6 = vmul.f32 %v5570_v8, %v2787_v22  ;;  %2890 = vst [vmem:[%s5591_s2 + $0x30] sm:$0xff] %v2858_v14  ;;  %3840 = vrsqrt.f32 %v2695_v2  ;;  %v2661_v13 = vsub.f32 %v2597_v17, %v2629_v50 }
 0x5ba   : > { %v3837_v31 = vpop.eup %3836  ;;  %v2820_v41 = vmul.f32 %v5570_v8, %v2784_v4  ;;  %3842 = vrsqrt.f32 %v2692_v48  ;;  %v2427_v47 = vpop.xlane.xlu1 %2426  ;;  %v2634_v44 = vmul.f32 %v5641_v18, %v5641_v18  ;;  %v2759_v4 = vsub.f32 %v5409_v33, %v5613_v21 }
 0x5bb   : > { %v2421_v26 = vpop.xlane.xlu0 %2420  ;;  %v2859_v5 = vadd.f32 %v5580_v51, %v2823_v6  ;;  %v2785_v1 = vmul.f32 %v3837_v31, %v2753_v3  ;;  %v2693_v38 = vadd.f32 1e-05, %v2661_v13  ;;  %v5647_v37 = vmul.f32 0.03125, %v2427_v47 }
 0x5bc   : > { %v2856_v16 = vadd.f32 %v5580_v51, %v2820_v41  ;;  %v5649_v62 = vmul.f32 0.03125, %v2421_v26  ;;  %v2756_v6 = vsub.f32 %v5406_v53, %v5615_v45 }
 0x5bd   : > { %2891 = vst [vmem:[%s5591_s2 + $0x38] sm:$0xff] %v2859_v5  ;;  %v2821_v15 = vmul.f32 %v5570_v8, %v2785_v1  ;;  %3844 = vrsqrt.f32 %v2693_v38  ;;  %v2635_v60 = vmul.f32 %v5647_v37, %v5647_v37 }
 0x5be   : > { %2888 = vst [vmem:[%s5591_s2 + $0x20] sm:$0xff] %v2856_v16  ;;  %v2423_v39 = vpop.xlane.xlu1 %2422  ;;  %v2632_v57 = vmul.f32 %v5649_v62, %v5649_v62  ;;  %v2757_v16 = vsub.f32 %v5415_v29, %v5623_v36 }
 0x5bf   : > { %v2553_v59 = vpop.xlane.xlu0 %2552  ;;  %v2857_v52 = vadd.f32 %v5580_v51, %v2821_v15  ;;  %v5659_v50 = vmul.f32 0.03125, %v2423_v39 }
 0x5c0   : > { %v2602_v55 = vmul.f32 0.03125, %v2553_v59 }
 0x5c1   : > { %2889 = vst [vmem:[%s5591_s2 + $0x28] sm:$0xff] %v2857_v52  ;;  %v2633_v13 = vmul.f32 %v5659_v50, %v5659_v50 }
 0x5c2   : > { %v2666_v61 = vsub.f32 %v2602_v55, %v2634_v44  ;;  %v3839_v34 = vpop.eup %3838  ;;  %v2555_v28 = vpop.xlane.xlu1 %2554 }
 0x5c3   : > { %v2549_v7 = vpop.xlane.xlu0 %2548  ;;  %v2790_v22 = vmul.f32 %v3839_v34, %v2758_v46  ;;  %v2603_v14 = vmul.f32 0.03125, %v2555_v28 }
 0x5c4   : > { %v2698_v2 = vadd.f32 1e-05, %v2666_v61  ;;  %v2600_v17 = vmul.f32 0.03125, %v2549_v7 }
 0x5c5   : > { %v2826_v25 = vmul.f32 %v5570_v8, %v2790_v22  ;;  %v2667_v27 = vsub.f32 %v2603_v14, %v2635_v60 }
 0x5c6   : > { %3846 = vrsqrt.f32 %v2698_v2  ;;  %v2664_v48 = vsub.f32 %v2600_v17, %v2632_v57  ;;  %v3841_v3 = vpop.eup %3840  ;;  %v2551_v31 = vpop.xlane.xlu1 %2550  ;;  %v2762_v2 = vsub.f32 %v5426_v9, %v5641_v18 }
 0x5c7   : > { %v2433_v41 = vpop.xlane.xlu0 %2432  ;;  %v3843_v47 = vpop.eup %3842  ;;  %v2791_v26 = vmul.f32 %v3841_v3, %v2759_v4  ;;  %v2862_v5 = vadd.f32 %v5580_v51, %v2826_v25  ;;  %v2699_v33 = vadd.f32 1e-05, %v2667_v27  ;;  %v2601_v21 = vmul.f32 0.03125, %v2551_v31 }
 0x5c8   : > { %v2788_v1 = vmul.f32 %v3843_v47, %v2756_v6  ;;  %v2696_v38 = vadd.f32 1e-05, %v2664_v48  ;;  %v5677_v61 = vmul.f32 0.03125, %v2433_v41 }
 0x5c9   : > { %v2827_v15 = vmul.f32 %v5570_v8, %v2791_v26  ;;  %2894 = vst [vmem:[%s5591_s2 + $0x50] sm:$0xff] %v2862_v5  ;;  %3848 = vrsqrt.f32 %v2699_v33  ;;  %v2665_v53 = vsub.f32 %v2601_v21, %v2633_v13  ;;  %v2763_v26 = vsub.f32 %v5437_v32, %v5647_v37 }
 0x5ca   : > { %v3845_v45 = vpop.eup %3844  ;;  %v2824_v39 = vmul.f32 %v5570_v8, %v2788_v1  ;;  %3850 = vrsqrt.f32 %v2696_v38  ;;  %v2435_v59 = vpop.xlane.xlu1 %2434  ;;  %v2638_v22 = vmul.f32 %v5677_v61, %v5677_v61  ;;  %v2760_v21 = vsub.f32 %v5434_v56, %v5649_v62 }
 0x5cb   : > { %v2429_v52 = vpop.xlane.xlu0 %2428  ;;  %v2863_v44 = vadd.f32 %v5580_v51, %v2827_v15  ;;  %v2789_v55 = vmul.f32 %v3845_v45, %v2757_v16  ;;  %v2697_v46 = vadd.f32 1e-05, %v2665_v53  ;;  %v5683_v34 = vmul.f32 0.03125, %v2435_v59 }
 0x5cc   : > { %v2860_v29 = vadd.f32 %v5580_v51, %v2824_v39  ;;  %v5685_v57 = vmul.f32 0.03125, %v2429_v52  ;;  %v2761_v52 = vsub.f32 %v5443_v40, %v5659_v50 }
 0x5cd   : > { %2895 = vst [vmem:[%s5591_s2 + $0x58] sm:$0xff] %v2863_v44  ;;  %v2825_v36 = vmul.f32 %v5570_v8, %v2789_v55  ;;  %3852 = vrsqrt.f32 %v2697_v46  ;;  %v2639_v25 = vmul.f32 %v5683_v34, %v5683_v34 }
 0x5ce   : > { %2892 = vst [vmem:[%s5591_s2 + $0x40] sm:$0xff] %v2860_v29  ;;  %v2431_v60 = vpop.xlane.xlu1 %2430  ;;  %v2636_v48 = vmul.f32 %v5685_v57, %v5685_v57 }
 0x5cf   : > { %v2561_v28 = vpop.xlane.xlu0 %2560  ;;  %v2861_v7 = vadd.f32 %v5580_v51, %v2825_v36  ;;  %v5695_v27 = vmul.f32 0.03125, %v2431_v60 }
 0x5d0   : > { %v2606_v14 = vmul.f32 0.03125, %v2561_v28 }
 0x5d1   : > { %2893 = vst [vmem:[%s5591_s2 + $0x48] sm:$0xff] %v2861_v7  ;;  %v2637_v1 = vmul.f32 %v5695_v27, %v5695_v27 }
 0x5d2   : > { %v2670_v17 = vsub.f32 %v2606_v14, %v2638_v22  ;;  %v2563_v3 = vpop.xlane.xlu1 %2562 }
 0x5d3   : > { %v3847_v4 = vpop.eup %3846  ;;  %v2557_v6 = vpop.xlane.xlu0 %2556  ;;  %v2607_v31 = vmul.f32 0.03125, %v2563_v3  ;;  %v2766_v3 = vsub.f32 %v5454_v24, %v5677_v61 }
 0x5d4   : > { %v2794_v13 = vmul.f32 %v3847_v4, %v2762_v2  ;;  %v2702_v41 = vadd.f32 1e-05, %v2670_v17  ;;  %v2604_v47 = vmul.f32 0.03125, %v2557_v6 }
 0x5d5   : > { %v2671_v18 = vsub.f32 %v2607_v31, %v2639_v25 }
 0x5d6   : > { %v2830_v9 = vmul.f32 %v5570_v8, %v2794_v13  ;;  %3854 = vrsqrt.f32 %v2702_v41  ;;  %v2668_v5 = vsub.f32 %v2604_v47, %v2636_v48  ;;  %v3849_v33 = vpop.eup %3848  ;;  %v2559_v38 = vpop.xlane.xlu1 %2558 }
 0x5d7   : > { %v2441_v16 = vpop.xlane.xlu0 %2440  ;;  %v3851_v15 = vpop.eup %3850  ;;  %v2795_v53 = vmul.f32 %v3849_v33, %v2763_v26  ;;  %v2703_v32 = vadd.f32 1e-05, %v2671_v18  ;;  %v2605_v37 = vmul.f32 0.03125, %v2559_v38 }
 0x5d8   : > { %v2866_v45 = vadd.f32 %v5580_v51, %v2830_v9  ;;  %v2792_v39 = vmul.f32 %v3851_v15, %v2760_v21  ;;  %v2700_v59 = vadd.f32 1e-05, %v2668_v5  ;;  %v5713_v7 = vmul.f32 0.03125, %v2441_v16 }
 0x5d9   : > { %v2831_v44 = vmul.f32 %v5570_v8, %v2795_v53  ;;  %3856 = vrsqrt.f32 %v2703_v32  ;;  %v2669_v56 = vsub.f32 %v2605_v37, %v2637_v1  ;;  %v2767_v1 = vsub.f32 %v5465_v43, %v5683_v34 }
 0x5da   : > { %2898 = vst [vmem:[%s5591_s2 + $0x70] sm:$0xff] %v2866_v45  ;;  %v3853_v62 = vpop.eup %3852  ;;  %v2828_v55 = vmul.f32 %v5570_v8, %v2792_v39  ;;  %3858 = vrsqrt.f32 %v2700_v59  ;;  %v2443_v46 = vpop.xlane.xlu1 %2442  ;;  %v2642_v25 = vmul.f32 %v5713_v7, %v5713_v7  ;;  %v2764_v15 = vsub.f32 %v5462_v12, %v5685_v57 }
 0x5db   : > { %v2437_v29 = vpop.xlane.xlu0 %2436  ;;  %v2867_v36 = vadd.f32 %v5580_v51, %v2831_v44  ;;  %v2793_v60 = vmul.f32 %v3853_v62, %v2761_v52  ;;  %v2701_v28 = vadd.f32 1e-05, %v2669_v56  ;;  %v5719_v22 = vmul.f32 0.03125, %v2443_v46 }
 0x5dc   : > { %v2864_v40 = vadd.f32 %v5580_v51, %v2828_v55  ;;  %v5721_v2 = vmul.f32 0.03125, %v2437_v29  ;;  %v2765_v56 = vsub.f32 %v5471_v54, %v5695_v27 }
 0x5dd   : > { %2899 = vst [vmem:[%s5591_s2 + $0x78] sm:$0xff] %v2867_v36  ;;  %v2829_v50 = vmul.f32 %v5570_v8, %v2793_v60  ;;  %3860 = vrsqrt.f32 %v2701_v28  ;;  %v2643_v31 = vmul.f32 %v5719_v22, %v5719_v22 }
 0x5de   : > { %2896 = vst [vmem:[%s5591_s2 + $0x60] sm:$0xff] %v2864_v40  ;;  %v2439_v14 = vpop.xlane.xlu1 %2438  ;;  %v2640_v47 = vmul.f32 %v5721_v2, %v5721_v2 }
 0x5df   : > { %v2569_v17 = vpop.xlane.xlu0 %2568  ;;  %v2865_v4 = vadd.f32 %v5580_v51, %v2829_v50  ;;  %v5731_v41 = vmul.f32 0.03125, %v2439_v14 }
 0x5e0   : > { %v2610_v48 = vmul.f32 0.03125, %v2569_v17 }
 0x5e1   : > { %2897 = vst [vmem:[%s5591_s2 + $0x68] sm:$0xff] %v2865_v4  ;;  %v2641_v53 = vmul.f32 %v5731_v41, %v5731_v41 }
 0x5e2   : > { %v2674_v6 = vsub.f32 %v2610_v48, %v2642_v25  ;;  %v2571_v26 = vpop.xlane.xlu1 %2570 }
 0x5e3   : > { %v3855_v13 = vpop.eup %3854  ;;  %v2565_v9 = vpop.xlane.xlu0 %2564  ;;  %v2611_v5 = vmul.f32 0.03125, %v2571_v26 }
 0x5e4   : > { %v2798_v18 = vmul.f32 %v3855_v13, %v2766_v3  ;;  %v2706_v33 = vadd.f32 1e-05, %v2674_v6  ;;  %v2608_v21 = vmul.f32 0.03125, %v2565_v9  ;;  %v2770_v6 = vsub.f32 %v5482_v42, %v5713_v7 }
 0x5e5   : > { %v2675_v61 = vsub.f32 %v2611_v5, %v2643_v31 }
 0x5e6   : > { %v2834_v24 = vmul.f32 %v5570_v8, %v2798_v18  ;;  %3862 = vrsqrt.f32 %v2706_v33  ;;  %v2672_v38 = vsub.f32 %v2608_v21, %v2640_v47  ;;  %v3857_v16 = vpop.eup %3856  ;;  %v2567_v45 = vpop.xlane.xlu1 %2566 }
 0x5e7   : > { %v2449_v32 = vpop.xlane.xlu0 %2448  ;;  %v3859_v37 = vpop.eup %3858  ;;  %v2799_v39 = vmul.f32 %v3857_v16, %v2767_v1  ;;  %v2707_v43 = vadd.f32 1e-05, %v2675_v61  ;;  %v2609_v34 = vmul.f32 0.03125, %v2567_v45  ;;  %v2771_v61 = vsub.f32 %v5493_v19, %v5719_v22 }
 0x5e8   : > { %v2870_v59 = vadd.f32 %v5580_v51, %v2834_v24  ;;  %v2796_v52 = vmul.f32 %v3859_v37, %v2764_v15  ;;  %v2704_v44 = vadd.f32 1e-05, %v2672_v38  ;;  %v5749_v40 = vmul.f32 0.03125, %v2449_v32 }
 0x5e9   : > { %v2835_v62 = vmul.f32 %v5570_v8, %v2799_v39  ;;  %3864 = vrsqrt.f32 %v2707_v43  ;;  %v2673_v12 = vsub.f32 %v2609_v34, %v2641_v53  ;;  %v2768_v15 = vsub.f32 %v5490_v58, %v5721_v2 }
 0x5ea   : > { %2902 = vst [vmem:[%s5591_s2 + $0x90] sm:$0xff] %v2870_v59  ;;  %v3861_v57 = vpop.eup %3860  ;;  %v2832_v55 = vmul.f32 %v5570_v8, %v2796_v52  ;;  %3866 = vrsqrt.f32 %v2704_v44  ;;  %v2451_v46 = vpop.xlane.xlu1 %2450  ;;  %v2646_v48 = vmul.f32 %v5749_v40, %v5749_v40  ;;  %v2769_v52 = vsub.f32 %v5499_v10, %v5731_v41 }
 0x5eb   : > { %v2445_v29 = vpop.xlane.xlu0 %2444  ;;  %v2871_v36 = vadd.f32 %v5580_v51, %v2835_v62  ;;  %v2797_v60 = vmul.f32 %v3861_v57, %v2765_v56  ;;  %v2705_v28 = vadd.f32 1e-05, %v2673_v12  ;;  %v5755_v50 = vmul.f32 0.03125, %v2451_v46 }
 0x5ec   : > { %v2868_v54 = vadd.f32 %v5580_v51, %v2832_v55  ;;  %v5757_v17 = vmul.f32 0.03125, %v2445_v29 }
 0x5ed   : > { %2903 = vst [vmem:[%s5591_s2 + $0x98] sm:$0xff] %v2871_v36  ;;  %v2833_v27 = vmul.f32 %v5570_v8, %v2797_v60  ;;  %3868 = vrsqrt.f32 %v2705_v28  ;;  %v2647_v47 = vmul.f32 %v5755_v50, %v5755_v50 }
 0x5ee   : > { %2900 = vst [vmem:[%s5591_s2 + $0x80] sm:$0xff] %v2868_v54  ;;  %v2447_v14 = vpop.xlane.xlu1 %2446  ;;  %v2644_v9 = vmul.f32 %v5757_v17, %v5757_v17 }
 0x5ef   : > { %v2577_v4 = vpop.xlane.xlu0 %2576  ;;  %v2869_v25 = vadd.f32 %v5580_v51, %v2833_v27  ;;  %v5767_v26 = vmul.f32 0.03125, %v2447_v14 }
 0x5f0   : > { %v2614_v3 = vmul.f32 0.03125, %v2577_v4 }
 0x5f1   : > { %2901 = vst [vmem:[%s5591_s2 + $0x88] sm:$0xff] %v2869_v25  ;;  %v2645_v53 = vmul.f32 %v5767_v26, %v5767_v26  ;;  %v2774_v25 = vsub.f32 %v5510_v35, %v5749_v40 }
 0x5f2   : > { %v2678_v13 = vsub.f32 %v2614_v3, %v2646_v48  ;;  %v2579_v18 = vpop.xlane.xlu1 %2578 }
 0x5f3   : > { %v3863_v31 = vpop.eup %3862  ;;  %v2573_v5 = vpop.xlane.xlu0 %2572  ;;  %v2615_v21 = vmul.f32 0.03125, %v2579_v18 }
 0x5f4   : > { %v2802_v33 = vmul.f32 %v3863_v31, %v2770_v6  ;;  %v2710_v1 = vadd.f32 1e-05, %v2678_v13  ;;  %v2612_v24 = vmul.f32 0.03125, %v2573_v5 }
 0x5f5   : > { %v2679_v7 = vsub.f32 %v2615_v21, %v2647_v47 }
 0x5f6   : > { %v2838_v42 = vmul.f32 %v5570_v8, %v2802_v33  ;;  %3870 = vrsqrt.f32 %v2710_v1  ;;  %v2676_v38 = vsub.f32 %v2612_v24, %v2644_v9  ;;  %v3865_v16 = vpop.eup %3864  ;;  %v2575_v45 = vpop.xlane.xlu1 %2574  ;;  %v2775_v1 = vsub.f32 %v5521_v63, %v5755_v50 }
 0x5f7   : > { %v2457_v32 = vpop.xlane.xlu0 %2456  ;;  %v3867_v37 = vpop.eup %3866  ;;  %v2803_v39 = vmul.f32 %v3865_v16, %v2771_v61  ;;  %v2711_v19 = vadd.f32 1e-05, %v2679_v7  ;;  %v2613_v22 = vmul.f32 0.03125, %v2575_v45 }
 0x5f8   : > { %v2874_v59 = vadd.f32 %v5580_v51, %v2838_v42  ;;  %v2800_v43 = vmul.f32 %v3867_v37, %v2768_v15  ;;  %v2708_v34 = vadd.f32 1e-05, %v2676_v38  ;;  %v5789_v36 = vmul.f32 0.03125, %v2457_v32 }
 0x5f9   : > { %v2839_v44 = vmul.f32 %v5570_v8, %v2803_v39  ;;  %3872 = vrsqrt.f32 %v2711_v19  ;;  %v2677_v58 = vsub.f32 %v2613_v22, %v2645_v53  ;;  %v2772_v42 = vsub.f32 %v5518_v49, %v5757_v17 }
 0x5fa   : > { %2906 = vst [vmem:[%s5591_s2 + $0xb0] sm:$0xff] %v2874_v59  ;;  %v3869_v2 = vpop.eup %3868  ;;  %v2836_v56 = vmul.f32 %v5570_v8, %v2800_v43  ;;  %3874 = vrsqrt.f32 %v2708_v34  ;;  %v2459_v62 = vpop.xlane.xlu1 %2458  ;;  %v2650_v13 = vmul.f32 %v5789_v36, %v5789_v36  ;;  %v2773_v37 = vsub.f32 %v5527_v0, %v5767_v26 }
 0x5fb   : > { %v2453_v12 = vpop.xlane.xlu0 %2452  ;;  %v2875_v57 = vadd.f32 %v5580_v51, %v2839_v44  ;;  %v2801_v55 = vmul.f32 %v3869_v2, %v2769_v52  ;;  %v2709_v46 = vadd.f32 1e-05, %v2677_v58  ;;  %v2491_v6 = vmul.f32 0.03125, %v2459_v62 }
 0x5fc   : > { %v2872_v29 = vadd.f32 %v5580_v51, %v2836_v56  ;;  %v2488_v10 = vmul.f32 0.03125, %v2453_v12  ;;  %v2778_v12 = vsub.f32 %v5538_v11, %v5789_v36 }
 0x5fd   : > { %2907 = vst [vmem:[%s5591_s2 + $0xb8] sm:$0xff] %v2875_v57  ;;  %v2837_v41 = vmul.f32 %v5570_v8, %v2801_v55  ;;  %3876 = vrsqrt.f32 %v2709_v46  ;;  %v2651_v7 = vmul.f32 %v2491_v6, %v2491_v6 }
 0x5fe   : > { %2904 = vst [vmem:[%s5591_s2 + $0xa0] sm:$0xff] %v2872_v29  ;;  %v2455_v60 = vpop.xlane.xlu1 %2454  ;;  %v2648_v14 = vmul.f32 %v2488_v10, %v2488_v10  ;;  %v2776_v26 = vsub.f32 %v5546_v20, %v2488_v10  ;;  %v2779_v20 = vsub.f32 %v5549_v23, %v2491_v6 }
 0x5ff   : > { %v2581_v28 = vpop.xlane.xlu0 %2580  ;;  %v2873_v54 = vadd.f32 %v5580_v51, %v2837_v41  ;;  %v2489_v27 = vmul.f32 0.03125, %v2455_v60 }
 0x600   : > { %v2616_v4 = vmul.f32 0.03125, %v2581_v28 }
 0x601   : > { %2905 = vst [vmem:[%s5591_s2 + $0xa8] sm:$0xff] %v2873_v54  ;;  %v2649_v31 = vmul.f32 %v2489_v27, %v2489_v27  ;;  %v2777_v2 = vsub.f32 %v5555_v30, %v2489_v27 }
 0x602   : > { %v2680_v48 = vsub.f32 %v2616_v4, %v2648_v14  ;;  %v2583_v47 = vpop.xlane.xlu1 %2582 }
 0x603   : > { %v3871_v3 = vpop.eup %3870  ;;  %v2585_v9 = vpop.xlane.xlu0 %2584  ;;  %v2617_v5 = vmul.f32 0.03125, %v2583_v47 }
 0x604   : > { %v2806_v18 = vmul.f32 %v3871_v3, %v2774_v25  ;;  %v2712_v33 = vadd.f32 1e-05, %v2680_v48  ;;  %v2618_v21 = vmul.f32 0.03125, %v2585_v9 }
 0x605   : > { %v2681_v61 = vsub.f32 %v2617_v5, %v2649_v31 }
 0x606   : > { %v2842_v24 = vmul.f32 %v5570_v8, %v2806_v18  ;;  %3878 = vrsqrt.f32 %v2712_v33  ;;  %v2682_v35 = vsub.f32 %v2618_v21, %v2650_v13  ;;  %v3873_v40 = vpop.eup %3872  ;;  %v2587_v38 = vpop.xlane.xlu1 %2586 }
 0x607   : > { %v3875_v16 = vpop.eup %3874  ;;  %v2807_v15 = vmul.f32 %v3873_v40, %v2775_v1  ;;  %v2713_v45 = vadd.f32 1e-05, %v2681_v61  ;;  %v2619_v32 = vmul.f32 0.03125, %v2587_v38 }
 0x608   : > { %v2878_v53 = vadd.f32 %v5580_v51, %v2842_v24  ;;  %v2804_v63 = vmul.f32 %v3875_v16, %v2772_v42  ;;  %v2714_v50 = vadd.f32 1e-05, %v2682_v35 }
 0x609   : > { %v2843_v39 = vmul.f32 %v5570_v8, %v2807_v15  ;;  %3880 = vrsqrt.f32 %v2713_v45  ;;  %v2683_v49 = vsub.f32 %v2619_v32, %v2651_v7 }
 0x60a   : > { %2910 = vst [vmem:[%s5591_s2 + $0xd0] sm:$0xff] %v2878_v53  ;;  %v3877_v17 = vpop.eup %3876  ;;  %v2840_v59 = vmul.f32 %v5570_v8, %v2804_v63  ;;  %3882 = vrsqrt.f32 %v2714_v50 }
 0x60b   : > { %v2879_v19 = vadd.f32 %v5580_v51, %v2843_v39  ;;  %v2805_v22 = vmul.f32 %v3877_v17, %v2773_v37  ;;  %v2715_v43 = vadd.f32 1e-05, %v2683_v49 }
 0x60c   : > { %v2876_v34 = vadd.f32 %v5580_v51, %v2840_v59 }
 0x60d   : > { %2911 = vst [vmem:[%s5591_s2 + $0xd8] sm:$0xff] %v2879_v19  ;;  %v2841_v52 = vmul.f32 %v5570_v8, %v2805_v22  ;;  %3884 = vrsqrt.f32 %v2715_v43 }
 0x60e   : > { %2908 = vst [vmem:[%s5591_s2 + $0xc0] sm:$0xff] %v2876_v34 }
 0x60f   : > { %v2877_v0 = vadd.f32 %v5580_v51, %v2841_v52 }
 0x611   : > { %2909 = vst [vmem:[%s5591_s2 + $0xc8] sm:$0xff] %v2877_v0 }
 0x613   : > { %v3879_v44 = vpop.eup %3878 }
 0x614   : > { %v2808_v58 = vmul.f32 %v3879_v44, %v2776_v26 }
 0x616   : > { %v2844_v56 = vmul.f32 %v5570_v8, %v2808_v58  ;;  %v3881_v62 = vpop.eup %3880 }
 0x617   : > { %v3883_v57 = vpop.eup %3882  ;;  %v2809_v55 = vmul.f32 %v3881_v62, %v2777_v2 }
 0x618   : > { %v2880_v46 = vadd.f32 %v5580_v51, %v2844_v56  ;;  %v2810_v29 = vmul.f32 %v3883_v57, %v2778_v12 }
 0x619   : > { %v2845_v10 = vmul.f32 %v5570_v8, %v2809_v55 }
 0x61a   : > { %2912 = vst [vmem:[%s5591_s2 + $0xe0] sm:$0xff] %v2880_v46  ;;  %v3885_v30 = vpop.eup %3884  ;;  %v2846_v41 = vmul.f32 %v5570_v8, %v2810_v29 }
 0x61b   : > { %v2881_v60 = vadd.f32 %v5580_v51, %v2845_v10  ;;  %v2811_v11 = vmul.f32 %v3885_v30, %v2779_v20 }
 0x61c   : > { %v2882_v36 = vadd.f32 %v5580_v51, %v2846_v41 }
 0x61d   : > { %2913 = vst [vmem:[%s5591_s2 + $0xe8] sm:$0xff] %v2881_v60  ;;  %v2847_v28 = vmul.f32 %v5570_v8, %v2811_v11 }
 0x61e   : > { %2914 = vst [vmem:[%s5591_s2 + $0xf0] sm:$0xff] %v2882_v36 }
 0x61f   : > { %v2883_v23 = vadd.f32 %v5580_v51, %v2847_v28 }
 0x621   : > { %2915 = vst [vmem:[%s5591_s2 + $0xf8] sm:$0xff] %v2883_v23 }
 0x622   : > { %4083 = shalt.err (!%p4080_p3)
}
 0x623   : > { %s4084_s26 = scalar_lea.hbm %s5835_s21, 4096  ;;  %s4088_s16 = scalar_lea.hbm %s5890_s8, 8192 }
 0x624   : > { %p4085_p4 = scmp.ne.s32.totalorder %s5835_s21, %s4084_s26  ;;  %p4089_p0 = scmp.lt.s32.totalorder %s5835_s21, %s5890_s8 }
 0x625   : > { %p4090_p7 = scmp.lt.s32.totalorder %s4088_s16, %s4084_s26 }
 0x626   : > { %p4086_p6 = pnand %p4085_p4, %p6040_p8 }
 0x627   : > { %p4091_p2 = por %p4090_p7, %p4089_p0 }
 0x628   : > { %p4087_p12 = pneg %p4086_p6 }
 0x62a   : > { %p4092_p9 = pnand %p4091_p2, %p4087_p12 }
 0x62c   : > { %4095 = shalt.err (!%p4092_p9)
}
 0x62d   : > { %s4158_s12 = smov 128   ;;  %s4159_s20 = smov 8  }
 0x62e   : > { %3553 = dma.vmem_to_hbm [thread:$0]  (%p6040_p8), %s5837_s18, 4096, %s5835_s21, %s2917_s11, %s4158_s12, %s4158_s12, %s4159_s20  }
 0x62f PF: > { %s2945_s25 = sand.u32 1, %s4134_s27   ;;  %p6041_p10 = scmp.ne.s32.totalorder %s5947_s10, 0 }
 0x630   : > { %p6042_p11 = scmp.ge.s32.totalorder %s4146_s30, 2  ;;  %s2946_s22 = scalar_lea.sflag [#allocation4], %s2945_s25 }
 0x632   : > { %p3579_p13 = pnand %p6042_p11, %p6041_p10 }
 0x634   : > { %p3580_p5 = pneg %p3579_p13 }
 0x636   : > { %4129 = dma.done.wait (%p3580_p5), %s2946_s22, 4096  }
 0x637   : > { %4131 = vsyncadd (%p3580_p5), %s2946_s22, 4294963200  ;;  %p24_p1 = scmp.ge.s32.totalorder %s4323_s15, 4   ;;  %s6043_s27 = smov %s4138_s28 }
 0x638   : > { %s6044_s28 = smov %s4142_s29  ;;  %s6045_s29 = smov %s4334_s17 }
 0x639   : > { %s6046_s30 = smov %s4323_s15  ;;  %26 = sbr.rel (!%p24_p1) target bundleno = 11 (0xb), region = 121 }
 0x63e   :  { %2951 = vsyncpa [#allocation3], 1 }
 0x63f   :  { %2953 = vsyncpa [#allocation3 + $0x1], 1 }
 0x640   :  { %2954 = vsyncpa [#allocation6], 1 }
 0x641   :  { %2955 = vsyncpa [#allocation9], 1 }
 0x642   :  { %2956 = vsyncpa [#allocation12], 1 }
 0x643   :  { %2957 = vsyncpa [#allocation4], 1 }
 0x644   :  { %2959 = vsyncpa [#allocation4 + $0x1], 1 }

</bundles_post_ra>
